<compile_context>
chip_gen: v7x
topology: tpu7x:2x2x1
jax: 0.10.0
libtpu: 0.0.40
codegen_flags: <defaults>
</compile_context>

<pallas_src>
import functools
import math

import jax
import jax.numpy as jnp
from jax.experimental import pallas as pl
from jax.experimental.pallas import tpu as pltpu


# -----------------------------------------------------------------------------
# Fused Pallas kernel: whole decoder forward (full batch) in one invocation
# -----------------------------------------------------------------------------
def _fused_decoder_kernel(*refs, num_heads, num_layers, num_head_layers, eps):
    x_ref, zs_ref, pe_ref, mask_self_ref, mask_cross_ref = refs[:5]
    (w_sa_qkv, b_sa_qkv, w_sa_o, b_sa_o,
     w_ca_q, b_ca_q, w_ca_kv, b_ca_kv, w_ca_o, b_ca_o,
     w_ff1, b_ff1, w_ff2, b_ff2, ln_g, ln_b) = refs[5:21]
    head_refs = refs[21:21 + 2 * num_head_layers]
    o_ref = refs[-1]

    x = x_ref[...].astype(jnp.float32) + pe_ref[...].astype(jnp.float32)   # [B*T, D]
    mem = zs_ref[...].astype(jnp.float32)                                   # [B*S, D]
    mask_self = mask_self_ref[...]                                          # [B*T, B*T]
    mask_cross = mask_cross_ref[...]                                        # [B*T, B*S]

    N, D = x.shape
    H = num_heads
    dh = D // H
    scale = 1.0 / math.sqrt(dh)

    def ln(y, g, b):
        mu = jnp.mean(y, axis=-1, keepdims=True)
        var = jnp.mean((y - mu) ** 2, axis=-1, keepdims=True)
        return (y - mu) * jax.lax.rsqrt(var + eps) * g + b

    def attend(q, k, v, w_o, b_o, mask_add):
        # q: [N, D], k/v: [M, D]. Static per-head lane slices; accumulate the
        # output projection per head (avoids a lane-concat).
        acc = jnp.zeros((q.shape[0], D), jnp.float32)
        for h in range(H):
            sl = slice(h * dh, (h + 1) * dh)
            s = jax.lax.dot_general(
                q[:, sl], k[:, sl], (((1,), (1,)), ((), ())),
                preferred_element_type=jnp.float32) * scale
            s = s + mask_add
            s = s - jnp.max(s, axis=-1, keepdims=True)
            p = jnp.exp(s)
            p = p * pl.reciprocal(jnp.sum(p, axis=-1, keepdims=True), approx=True)
            oh = jnp.dot(p, v[:, sl], preferred_element_type=jnp.float32)        # [N, dh]
            acc = acc + jnp.dot(oh, w_o[sl, :], preferred_element_type=jnp.float32)
        return acc + b_o

    for l in range(num_layers):
        g_all = ln_g[l]   # [3, D]
        b_all = ln_b[l]   # [3, D]

        # ---- causal self-attention (fused QKV matmul, per-batch causal mask) ----
        qkv = jnp.dot(x, w_sa_qkv[l], preferred_element_type=jnp.float32) + b_sa_qkv[l]
        q, k, v = qkv[:, :D], qkv[:, D:2 * D], qkv[:, 2 * D:]
        sa = attend(q, k, v, w_sa_o[l], b_sa_o[l], mask_self)
        x = ln(x + sa, g_all[0:1], b_all[0:1])

        # ---- cross-attention over zs (fused KV matmul, batch-diagonal mask) -----
        q = jnp.dot(x, w_ca_q[l], preferred_element_type=jnp.float32) + b_ca_q[l]
        kv = jnp.dot(mem, w_ca_kv[l], preferred_element_type=jnp.float32) + b_ca_kv[l]
        k, v = kv[:, :D], kv[:, D:]
        ca = attend(q, k, v, w_ca_o[l], b_ca_o[l], mask_cross)
        x = ln(x + ca, g_all[1:2], b_all[1:2])

        # ---- feed-forward --------------------------------------------------------
        h1 = jnp.dot(x, w_ff1[l], preferred_element_type=jnp.float32) + b_ff1[l]
        h1 = jnp.maximum(h1, 0.0)
        h2 = jnp.dot(h1, w_ff2[l], preferred_element_type=jnp.float32) + b_ff2[l]
        x = ln(x + h2, g_all[2:3], b_all[2:3])

    # ---- MLP head -----------------------------------------------------------------
    h = x
    for i in range(num_head_layers):
        w = head_refs[2 * i][...]
        b = head_refs[2 * i + 1][...]
        h = jnp.dot(h, w, preferred_element_type=jnp.float32) + b
        if i < num_head_layers - 1:
            h = jnp.maximum(h, 0.0)

    o_ref[...] = h.astype(o_ref.dtype)


def _const_index_map(nd):
    return lambda i: (0,) * nd


_STACK_NAMES = [
    "w_sa_qkv", "b_sa_qkv", "w_sa_o", "b_sa_o",
    "w_ca_q", "b_ca_q", "w_ca_kv", "b_ca_kv", "w_ca_o", "b_ca_o",
    "w_ff1", "b_ff1", "w_ff2", "b_ff2", "ln_g", "ln_b",
]


# -----------------------------------------------------------------------------
# Forward wrapper: flattens batch, builds masks/specs, issues one pallas_call
# -----------------------------------------------------------------------------
def spatial_decoder_forward(packed, hp, loc_tgt, loc_tgt_embed, zs):
    del loc_tgt  # TODO(synk): see note at top of file (mask built from length only)
    B, T, D = loc_tgt_embed.shape
    S = zs.shape[1]
    num_heads = hp["head_num_loc"]
    num_layers = hp["num_dec_loc"]
    head = packed["head"]                # list of (w [K,N], b [1,N])
    num_head_layers = len(head)
    out_dim = head[-1][0].shape[1]

    # Flatten batch into rows (contiguous reshape — free in XLA).
    x_flat = loc_tgt_embed.reshape(B * T, D)
    zs_flat = zs.reshape(B * S, D)
    pe_flat = jnp.tile(packed["pos_enc"][:T], (B, 1))       # [B*T, D]

    # Additive masks enforcing per-batch attention on the flattened rows.
    neg = jnp.float32(-1e9)
    r = jnp.arange(B * T)
    ct = jnp.arange(B * T)
    same_b = (r[:, None] // T) == (ct[None, :] // T)
    causal = (r[:, None] % T) >= (ct[None, :] % T)
    mask_self = jnp.where(same_b & causal, 0.0, neg).astype(jnp.float32)    # [B*T, B*T]
    cs = jnp.arange(B * S)
    same_b_x = (r[:, None] // T) == (cs[None, :] // S)
    mask_cross = jnp.where(same_b_x, 0.0, neg).astype(jnp.float32)          # [B*T, B*S]

    stacks = [packed[name] for name in _STACK_NAMES]
    head_flat = [a for pair in head for a in pair]
    inputs = [x_flat, zs_flat, pe_flat, mask_self, mask_cross] + stacks + head_flat

    # All blocks are full-extent (== array dims), so the (8,128) divisibility rule
    # does not apply; everything is DMA'd to VMEM once and stays resident.
    in_specs = [pl.BlockSpec(a.shape, _const_index_map(a.ndim)) for a in inputs]

    kernel = functools.partial(
        _fused_decoder_kernel,
        num_heads=num_heads,
        num_layers=num_layers,
        num_head_layers=num_head_layers,
        eps=1e-5,
    )

    out_flat = pl.pallas_call(
        kernel,
        out_shape=jax.ShapeDtypeStruct((B * T, out_dim), loc_tgt_embed.dtype),
        grid=(1,),
        in_specs=in_specs,
        out_specs=pl.BlockSpec((B * T, out_dim), lambda i: (0, 0)),
        compiler_params=pltpu.CompilerParams(
            dimension_semantics=("arbitrary",),
        ),
    )(*inputs)
    return out_flat.reshape(B, T, out_dim)


# -----------------------------------------------------------------------------
# Positional encoding, parameter init, and packing (fused QKV / stacked layers)
# -----------------------------------------------------------------------------
def sinusoidal_pe(max_len, d_model):
    pos = jnp.arange(max_len, dtype=jnp.float32)[:, None]
    i = jnp.arange(0, d_model, 2, dtype=jnp.float32)[None, :]
    angle = pos / jnp.power(10000.0, i / d_model)
    pe = jnp.zeros((max_len, d_model), jnp.float32)
    pe = pe.at[:, 0::2].set(jnp.sin(angle))
    pe = pe.at[:, 1::2].set(jnp.cos(angle))
    return pe


def init_params(key, hp):
    D = hp["dim_embed_loc"]
    Dff = hp["dim_dec_loc"]
    dim_linear_list = [D] + hp["dim_LD_linear"] + [hp["lid_size"] + 3]
    max_len = hp["traj_len"] + 2

    def dense(k, fan_in, fan_out):
        w = jax.random.normal(k, (fan_in, fan_out), jnp.float32) * (1.0 / math.sqrt(fan_in))
        b = jnp.zeros((fan_out,), jnp.float32)
        return w, b

    keys = iter(jax.random.split(key, 256))

    def attn_params():
        wq, bq = dense(next(keys), D, D)
        wk, bk = dense(next(keys), D, D)
        wv, bv = dense(next(keys), D, D)
        wo, bo = dense(next(keys), D, D)
        return {"wq": wq, "bq": bq, "wk": wk, "bk": bk,
                "wv": wv, "bv": bv, "wo": wo, "bo": bo}

    layers = []
    for _ in range(hp["num_dec_loc"]):
        w1, b1 = dense(next(keys), D, Dff)
        w2, b2 = dense(next(keys), Dff, D)
        layers.append({
            "self_attn": attn_params(),
            "cross_attn": attn_params(),
            "w_ff1": w1, "b_ff1": b1, "w_ff2": w2, "b_ff2": b2,
            "ln1_g": jnp.ones((D,), jnp.float32), "ln1_b": jnp.zeros((D,), jnp.float32),
            "ln2_g": jnp.ones((D,), jnp.float32), "ln2_b": jnp.zeros((D,), jnp.float32),
            "ln3_g": jnp.ones((D,), jnp.float32), "ln3_b": jnp.zeros((D,), jnp.float32),
        })

    head = []
    for fi, fo in zip(dim_linear_list[:-1], dim_linear_list[1:]):
        head.append(dense(next(keys), fi, fo))

    return {"layers": layers, "head": head, "pos_enc": sinusoidal_pe(max_len, D)}


def pack_params(params):
    """One-time packing: fuse QKV / KV weights and stack per-layer params so the
    fused kernel can index them with a static layer loop."""
    layers = params["layers"]

    def stk(fn):
        return jnp.stack([fn(lp) for lp in layers], axis=0)

    packed = {
        "w_sa_qkv": stk(lambda lp: jnp.concatenate(
            [lp["self_attn"]["wq"], lp["self_attn"]["wk"], lp["self_attn"]["wv"]], axis=1)),
        "b_sa_qkv": stk(lambda lp: jnp.concatenate(
            [lp["self_attn"]["bq"], lp["self_attn"]["bk"], lp["self_attn"]["bv"]], axis=0)[None, :]),
        "w_sa_o": stk(lambda lp: lp["self_attn"]["wo"]),
        "b_sa_o": stk(lambda lp: lp["self_attn"]["bo"][None, :]),
        "w_ca_q": stk(lambda lp: lp["cross_attn"]["wq"]),
        "b_ca_q": stk(lambda lp: lp["cross_attn"]["bq"][None, :]),
        "w_ca_kv": stk(lambda lp: jnp.concatenate(
            [lp["cross_attn"]["wk"], lp["cross_attn"]["wv"]], axis=1)),
        "b_ca_kv": stk(lambda lp: jnp.concatenate(
            [lp["cross_attn"]["bk"], lp["cross_attn"]["bv"]], axis=0)[None, :]),
        "w_ca_o": stk(lambda lp: lp["cross_attn"]["wo"]),
        "b_ca_o": stk(lambda lp: lp["cross_attn"]["bo"][None, :]),
        "w_ff1": stk(lambda lp: lp["w_ff1"]),
        "b_ff1": stk(lambda lp: lp["b_ff1"][None, :]),
        "w_ff2": stk(lambda lp: lp["w_ff2"]),
        "b_ff2": stk(lambda lp: lp["b_ff2"][None, :]),
        "ln_g": stk(lambda lp: jnp.stack([lp["ln1_g"], lp["ln2_g"], lp["ln3_g"]], 0)),
        "ln_b": stk(lambda lp: jnp.stack([lp["ln1_b"], lp["ln2_b"], lp["ln3_b"]], 0)),
        "head": [(w, b[None, :]) for (w, b) in params["head"]],
        "pos_enc": params["pos_enc"],
    }
    return packed


# -----------------------------------------------------------------------------
# Main
# -----------------------------------------------------------------------------
if __name__ == "__main__":
    # Hyper-parameters implied by the module's __init__ (small, TPU-friendly).
    hp = {
        "dim_embed_loc": 32,
        "dim_LD_linear": [32],
        "lid_size": 13,            # output dim = lid_size + 3 = 16
        "head_num_loc": 4,
        "dim_dec_loc": 64,
        "num_dec_loc": 2,
        "traj_len": 6,             # decoder max length = traj_len + 2 = 8
    }
    B, T, S, D = 2, hp["traj_len"] + 2, 8, hp["dim_embed_loc"]

    key = jax.random.PRNGKey(0)
    k_param, k_tgt, k_emb, k_zs = jax.random.split(key, 4)

    params = init_params(k_param, hp)
    packed = pack_params(params)

    loc_tgt = jax.random.randint(k_tgt, (B, T), 0, hp["lid_size"] + 3, dtype=jnp.int32)
    loc_tgt_embed = jax.random.normal(k_emb, (B, T, D), jnp.float32)
    zs = jax.random.normal(k_zs, (B, S, D), jnp.float32)

    fwd = jax.jit(functools.partial(spatial_decoder_forward, packed, hp))
    loc_chain = fwd(loc_tgt, loc_tgt_embed, zs)
    jax.block_until_ready(loc_chain)

    assert loc_chain.shape == (B, T, hp["lid_size"] + 3), loc_chain.shape
    assert bool(jnp.all(jnp.isfinite(loc_chain)))
    print("KERNEL_OK")
</pallas_src>

<mosaic_0001>
module attributes {stable_mosaic.version = 11 : i64} {
  func.func @_fused_decoder_kernel(%arg0: i32, %arg1: memref<16x32xf32, #tpu.memory_space<vmem>>, %arg2: memref<16x32xf32, #tpu.memory_space<vmem>>, %arg3: memref<16x32xf32, #tpu.memory_space<vmem>>, %arg4: memref<16x16xf32, #tpu.memory_space<vmem>>, %arg5: memref<16x16xf32, #tpu.memory_space<vmem>>, %arg6: memref<2x32x96xf32, #tpu.memory_space<vmem>>, %arg7: memref<2x1x96xf32, #tpu.memory_space<vmem>>, %arg8: memref<2x32x32xf32, #tpu.memory_space<vmem>>, %arg9: memref<2x1x32xf32, #tpu.memory_space<vmem>>, %arg10: memref<2x32x32xf32, #tpu.memory_space<vmem>>, %arg11: memref<2x1x32xf32, #tpu.memory_space<vmem>>, %arg12: memref<2x32x64xf32, #tpu.memory_space<vmem>>, %arg13: memref<2x1x64xf32, #tpu.memory_space<vmem>>, %arg14: memref<2x32x32xf32, #tpu.memory_space<vmem>>, %arg15: memref<2x1x32xf32, #tpu.memory_space<vmem>>, %arg16: memref<2x32x64xf32, #tpu.memory_space<vmem>>, %arg17: memref<2x1x64xf32, #tpu.memory_space<vmem>>, %arg18: memref<2x64x32xf32, #tpu.memory_space<vmem>>, %arg19: memref<2x1x32xf32, #tpu.memory_space<vmem>>, %arg20: memref<2x3x32xf32, #tpu.memory_space<vmem>>, %arg21: memref<2x3x32xf32, #tpu.memory_space<vmem>>, %arg22: memref<32x32xf32, #tpu.memory_space<vmem>>, %arg23: memref<1x32xf32, #tpu.memory_space<vmem>>, %arg24: memref<32x16xf32, #tpu.memory_space<vmem>>, %arg25: memref<1x16xf32, #tpu.memory_space<vmem>>, %arg26: memref<16x16xf32, #tpu.memory_space<vmem>>) attributes {dimension_semantics = [#tpu.dimension_semantics<arbitrary>], iteration_bounds = array<i64: 1>, scalar_prefetch = 0 : i64, scratch_operands = 0 : i64, tpu.core_type = #tpu.core_type<tc>, window_params = [{pipeline_mode = #tpu.pipeline_mode<synchronous>, transform_indices = @transform_0, window_bounds = array<i64: 16, 32>}, {pipeline_mode = #tpu.pipeline_mode<synchronous>, transform_indices = @transform_1, window_bounds = array<i64: 16, 32>}, {pipeline_mode = #tpu.pipeline_mode<synchronous>, transform_indices = @transform_2, window_bounds = array<i64: 16, 32>}, {pipeline_mode = #tpu.pipeline_mode<synchronous>, transform_indices = @transform_3, window_bounds = array<i64: 16, 16>}, {pipeline_mode = #tpu.pipeline_mode<synchronous>, transform_indices = @transform_4, window_bounds = array<i64: 16, 16>}, {pipeline_mode = #tpu.pipeline_mode<synchronous>, transform_indices = @transform_5, window_bounds = array<i64: 2, 32, 96>}, {pipeline_mode = #tpu.pipeline_mode<synchronous>, transform_indices = @transform_6, window_bounds = array<i64: 2, 1, 96>}, {pipeline_mode = #tpu.pipeline_mode<synchronous>, transform_indices = @transform_7, window_bounds = array<i64: 2, 32, 32>}, {pipeline_mode = #tpu.pipeline_mode<synchronous>, transform_indices = @transform_8, window_bounds = array<i64: 2, 1, 32>}, {pipeline_mode = #tpu.pipeline_mode<synchronous>, transform_indices = @transform_9, window_bounds = array<i64: 2, 32, 32>}, {pipeline_mode = #tpu.pipeline_mode<synchronous>, transform_indices = @transform_10, window_bounds = array<i64: 2, 1, 32>}, {pipeline_mode = #tpu.pipeline_mode<synchronous>, transform_indices = @transform_11, window_bounds = array<i64: 2, 32, 64>}, {pipeline_mode = #tpu.pipeline_mode<synchronous>, transform_indices = @transform_12, window_bounds = array<i64: 2, 1, 64>}, {pipeline_mode = #tpu.pipeline_mode<synchronous>, transform_indices = @transform_13, window_bounds = array<i64: 2, 32, 32>}, {pipeline_mode = #tpu.pipeline_mode<synchronous>, transform_indices = @transform_14, window_bounds = array<i64: 2, 1, 32>}, {pipeline_mode = #tpu.pipeline_mode<synchronous>, transform_indices = @transform_15, window_bounds = array<i64: 2, 32, 64>}, {pipeline_mode = #tpu.pipeline_mode<synchronous>, transform_indices = @transform_16, window_bounds = array<i64: 2, 1, 64>}, {pipeline_mode = #tpu.pipeline_mode<synchronous>, transform_indices = @transform_17, window_bounds = array<i64: 2, 64, 32>}, {pipeline_mode = #tpu.pipeline_mode<synchronous>, transform_indices = @transform_18, window_bounds = array<i64: 2, 1, 32>}, {pipeline_mode = #tpu.pipeline_mode<synchronous>, transform_indices = @transform_19, window_bounds = array<i64: 2, 3, 32>}, {pipeline_mode = #tpu.pipeline_mode<synchronous>, transform_indices = @transform_20, window_bounds = array<i64: 2, 3, 32>}, {pipeline_mode = #tpu.pipeline_mode<synchronous>, transform_indices = @transform_21, window_bounds = array<i64: 32, 32>}, {pipeline_mode = #tpu.pipeline_mode<synchronous>, transform_indices = @transform_22, window_bounds = array<i64: 1, 32>}, {pipeline_mode = #tpu.pipeline_mode<synchronous>, transform_indices = @transform_23, window_bounds = array<i64: 32, 16>}, {pipeline_mode = #tpu.pipeline_mode<synchronous>, transform_indices = @transform_24, window_bounds = array<i64: 1, 16>}, {pipeline_mode = #tpu.pipeline_mode<synchronous>, transform_indices = @transform_25, window_bounds = array<i64: 16, 16>}]} {
    %c0 = arith.constant 0 : index
    %c0_0 = arith.constant 0 : index
    %0 = vector.load %arg1[%c0, %c0_0] : memref<16x32xf32, #tpu.memory_space<vmem>>, vector<16x32xf32>
    %c0_1 = arith.constant 0 : index
    %c0_2 = arith.constant 0 : index
    %1 = vector.load %arg3[%c0_1, %c0_2] : memref<16x32xf32, #tpu.memory_space<vmem>>, vector<16x32xf32>
    %2 = arith.addf %0, %1 : vector<16x32xf32>
    %c0_3 = arith.constant 0 : index
    %c0_4 = arith.constant 0 : index
    %3 = vector.load %arg2[%c0_3, %c0_4] : memref<16x32xf32, #tpu.memory_space<vmem>>, vector<16x32xf32>
    %c0_5 = arith.constant 0 : index
    %c0_6 = arith.constant 0 : index
    %4 = vector.load %arg4[%c0_5, %c0_6] : memref<16x16xf32, #tpu.memory_space<vmem>>, vector<16x16xf32>
    %c0_7 = arith.constant 0 : index
    %c0_8 = arith.constant 0 : index
    %5 = vector.load %arg5[%c0_7, %c0_8] : memref<16x16xf32, #tpu.memory_space<vmem>>, vector<16x16xf32>
    %c0_9 = arith.constant 0 : index
    %c0_10 = arith.constant 0 : index
    %c0_11 = arith.constant 0 : index
    %6 = vector.load %arg20[%c0_9, %c0_10, %c0_11] : memref<2x3x32xf32, #tpu.memory_space<vmem>>, vector<1x3x32xf32>
    %7 = vector.shape_cast %6 : vector<1x3x32xf32> to vector<3x32xf32>
    %c0_12 = arith.constant 0 : index
    %c0_13 = arith.constant 0 : index
    %c0_14 = arith.constant 0 : index
    %8 = vector.load %arg21[%c0_12, %c0_13, %c0_14] : memref<2x3x32xf32, #tpu.memory_space<vmem>>, vector<1x3x32xf32>
    %9 = vector.shape_cast %8 : vector<1x3x32xf32> to vector<3x32xf32>
    %c0_15 = arith.constant 0 : index
    %c0_16 = arith.constant 0 : index
    %c0_17 = arith.constant 0 : index
    %10 = vector.load %arg6[%c0_15, %c0_16, %c0_17] : memref<2x32x96xf32, #tpu.memory_space<vmem>>, vector<1x32x96xf32>
    %11 = vector.shape_cast %10 : vector<1x32x96xf32> to vector<32x96xf32>
    %cst = arith.constant dense<0.000000e+00> : vector<16x96xf32>
    %12 = tpu.matmul %2, %11, %cst {dimension_numbers = #tpu.dot_dimension_numbers<[1], [0], [0], [1], [0, 0, 1, 1], [], []>} : vector<16x32xf32>, vector<32x96xf32>, vector<16x96xf32> -> vector<16x96xf32>
    %c0_18 = arith.constant 0 : index
    %c0_19 = arith.constant 0 : index
    %c0_20 = arith.constant 0 : index
    %13 = vector.load %arg7[%c0_18, %c0_19, %c0_20] : memref<2x1x96xf32, #tpu.memory_space<vmem>>, vector<1x1x96xf32>
    %14 = vector.shape_cast %13 : vector<1x1x96xf32> to vector<1x96xf32>
    %15 = vector.broadcast %14 : vector<1x96xf32> to vector<16x96xf32>
    %16 = arith.addf %12, %15 : vector<16x96xf32>
    %17 = vector.extract_strided_slice %16 {offsets = [0, 0], sizes = [16, 32], strides = [1, 1]} : vector<16x96xf32> to vector<16x32xf32>
    %18 = vector.extract_strided_slice %16 {offsets = [0, 32], sizes = [16, 32], strides = [1, 1]} : vector<16x96xf32> to vector<16x32xf32>
    %19 = vector.extract_strided_slice %16 {offsets = [0, 64], sizes = [16, 32], strides = [1, 1]} : vector<16x96xf32> to vector<16x32xf32>
    %c0_21 = arith.constant 0 : index
    %c0_22 = arith.constant 0 : index
    %c0_23 = arith.constant 0 : index
    %20 = vector.load %arg8[%c0_21, %c0_22, %c0_23] : memref<2x32x32xf32, #tpu.memory_space<vmem>>, vector<1x32x32xf32>
    %21 = vector.shape_cast %20 : vector<1x32x32xf32> to vector<32x32xf32>
    %c0_24 = arith.constant 0 : index
    %c0_25 = arith.constant 0 : index
    %c0_26 = arith.constant 0 : index
    %22 = vector.load %arg9[%c0_24, %c0_25, %c0_26] : memref<2x1x32xf32, #tpu.memory_space<vmem>>, vector<1x1x32xf32>
    %23 = vector.shape_cast %22 : vector<1x1x32xf32> to vector<1x32xf32>
    %cst_27 = arith.constant 0.000000e+00 : f32
    %24 = vector.broadcast %cst_27 : f32 to vector<16x32xf32>
    %25 = vector.extract_strided_slice %17 {offsets = [0, 0], sizes = [16, 8], strides = [1, 1]} : vector<16x32xf32> to vector<16x8xf32>
    %26 = vector.extract_strided_slice %18 {offsets = [0, 0], sizes = [16, 8], strides = [1, 1]} : vector<16x32xf32> to vector<16x8xf32>
    %cst_28 = arith.constant dense<0.000000e+00> : vector<16x16xf32>
    %27 = tpu.matmul %25, %26, %cst_28 {dimension_numbers = #tpu.dot_dimension_numbers<[1], [1], [0], [0], [0, 0, 1, 0], [], []>} : vector<16x8xf32>, vector<16x8xf32>, vector<16x16xf32> -> vector<16x16xf32>
    %cst_29 = arith.constant 0.353553385 : f32
    %28 = vector.broadcast %cst_29 : f32 to vector<16x16xf32>
    %29 = arith.mulf %27, %28 : vector<16x16xf32>
    %30 = arith.addf %29, %4 : vector<16x16xf32>
    %cst_30 = arith.constant dense<0xFF800000> : vector<16xf32>
    %31 = vector.multi_reduction <maximumf>, %30, %cst_30 [1] : vector<16x16xf32> to vector<16xf32>
    %32 = vector.shape_cast %31 : vector<16xf32> to vector<16x1xf32>
    %33 = vector.broadcast %32 : vector<16x1xf32> to vector<16x16xf32>
    %34 = arith.subf %30, %33 : vector<16x16xf32>
    %35 = math.exp %34 : vector<16x16xf32>
    %cst_31 = arith.constant dense<0.000000e+00> : vector<16xf32>
    %36 = vector.multi_reduction <add>, %35, %cst_31 [1] : vector<16x16xf32> to vector<16xf32>
    %37 = vector.shape_cast %36 : vector<16xf32> to vector<16x1xf32>
    %38 = tpu.reciprocal %37 {approx = true} : vector<16x1xf32> -> vector<16x1xf32>
    %39 = vector.broadcast %38 : vector<16x1xf32> to vector<16x16xf32>
    %40 = arith.mulf %35, %39 : vector<16x16xf32>
    %41 = vector.extract_strided_slice %19 {offsets = [0, 0], sizes = [16, 8], strides = [1, 1]} : vector<16x32xf32> to vector<16x8xf32>
    %cst_32 = arith.constant dense<0.000000e+00> : vector<16x8xf32>
    %42 = tpu.matmul %40, %41, %cst_32 {dimension_numbers = #tpu.dot_dimension_numbers<[1], [0], [0], [1], [0, 0, 1, 1], [], []>} : vector<16x16xf32>, vector<16x8xf32>, vector<16x8xf32> -> vector<16x8xf32>
    %43 = vector.extract_strided_slice %21 {offsets = [0, 0], sizes = [8, 32], strides = [1, 1]} : vector<32x32xf32> to vector<8x32xf32>
    %cst_33 = arith.constant dense<0.000000e+00> : vector<16x32xf32>
    %44 = tpu.matmul %42, %43, %cst_33 {dimension_numbers = #tpu.dot_dimension_numbers<[1], [0], [0], [1], [0, 0, 1, 1], [], []>} : vector<16x8xf32>, vector<8x32xf32>, vector<16x32xf32> -> vector<16x32xf32>
    %45 = arith.addf %24, %44 : vector<16x32xf32>
    %46 = vector.extract_strided_slice %17 {offsets = [0, 8], sizes = [16, 8], strides = [1, 1]} : vector<16x32xf32> to vector<16x8xf32>
    %47 = vector.extract_strided_slice %18 {offsets = [0, 8], sizes = [16, 8], strides = [1, 1]} : vector<16x32xf32> to vector<16x8xf32>
    %cst_34 = arith.constant dense<0.000000e+00> : vector<16x16xf32>
    %48 = tpu.matmul %46, %47, %cst_34 {dimension_numbers = #tpu.dot_dimension_numbers<[1], [1], [0], [0], [0, 0, 1, 0], [], []>} : vector<16x8xf32>, vector<16x8xf32>, vector<16x16xf32> -> vector<16x16xf32>
    %cst_35 = arith.constant 0.353553385 : f32
    %49 = vector.broadcast %cst_35 : f32 to vector<16x16xf32>
    %50 = arith.mulf %48, %49 : vector<16x16xf32>
    %51 = arith.addf %50, %4 : vector<16x16xf32>
    %cst_36 = arith.constant dense<0xFF800000> : vector<16xf32>
    %52 = vector.multi_reduction <maximumf>, %51, %cst_36 [1] : vector<16x16xf32> to vector<16xf32>
    %53 = vector.shape_cast %52 : vector<16xf32> to vector<16x1xf32>
    %54 = vector.broadcast %53 : vector<16x1xf32> to vector<16x16xf32>
    %55 = arith.subf %51, %54 : vector<16x16xf32>
    %56 = math.exp %55 : vector<16x16xf32>
    %cst_37 = arith.constant dense<0.000000e+00> : vector<16xf32>
    %57 = vector.multi_reduction <add>, %56, %cst_37 [1] : vector<16x16xf32> to vector<16xf32>
    %58 = vector.shape_cast %57 : vector<16xf32> to vector<16x1xf32>
    %59 = tpu.reciprocal %58 {approx = true} : vector<16x1xf32> -> vector<16x1xf32>
    %60 = vector.broadcast %59 : vector<16x1xf32> to vector<16x16xf32>
    %61 = arith.mulf %56, %60 : vector<16x16xf32>
    %62 = vector.extract_strided_slice %19 {offsets = [0, 8], sizes = [16, 8], strides = [1, 1]} : vector<16x32xf32> to vector<16x8xf32>
    %cst_38 = arith.constant dense<0.000000e+00> : vector<16x8xf32>
    %63 = tpu.matmul %61, %62, %cst_38 {dimension_numbers = #tpu.dot_dimension_numbers<[1], [0], [0], [1], [0, 0, 1, 1], [], []>} : vector<16x16xf32>, vector<16x8xf32>, vector<16x8xf32> -> vector<16x8xf32>
    %64 = vector.extract_strided_slice %21 {offsets = [8, 0], sizes = [8, 32], strides = [1, 1]} : vector<32x32xf32> to vector<8x32xf32>
    %cst_39 = arith.constant dense<0.000000e+00> : vector<16x32xf32>
    %65 = tpu.matmul %63, %64, %cst_39 {dimension_numbers = #tpu.dot_dimension_numbers<[1], [0], [0], [1], [0, 0, 1, 1], [], []>} : vector<16x8xf32>, vector<8x32xf32>, vector<16x32xf32> -> vector<16x32xf32>
    %66 = arith.addf %45, %65 : vector<16x32xf32>
    %67 = vector.extract_strided_slice %17 {offsets = [0, 16], sizes = [16, 8], strides = [1, 1]} : vector<16x32xf32> to vector<16x8xf32>
    %68 = vector.extract_strided_slice %18 {offsets = [0, 16], sizes = [16, 8], strides = [1, 1]} : vector<16x32xf32> to vector<16x8xf32>
    %cst_40 = arith.constant dense<0.000000e+00> : vector<16x16xf32>
    %69 = tpu.matmul %67, %68, %cst_40 {dimension_numbers = #tpu.dot_dimension_numbers<[1], [1], [0], [0], [0, 0, 1, 0], [], []>} : vector<16x8xf32>, vector<16x8xf32>, vector<16x16xf32> -> vector<16x16xf32>
    %cst_41 = arith.constant 0.353553385 : f32
    %70 = vector.broadcast %cst_41 : f32 to vector<16x16xf32>
    %71 = arith.mulf %69, %70 : vector<16x16xf32>
    %72 = arith.addf %71, %4 : vector<16x16xf32>
    %cst_42 = arith.constant dense<0xFF800000> : vector<16xf32>
    %73 = vector.multi_reduction <maximumf>, %72, %cst_42 [1] : vector<16x16xf32> to vector<16xf32>
    %74 = vector.shape_cast %73 : vector<16xf32> to vector<16x1xf32>
    %75 = vector.broadcast %74 : vector<16x1xf32> to vector<16x16xf32>
    %76 = arith.subf %72, %75 : vector<16x16xf32>
    %77 = math.exp %76 : vector<16x16xf32>
    %cst_43 = arith.constant dense<0.000000e+00> : vector<16xf32>
    %78 = vector.multi_reduction <add>, %77, %cst_43 [1] : vector<16x16xf32> to vector<16xf32>
    %79 = vector.shape_cast %78 : vector<16xf32> to vector<16x1xf32>
    %80 = tpu.reciprocal %79 {approx = true} : vector<16x1xf32> -> vector<16x1xf32>
    %81 = vector.broadcast %80 : vector<16x1xf32> to vector<16x16xf32>
    %82 = arith.mulf %77, %81 : vector<16x16xf32>
    %83 = vector.extract_strided_slice %19 {offsets = [0, 16], sizes = [16, 8], strides = [1, 1]} : vector<16x32xf32> to vector<16x8xf32>
    %cst_44 = arith.constant dense<0.000000e+00> : vector<16x8xf32>
    %84 = tpu.matmul %82, %83, %cst_44 {dimension_numbers = #tpu.dot_dimension_numbers<[1], [0], [0], [1], [0, 0, 1, 1], [], []>} : vector<16x16xf32>, vector<16x8xf32>, vector<16x8xf32> -> vector<16x8xf32>
    %85 = vector.extract_strided_slice %21 {offsets = [16, 0], sizes = [8, 32], strides = [1, 1]} : vector<32x32xf32> to vector<8x32xf32>
    %cst_45 = arith.constant dense<0.000000e+00> : vector<16x32xf32>
    %86 = tpu.matmul %84, %85, %cst_45 {dimension_numbers = #tpu.dot_dimension_numbers<[1], [0], [0], [1], [0, 0, 1, 1], [], []>} : vector<16x8xf32>, vector<8x32xf32>, vector<16x32xf32> -> vector<16x32xf32>
    %87 = arith.addf %66, %86 : vector<16x32xf32>
    %88 = vector.extract_strided_slice %17 {offsets = [0, 24], sizes = [16, 8], strides = [1, 1]} : vector<16x32xf32> to vector<16x8xf32>
    %89 = vector.extract_strided_slice %18 {offsets = [0, 24], sizes = [16, 8], strides = [1, 1]} : vector<16x32xf32> to vector<16x8xf32>
    %cst_46 = arith.constant dense<0.000000e+00> : vector<16x16xf32>
    %90 = tpu.matmul %88, %89, %cst_46 {dimension_numbers = #tpu.dot_dimension_numbers<[1], [1], [0], [0], [0, 0, 1, 0], [], []>} : vector<16x8xf32>, vector<16x8xf32>, vector<16x16xf32> -> vector<16x16xf32>
    %cst_47 = arith.constant 0.353553385 : f32
    %91 = vector.broadcast %cst_47 : f32 to vector<16x16xf32>
    %92 = arith.mulf %90, %91 : vector<16x16xf32>
    %93 = arith.addf %92, %4 : vector<16x16xf32>
    %cst_48 = arith.constant dense<0xFF800000> : vector<16xf32>
    %94 = vector.multi_reduction <maximumf>, %93, %cst_48 [1] : vector<16x16xf32> to vector<16xf32>
    %95 = vector.shape_cast %94 : vector<16xf32> to vector<16x1xf32>
    %96 = vector.broadcast %95 : vector<16x1xf32> to vector<16x16xf32>
    %97 = arith.subf %93, %96 : vector<16x16xf32>
    %98 = math.exp %97 : vector<16x16xf32>
    %cst_49 = arith.constant dense<0.000000e+00> : vector<16xf32>
    %99 = vector.multi_reduction <add>, %98, %cst_49 [1] : vector<16x16xf32> to vector<16xf32>
    %100 = vector.shape_cast %99 : vector<16xf32> to vector<16x1xf32>
    %101 = tpu.reciprocal %100 {approx = true} : vector<16x1xf32> -> vector<16x1xf32>
    %102 = vector.broadcast %101 : vector<16x1xf32> to vector<16x16xf32>
    %103 = arith.mulf %98, %102 : vector<16x16xf32>
    %104 = vector.extract_strided_slice %19 {offsets = [0, 24], sizes = [16, 8], strides = [1, 1]} : vector<16x32xf32> to vector<16x8xf32>
    %cst_50 = arith.constant dense<0.000000e+00> : vector<16x8xf32>
    %105 = tpu.matmul %103, %104, %cst_50 {dimension_numbers = #tpu.dot_dimension_numbers<[1], [0], [0], [1], [0, 0, 1, 1], [], []>} : vector<16x16xf32>, vector<16x8xf32>, vector<16x8xf32> -> vector<16x8xf32>
    %106 = vector.extract_strided_slice %21 {offsets = [24, 0], sizes = [8, 32], strides = [1, 1]} : vector<32x32xf32> to vector<8x32xf32>
    %cst_51 = arith.constant dense<0.000000e+00> : vector<16x32xf32>
    %107 = tpu.matmul %105, %106, %cst_51 {dimension_numbers = #tpu.dot_dimension_numbers<[1], [0], [0], [1], [0, 0, 1, 1], [], []>} : vector<16x8xf32>, vector<8x32xf32>, vector<16x32xf32> -> vector<16x32xf32>
    %108 = arith.addf %87, %107 : vector<16x32xf32>
    %109 = vector.broadcast %23 : vector<1x32xf32> to vector<16x32xf32>
    %110 = arith.addf %108, %109 : vector<16x32xf32>
    %111 = arith.addf %2, %110 : vector<16x32xf32>
    %112 = vector.extract_strided_slice %7 {offsets = [0, 0], sizes = [1, 32], strides = [1, 1]} : vector<3x32xf32> to vector<1x32xf32>
    %113 = vector.extract_strided_slice %9 {offsets = [0, 0], sizes = [1, 32], strides = [1, 1]} : vector<3x32xf32> to vector<1x32xf32>
    %cst_52 = arith.constant dense<0.000000e+00> : vector<16xf32>
    %114 = vector.multi_reduction <add>, %111, %cst_52 [1] : vector<16x32xf32> to vector<16xf32>
    %115 = vector.shape_cast %114 : vector<16xf32> to vector<16x1xf32>
    %cst_53 = arith.constant 3.200000e+01 : f32
    %116 = vector.broadcast %cst_53 : f32 to vector<16x1xf32>
    %117 = arith.divf %115, %116 : vector<16x1xf32>
    %118 = vector.broadcast %117 : vector<16x1xf32> to vector<16x32xf32>
    %119 = arith.subf %111, %118 : vector<16x32xf32>
    %120 = arith.mulf %119, %119 : vector<16x32xf32>
    %cst_54 = arith.constant dense<0.000000e+00> : vector<16xf32>
    %121 = vector.multi_reduction <add>, %120, %cst_54 [1] : vector<16x32xf32> to vector<16xf32>
    %122 = vector.shape_cast %121 : vector<16xf32> to vector<16x1xf32>
    %cst_55 = arith.constant 3.200000e+01 : f32
    %123 = vector.broadcast %cst_55 : f32 to vector<16x1xf32>
    %124 = arith.divf %122, %123 : vector<16x1xf32>
    %125 = vector.broadcast %117 : vector<16x1xf32> to vector<16x32xf32>
    %126 = arith.subf %111, %125 : vector<16x32xf32>
    %cst_56 = arith.constant 9.99999974E-6 : f32
    %127 = vector.broadcast %cst_56 : f32 to vector<16x1xf32>
    %128 = arith.addf %124, %127 : vector<16x1xf32>
    %129 = math.rsqrt %128 : vector<16x1xf32>
    %130 = vector.broadcast %129 : vector<16x1xf32> to vector<16x32xf32>
    %131 = arith.mulf %126, %130 : vector<16x32xf32>
    %132 = vector.broadcast %112 : vector<1x32xf32> to vector<16x32xf32>
    %133 = arith.mulf %131, %132 : vector<16x32xf32>
    %134 = vector.broadcast %113 : vector<1x32xf32> to vector<16x32xf32>
    %135 = arith.addf %133, %134 : vector<16x32xf32>
    %c0_57 = arith.constant 0 : index
    %c0_58 = arith.constant 0 : index
    %c0_59 = arith.constant 0 : index
    %136 = vector.load %arg10[%c0_57, %c0_58, %c0_59] : memref<2x32x32xf32, #tpu.memory_space<vmem>>, vector<1x32x32xf32>
    %137 = vector.shape_cast %136 : vector<1x32x32xf32> to vector<32x32xf32>
    %cst_60 = arith.constant dense<0.000000e+00> : vector<16x32xf32>
    %138 = tpu.matmul %135, %137, %cst_60 {dimension_numbers = #tpu.dot_dimension_numbers<[1], [0], [0], [1], [0, 0, 1, 1], [], []>} : vector<16x32xf32>, vector<32x32xf32>, vector<16x32xf32> -> vector<16x32xf32>
    %c0_61 = arith.constant 0 : index
    %c0_62 = arith.constant 0 : index
    %c0_63 = arith.constant 0 : index
    %139 = vector.load %arg11[%c0_61, %c0_62, %c0_63] : memref<2x1x32xf32, #tpu.memory_space<vmem>>, vector<1x1x32xf32>
    %140 = vector.shape_cast %139 : vector<1x1x32xf32> to vector<1x32xf32>
    %141 = vector.broadcast %140 : vector<1x32xf32> to vector<16x32xf32>
    %142 = arith.addf %138, %141 : vector<16x32xf32>
    %c0_64 = arith.constant 0 : index
    %c0_65 = arith.constant 0 : index
    %c0_66 = arith.constant 0 : index
    %143 = vector.load %arg12[%c0_64, %c0_65, %c0_66] : memref<2x32x64xf32, #tpu.memory_space<vmem>>, vector<1x32x64xf32>
    %144 = vector.shape_cast %143 : vector<1x32x64xf32> to vector<32x64xf32>
    %cst_67 = arith.constant dense<0.000000e+00> : vector<16x64xf32>
    %145 = tpu.matmul %3, %144, %cst_67 {dimension_numbers = #tpu.dot_dimension_numbers<[1], [0], [0], [1], [0, 0, 1, 1], [], []>} : vector<16x32xf32>, vector<32x64xf32>, vector<16x64xf32> -> vector<16x64xf32>
    %c0_68 = arith.constant 0 : index
    %c0_69 = arith.constant 0 : index
    %c0_70 = arith.constant 0 : index
    %146 = vector.load %arg13[%c0_68, %c0_69, %c0_70] : memref<2x1x64xf32, #tpu.memory_space<vmem>>, vector<1x1x64xf32>
    %147 = vector.shape_cast %146 : vector<1x1x64xf32> to vector<1x64xf32>
    %148 = vector.broadcast %147 : vector<1x64xf32> to vector<16x64xf32>
    %149 = arith.addf %145, %148 : vector<16x64xf32>
    %150 = vector.extract_strided_slice %149 {offsets = [0, 0], sizes = [16, 32], strides = [1, 1]} : vector<16x64xf32> to vector<16x32xf32>
    %151 = vector.extract_strided_slice %149 {offsets = [0, 32], sizes = [16, 32], strides = [1, 1]} : vector<16x64xf32> to vector<16x32xf32>
    %c0_71 = arith.constant 0 : index
    %c0_72 = arith.constant 0 : index
    %c0_73 = arith.constant 0 : index
    %152 = vector.load %arg14[%c0_71, %c0_72, %c0_73] : memref<2x32x32xf32, #tpu.memory_space<vmem>>, vector<1x32x32xf32>
    %153 = vector.shape_cast %152 : vector<1x32x32xf32> to vector<32x32xf32>
    %c0_74 = arith.constant 0 : index
    %c0_75 = arith.constant 0 : index
    %c0_76 = arith.constant 0 : index
    %154 = vector.load %arg15[%c0_74, %c0_75, %c0_76] : memref<2x1x32xf32, #tpu.memory_space<vmem>>, vector<1x1x32xf32>
    %155 = vector.shape_cast %154 : vector<1x1x32xf32> to vector<1x32xf32>
    %cst_77 = arith.constant 0.000000e+00 : f32
    %156 = vector.broadcast %cst_77 : f32 to vector<16x32xf32>
    %157 = vector.extract_strided_slice %142 {offsets = [0, 0], sizes = [16, 8], strides = [1, 1]} : vector<16x32xf32> to vector<16x8xf32>
    %158 = vector.extract_strided_slice %150 {offsets = [0, 0], sizes = [16, 8], strides = [1, 1]} : vector<16x32xf32> to vector<16x8xf32>
    %cst_78 = arith.constant dense<0.000000e+00> : vector<16x16xf32>
    %159 = tpu.matmul %157, %158, %cst_78 {dimension_numbers = #tpu.dot_dimension_numbers<[1], [1], [0], [0], [0, 0, 1, 0], [], []>} : vector<16x8xf32>, vector<16x8xf32>, vector<16x16xf32> -> vector<16x16xf32>
    %cst_79 = arith.constant 0.353553385 : f32
    %160 = vector.broadcast %cst_79 : f32 to vector<16x16xf32>
    %161 = arith.mulf %159, %160 : vector<16x16xf32>
    %162 = arith.addf %161, %5 : vector<16x16xf32>
    %cst_80 = arith.constant dense<0xFF800000> : vector<16xf32>
    %163 = vector.multi_reduction <maximumf>, %162, %cst_80 [1] : vector<16x16xf32> to vector<16xf32>
    %164 = vector.shape_cast %163 : vector<16xf32> to vector<16x1xf32>
    %165 = vector.broadcast %164 : vector<16x1xf32> to vector<16x16xf32>
    %166 = arith.subf %162, %165 : vector<16x16xf32>
    %167 = math.exp %166 : vector<16x16xf32>
    %cst_81 = arith.constant dense<0.000000e+00> : vector<16xf32>
    %168 = vector.multi_reduction <add>, %167, %cst_81 [1] : vector<16x16xf32> to vector<16xf32>
    %169 = vector.shape_cast %168 : vector<16xf32> to vector<16x1xf32>
    %170 = tpu.reciprocal %169 {approx = true} : vector<16x1xf32> -> vector<16x1xf32>
    %171 = vector.broadcast %170 : vector<16x1xf32> to vector<16x16xf32>
    %172 = arith.mulf %167, %171 : vector<16x16xf32>
    %173 = vector.extract_strided_slice %151 {offsets = [0, 0], sizes = [16, 8], strides = [1, 1]} : vector<16x32xf32> to vector<16x8xf32>
    %cst_82 = arith.constant dense<0.000000e+00> : vector<16x8xf32>
    %174 = tpu.matmul %172, %173, %cst_82 {dimension_numbers = #tpu.dot_dimension_numbers<[1], [0], [0], [1], [0, 0, 1, 1], [], []>} : vector<16x16xf32>, vector<16x8xf32>, vector<16x8xf32> -> vector<16x8xf32>
    %175 = vector.extract_strided_slice %153 {offsets = [0, 0], sizes = [8, 32], strides = [1, 1]} : vector<32x32xf32> to vector<8x32xf32>
    %cst_83 = arith.constant dense<0.000000e+00> : vector<16x32xf32>
    %176 = tpu.matmul %174, %175, %cst_83 {dimension_numbers = #tpu.dot_dimension_numbers<[1], [0], [0], [1], [0, 0, 1, 1], [], []>} : vector<16x8xf32>, vector<8x32xf32>, vector<16x32xf32> -> vector<16x32xf32>
    %177 = arith.addf %156, %176 : vector<16x32xf32>
    %178 = vector.extract_strided_slice %142 {offsets = [0, 8], sizes = [16, 8], strides = [1, 1]} : vector<16x32xf32> to vector<16x8xf32>
    %179 = vector.extract_strided_slice %150 {offsets = [0, 8], sizes = [16, 8], strides = [1, 1]} : vector<16x32xf32> to vector<16x8xf32>
    %cst_84 = arith.constant dense<0.000000e+00> : vector<16x16xf32>
    %180 = tpu.matmul %178, %179, %cst_84 {dimension_numbers = #tpu.dot_dimension_numbers<[1], [1], [0], [0], [0, 0, 1, 0], [], []>} : vector<16x8xf32>, vector<16x8xf32>, vector<16x16xf32> -> vector<16x16xf32>
    %cst_85 = arith.constant 0.353553385 : f32
    %181 = vector.broadcast %cst_85 : f32 to vector<16x16xf32>
    %182 = arith.mulf %180, %181 : vector<16x16xf32>
    %183 = arith.addf %182, %5 : vector<16x16xf32>
    %cst_86 = arith.constant dense<0xFF800000> : vector<16xf32>
    %184 = vector.multi_reduction <maximumf>, %183, %cst_86 [1] : vector<16x16xf32> to vector<16xf32>
    %185 = vector.shape_cast %184 : vector<16xf32> to vector<16x1xf32>
    %186 = vector.broadcast %185 : vector<16x1xf32> to vector<16x16xf32>
    %187 = arith.subf %183, %186 : vector<16x16xf32>
    %188 = math.exp %187 : vector<16x16xf32>
    %cst_87 = arith.constant dense<0.000000e+00> : vector<16xf32>
    %189 = vector.multi_reduction <add>, %188, %cst_87 [1] : vector<16x16xf32> to vector<16xf32>
    %190 = vector.shape_cast %189 : vector<16xf32> to vector<16x1xf32>
    %191 = tpu.reciprocal %190 {approx = true} : vector<16x1xf32> -> vector<16x1xf32>
    %192 = vector.broadcast %191 : vector<16x1xf32> to vector<16x16xf32>
    %193 = arith.mulf %188, %192 : vector<16x16xf32>
    %194 = vector.extract_strided_slice %151 {offsets = [0, 8], sizes = [16, 8], strides = [1, 1]} : vector<16x32xf32> to vector<16x8xf32>
    %cst_88 = arith.constant dense<0.000000e+00> : vector<16x8xf32>
    %195 = tpu.matmul %193, %194, %cst_88 {dimension_numbers = #tpu.dot_dimension_numbers<[1], [0], [0], [1], [0, 0, 1, 1], [], []>} : vector<16x16xf32>, vector<16x8xf32>, vector<16x8xf32> -> vector<16x8xf32>
    %196 = vector.extract_strided_slice %153 {offsets = [8, 0], sizes = [8, 32], strides = [1, 1]} : vector<32x32xf32> to vector<8x32xf32>
    %cst_89 = arith.constant dense<0.000000e+00> : vector<16x32xf32>
    %197 = tpu.matmul %195, %196, %cst_89 {dimension_numbers = #tpu.dot_dimension_numbers<[1], [0], [0], [1], [0, 0, 1, 1], [], []>} : vector<16x8xf32>, vector<8x32xf32>, vector<16x32xf32> -> vector<16x32xf32>
    %198 = arith.addf %177, %197 : vector<16x32xf32>
    %199 = vector.extract_strided_slice %142 {offsets = [0, 16], sizes = [16, 8], strides = [1, 1]} : vector<16x32xf32> to vector<16x8xf32>
    %200 = vector.extract_strided_slice %150 {offsets = [0, 16], sizes = [16, 8], strides = [1, 1]} : vector<16x32xf32> to vector<16x8xf32>
    %cst_90 = arith.constant dense<0.000000e+00> : vector<16x16xf32>
    %201 = tpu.matmul %199, %200, %cst_90 {dimension_numbers = #tpu.dot_dimension_numbers<[1], [1], [0], [0], [0, 0, 1, 0], [], []>} : vector<16x8xf32>, vector<16x8xf32>, vector<16x16xf32> -> vector<16x16xf32>
    %cst_91 = arith.constant 0.353553385 : f32
    %202 = vector.broadcast %cst_91 : f32 to vector<16x16xf32>
    %203 = arith.mulf %201, %202 : vector<16x16xf32>
    %204 = arith.addf %203, %5 : vector<16x16xf32>
    %cst_92 = arith.constant dense<0xFF800000> : vector<16xf32>
    %205 = vector.multi_reduction <maximumf>, %204, %cst_92 [1] : vector<16x16xf32> to vector<16xf32>
    %206 = vector.shape_cast %205 : vector<16xf32> to vector<16x1xf32>
    %207 = vector.broadcast %206 : vector<16x1xf32> to vector<16x16xf32>
    %208 = arith.subf %204, %207 : vector<16x16xf32>
    %209 = math.exp %208 : vector<16x16xf32>
    %cst_93 = arith.constant dense<0.000000e+00> : vector<16xf32>
    %210 = vector.multi_reduction <add>, %209, %cst_93 [1] : vector<16x16xf32> to vector<16xf32>
    %211 = vector.shape_cast %210 : vector<16xf32> to vector<16x1xf32>
    %212 = tpu.reciprocal %211 {approx = true} : vector<16x1xf32> -> vector<16x1xf32>
    %213 = vector.broadcast %212 : vector<16x1xf32> to vector<16x16xf32>
    %214 = arith.mulf %209, %213 : vector<16x16xf32>
    %215 = vector.extract_strided_slice %151 {offsets = [0, 16], sizes = [16, 8], strides = [1, 1]} : vector<16x32xf32> to vector<16x8xf32>
    %cst_94 = arith.constant dense<0.000000e+00> : vector<16x8xf32>
    %216 = tpu.matmul %214, %215, %cst_94 {dimension_numbers = #tpu.dot_dimension_numbers<[1], [0], [0], [1], [0, 0, 1, 1], [], []>} : vector<16x16xf32>, vector<16x8xf32>, vector<16x8xf32> -> vector<16x8xf32>
    %217 = vector.extract_strided_slice %153 {offsets = [16, 0], sizes = [8, 32], strides = [1, 1]} : vector<32x32xf32> to vector<8x32xf32>
    %cst_95 = arith.constant dense<0.000000e+00> : vector<16x32xf32>
    %218 = tpu.matmul %216, %217, %cst_95 {dimension_numbers = #tpu.dot_dimension_numbers<[1], [0], [0], [1], [0, 0, 1, 1], [], []>} : vector<16x8xf32>, vector<8x32xf32>, vector<16x32xf32> -> vector<16x32xf32>
    %219 = arith.addf %198, %218 : vector<16x32xf32>
    %220 = vector.extract_strided_slice %142 {offsets = [0, 24], sizes = [16, 8], strides = [1, 1]} : vector<16x32xf32> to vector<16x8xf32>
    %221 = vector.extract_strided_slice %150 {offsets = [0, 24], sizes = [16, 8], strides = [1, 1]} : vector<16x32xf32> to vector<16x8xf32>
    %cst_96 = arith.constant dense<0.000000e+00> : vector<16x16xf32>
    %222 = tpu.matmul %220, %221, %cst_96 {dimension_numbers = #tpu.dot_dimension_numbers<[1], [1], [0], [0], [0, 0, 1, 0], [], []>} : vector<16x8xf32>, vector<16x8xf32>, vector<16x16xf32> -> vector<16x16xf32>
    %cst_97 = arith.constant 0.353553385 : f32
    %223 = vector.broadcast %cst_97 : f32 to vector<16x16xf32>
    %224 = arith.mulf %222, %223 : vector<16x16xf32>
    %225 = arith.addf %224, %5 : vector<16x16xf32>
    %cst_98 = arith.constant dense<0xFF800000> : vector<16xf32>
    %226 = vector.multi_reduction <maximumf>, %225, %cst_98 [1] : vector<16x16xf32> to vector<16xf32>
    %227 = vector.shape_cast %226 : vector<16xf32> to vector<16x1xf32>
    %228 = vector.broadcast %227 : vector<16x1xf32> to vector<16x16xf32>
    %229 = arith.subf %225, %228 : vector<16x16xf32>
    %230 = math.exp %229 : vector<16x16xf32>
    %cst_99 = arith.constant dense<0.000000e+00> : vector<16xf32>
    %231 = vector.multi_reduction <add>, %230, %cst_99 [1] : vector<16x16xf32> to vector<16xf32>
    %232 = vector.shape_cast %231 : vector<16xf32> to vector<16x1xf32>
    %233 = tpu.reciprocal %232 {approx = true} : vector<16x1xf32> -> vector<16x1xf32>
    %234 = vector.broadcast %233 : vector<16x1xf32> to vector<16x16xf32>
    %235 = arith.mulf %230, %234 : vector<16x16xf32>
    %236 = vector.extract_strided_slice %151 {offsets = [0, 24], sizes = [16, 8], strides = [1, 1]} : vector<16x32xf32> to vector<16x8xf32>
    %cst_100 = arith.constant dense<0.000000e+00> : vector<16x8xf32>
    %237 = tpu.matmul %235, %236, %cst_100 {dimension_numbers = #tpu.dot_dimension_numbers<[1], [0], [0], [1], [0, 0, 1, 1], [], []>} : vector<16x16xf32>, vector<16x8xf32>, vector<16x8xf32> -> vector<16x8xf32>
    %238 = vector.extract_strided_slice %153 {offsets = [24, 0], sizes = [8, 32], strides = [1, 1]} : vector<32x32xf32> to vector<8x32xf32>
    %cst_101 = arith.constant dense<0.000000e+00> : vector<16x32xf32>
    %239 = tpu.matmul %237, %238, %cst_101 {dimension_numbers = #tpu.dot_dimension_numbers<[1], [0], [0], [1], [0, 0, 1, 1], [], []>} : vector<16x8xf32>, vector<8x32xf32>, vector<16x32xf32> -> vector<16x32xf32>
    %240 = arith.addf %219, %239 : vector<16x32xf32>
    %241 = vector.broadcast %155 : vector<1x32xf32> to vector<16x32xf32>
    %242 = arith.addf %240, %241 : vector<16x32xf32>
    %243 = arith.addf %135, %242 : vector<16x32xf32>
    %244 = vector.extract_strided_slice %7 {offsets = [1, 0], sizes = [1, 32], strides = [1, 1]} : vector<3x32xf32> to vector<1x32xf32>
    %245 = vector.extract_strided_slice %9 {offsets = [1, 0], sizes = [1, 32], strides = [1, 1]} : vector<3x32xf32> to vector<1x32xf32>
    %cst_102 = arith.constant dense<0.000000e+00> : vector<16xf32>
    %246 = vector.multi_reduction <add>, %243, %cst_102 [1] : vector<16x32xf32> to vector<16xf32>
    %247 = vector.shape_cast %246 : vector<16xf32> to vector<16x1xf32>
    %cst_103 = arith.constant 3.200000e+01 : f32
    %248 = vector.broadcast %cst_103 : f32 to vector<16x1xf32>
    %249 = arith.divf %247, %248 : vector<16x1xf32>
    %250 = vector.broadcast %249 : vector<16x1xf32> to vector<16x32xf32>
    %251 = arith.subf %243, %250 : vector<16x32xf32>
    %252 = arith.mulf %251, %251 : vector<16x32xf32>
    %cst_104 = arith.constant dense<0.000000e+00> : vector<16xf32>
    %253 = vector.multi_reduction <add>, %252, %cst_104 [1] : vector<16x32xf32> to vector<16xf32>
    %254 = vector.shape_cast %253 : vector<16xf32> to vector<16x1xf32>
    %cst_105 = arith.constant 3.200000e+01 : f32
    %255 = vector.broadcast %cst_105 : f32 to vector<16x1xf32>
    %256 = arith.divf %254, %255 : vector<16x1xf32>
    %257 = vector.broadcast %249 : vector<16x1xf32> to vector<16x32xf32>
    %258 = arith.subf %243, %257 : vector<16x32xf32>
    %cst_106 = arith.constant 9.99999974E-6 : f32
    %259 = vector.broadcast %cst_106 : f32 to vector<16x1xf32>
    %260 = arith.addf %256, %259 : vector<16x1xf32>
    %261 = math.rsqrt %260 : vector<16x1xf32>
    %262 = vector.broadcast %261 : vector<16x1xf32> to vector<16x32xf32>
    %263 = arith.mulf %258, %262 : vector<16x32xf32>
    %264 = vector.broadcast %244 : vector<1x32xf32> to vector<16x32xf32>
    %265 = arith.mulf %263, %264 : vector<16x32xf32>
    %266 = vector.broadcast %245 : vector<1x32xf32> to vector<16x32xf32>
    %267 = arith.addf %265, %266 : vector<16x32xf32>
    %c0_107 = arith.constant 0 : index
    %c0_108 = arith.constant 0 : index
    %c0_109 = arith.constant 0 : index
    %268 = vector.load %arg16[%c0_107, %c0_108, %c0_109] : memref<2x32x64xf32, #tpu.memory_space<vmem>>, vector<1x32x64xf32>
    %269 = vector.shape_cast %268 : vector<1x32x64xf32> to vector<32x64xf32>
    %cst_110 = arith.constant dense<0.000000e+00> : vector<16x64xf32>
    %270 = tpu.matmul %267, %269, %cst_110 {dimension_numbers = #tpu.dot_dimension_numbers<[1], [0], [0], [1], [0, 0, 1, 1], [], []>} : vector<16x32xf32>, vector<32x64xf32>, vector<16x64xf32> -> vector<16x64xf32>
    %c0_111 = arith.constant 0 : index
    %c0_112 = arith.constant 0 : index
    %c0_113 = arith.constant 0 : index
    %271 = vector.load %arg17[%c0_111, %c0_112, %c0_113] : memref<2x1x64xf32, #tpu.memory_space<vmem>>, vector<1x1x64xf32>
    %272 = vector.shape_cast %271 : vector<1x1x64xf32> to vector<1x64xf32>
    %273 = vector.broadcast %272 : vector<1x64xf32> to vector<16x64xf32>
    %274 = arith.addf %270, %273 : vector<16x64xf32>
    %cst_114 = arith.constant 0.000000e+00 : f32
    %275 = vector.broadcast %cst_114 : f32 to vector<16x64xf32>
    %276 = arith.maximumf %274, %275 : vector<16x64xf32>
    %c0_115 = arith.constant 0 : index
    %c0_116 = arith.constant 0 : index
    %c0_117 = arith.constant 0 : index
    %277 = vector.load %arg18[%c0_115, %c0_116, %c0_117] : memref<2x64x32xf32, #tpu.memory_space<vmem>>, vector<1x64x32xf32>
    %278 = vector.shape_cast %277 : vector<1x64x32xf32> to vector<64x32xf32>
    %cst_118 = arith.constant dense<0.000000e+00> : vector<16x32xf32>
    %279 = tpu.matmul %276, %278, %cst_118 {dimension_numbers = #tpu.dot_dimension_numbers<[1], [0], [0], [1], [0, 0, 1, 1], [], []>} : vector<16x64xf32>, vector<64x32xf32>, vector<16x32xf32> -> vector<16x32xf32>
    %c0_119 = arith.constant 0 : index
    %c0_120 = arith.constant 0 : index
    %c0_121 = arith.constant 0 : index
    %280 = vector.load %arg19[%c0_119, %c0_120, %c0_121] : memref<2x1x32xf32, #tpu.memory_space<vmem>>, vector<1x1x32xf32>
    %281 = vector.shape_cast %280 : vector<1x1x32xf32> to vector<1x32xf32>
    %282 = vector.broadcast %281 : vector<1x32xf32> to vector<16x32xf32>
    %283 = arith.addf %279, %282 : vector<16x32xf32>
    %284 = arith.addf %267, %283 : vector<16x32xf32>
    %285 = vector.extract_strided_slice %7 {offsets = [2, 0], sizes = [1, 32], strides = [1, 1]} : vector<3x32xf32> to vector<1x32xf32>
    %286 = vector.extract_strided_slice %9 {offsets = [2, 0], sizes = [1, 32], strides = [1, 1]} : vector<3x32xf32> to vector<1x32xf32>
    %cst_122 = arith.constant dense<0.000000e+00> : vector<16xf32>
    %287 = vector.multi_reduction <add>, %284, %cst_122 [1] : vector<16x32xf32> to vector<16xf32>
    %288 = vector.shape_cast %287 : vector<16xf32> to vector<16x1xf32>
    %cst_123 = arith.constant 3.200000e+01 : f32
    %289 = vector.broadcast %cst_123 : f32 to vector<16x1xf32>
    %290 = arith.divf %288, %289 : vector<16x1xf32>
    %291 = vector.broadcast %290 : vector<16x1xf32> to vector<16x32xf32>
    %292 = arith.subf %284, %291 : vector<16x32xf32>
    %293 = arith.mulf %292, %292 : vector<16x32xf32>
    %cst_124 = arith.constant dense<0.000000e+00> : vector<16xf32>
    %294 = vector.multi_reduction <add>, %293, %cst_124 [1] : vector<16x32xf32> to vector<16xf32>
    %295 = vector.shape_cast %294 : vector<16xf32> to vector<16x1xf32>
    %cst_125 = arith.constant 3.200000e+01 : f32
    %296 = vector.broadcast %cst_125 : f32 to vector<16x1xf32>
    %297 = arith.divf %295, %296 : vector<16x1xf32>
    %298 = vector.broadcast %290 : vector<16x1xf32> to vector<16x32xf32>
    %299 = arith.subf %284, %298 : vector<16x32xf32>
    %cst_126 = arith.constant 9.99999974E-6 : f32
    %300 = vector.broadcast %cst_126 : f32 to vector<16x1xf32>
    %301 = arith.addf %297, %300 : vector<16x1xf32>
    %302 = math.rsqrt %301 : vector<16x1xf32>
    %303 = vector.broadcast %302 : vector<16x1xf32> to vector<16x32xf32>
    %304 = arith.mulf %299, %303 : vector<16x32xf32>
    %305 = vector.broadcast %285 : vector<1x32xf32> to vector<16x32xf32>
    %306 = arith.mulf %304, %305 : vector<16x32xf32>
    %307 = vector.broadcast %286 : vector<1x32xf32> to vector<16x32xf32>
    %308 = arith.addf %306, %307 : vector<16x32xf32>
    %c1 = arith.constant 1 : index
    %c0_127 = arith.constant 0 : index
    %c0_128 = arith.constant 0 : index
    %309 = vector.load %arg20[%c1, %c0_127, %c0_128] : memref<2x3x32xf32, #tpu.memory_space<vmem>>, vector<1x3x32xf32>
    %310 = vector.shape_cast %309 : vector<1x3x32xf32> to vector<3x32xf32>
    %c1_129 = arith.constant 1 : index
    %c0_130 = arith.constant 0 : index
    %c0_131 = arith.constant 0 : index
    %311 = vector.load %arg21[%c1_129, %c0_130, %c0_131] : memref<2x3x32xf32, #tpu.memory_space<vmem>>, vector<1x3x32xf32>
    %312 = vector.shape_cast %311 : vector<1x3x32xf32> to vector<3x32xf32>
    %c1_132 = arith.constant 1 : index
    %c0_133 = arith.constant 0 : index
    %c0_134 = arith.constant 0 : index
    %313 = vector.load %arg6[%c1_132, %c0_133, %c0_134] : memref<2x32x96xf32, #tpu.memory_space<vmem>>, vector<1x32x96xf32>
    %314 = vector.shape_cast %313 : vector<1x32x96xf32> to vector<32x96xf32>
    %cst_135 = arith.constant dense<0.000000e+00> : vector<16x96xf32>
    %315 = tpu.matmul %308, %314, %cst_135 {dimension_numbers = #tpu.dot_dimension_numbers<[1], [0], [0], [1], [0, 0, 1, 1], [], []>} : vector<16x32xf32>, vector<32x96xf32>, vector<16x96xf32> -> vector<16x96xf32>
    %c1_136 = arith.constant 1 : index
    %c0_137 = arith.constant 0 : index
    %c0_138 = arith.constant 0 : index
    %316 = vector.load %arg7[%c1_136, %c0_137, %c0_138] : memref<2x1x96xf32, #tpu.memory_space<vmem>>, vector<1x1x96xf32>
    %317 = vector.shape_cast %316 : vector<1x1x96xf32> to vector<1x96xf32>
    %318 = vector.broadcast %317 : vector<1x96xf32> to vector<16x96xf32>
    %319 = arith.addf %315, %318 : vector<16x96xf32>
    %320 = vector.extract_strided_slice %319 {offsets = [0, 0], sizes = [16, 32], strides = [1, 1]} : vector<16x96xf32> to vector<16x32xf32>
    %321 = vector.extract_strided_slice %319 {offsets = [0, 32], sizes = [16, 32], strides = [1, 1]} : vector<16x96xf32> to vector<16x32xf32>
    %322 = vector.extract_strided_slice %319 {offsets = [0, 64], sizes = [16, 32], strides = [1, 1]} : vector<16x96xf32> to vector<16x32xf32>
    %c1_139 = arith.constant 1 : index
    %c0_140 = arith.constant 0 : index
    %c0_141 = arith.constant 0 : index
    %323 = vector.load %arg8[%c1_139, %c0_140, %c0_141] : memref<2x32x32xf32, #tpu.memory_space<vmem>>, vector<1x32x32xf32>
    %324 = vector.shape_cast %323 : vector<1x32x32xf32> to vector<32x32xf32>
    %c1_142 = arith.constant 1 : index
    %c0_143 = arith.constant 0 : index
    %c0_144 = arith.constant 0 : index
    %325 = vector.load %arg9[%c1_142, %c0_143, %c0_144] : memref<2x1x32xf32, #tpu.memory_space<vmem>>, vector<1x1x32xf32>
    %326 = vector.shape_cast %325 : vector<1x1x32xf32> to vector<1x32xf32>
    %cst_145 = arith.constant 0.000000e+00 : f32
    %327 = vector.broadcast %cst_145 : f32 to vector<16x32xf32>
    %328 = vector.extract_strided_slice %320 {offsets = [0, 0], sizes = [16, 8], strides = [1, 1]} : vector<16x32xf32> to vector<16x8xf32>
    %329 = vector.extract_strided_slice %321 {offsets = [0, 0], sizes = [16, 8], strides = [1, 1]} : vector<16x32xf32> to vector<16x8xf32>
    %cst_146 = arith.constant dense<0.000000e+00> : vector<16x16xf32>
    %330 = tpu.matmul %328, %329, %cst_146 {dimension_numbers = #tpu.dot_dimension_numbers<[1], [1], [0], [0], [0, 0, 1, 0], [], []>} : vector<16x8xf32>, vector<16x8xf32>, vector<16x16xf32> -> vector<16x16xf32>
    %cst_147 = arith.constant 0.353553385 : f32
    %331 = vector.broadcast %cst_147 : f32 to vector<16x16xf32>
    %332 = arith.mulf %330, %331 : vector<16x16xf32>
    %333 = arith.addf %332, %4 : vector<16x16xf32>
    %cst_148 = arith.constant dense<0xFF800000> : vector<16xf32>
    %334 = vector.multi_reduction <maximumf>, %333, %cst_148 [1] : vector<16x16xf32> to vector<16xf32>
    %335 = vector.shape_cast %334 : vector<16xf32> to vector<16x1xf32>
    %336 = vector.broadcast %335 : vector<16x1xf32> to vector<16x16xf32>
    %337 = arith.subf %333, %336 : vector<16x16xf32>
    %338 = math.exp %337 : vector<16x16xf32>
    %cst_149 = arith.constant dense<0.000000e+00> : vector<16xf32>
    %339 = vector.multi_reduction <add>, %338, %cst_149 [1] : vector<16x16xf32> to vector<16xf32>
    %340 = vector.shape_cast %339 : vector<16xf32> to vector<16x1xf32>
    %341 = tpu.reciprocal %340 {approx = true} : vector<16x1xf32> -> vector<16x1xf32>
    %342 = vector.broadcast %341 : vector<16x1xf32> to vector<16x16xf32>
    %343 = arith.mulf %338, %342 : vector<16x16xf32>
    %344 = vector.extract_strided_slice %322 {offsets = [0, 0], sizes = [16, 8], strides = [1, 1]} : vector<16x32xf32> to vector<16x8xf32>
    %cst_150 = arith.constant dense<0.000000e+00> : vector<16x8xf32>
    %345 = tpu.matmul %343, %344, %cst_150 {dimension_numbers = #tpu.dot_dimension_numbers<[1], [0], [0], [1], [0, 0, 1, 1], [], []>} : vector<16x16xf32>, vector<16x8xf32>, vector<16x8xf32> -> vector<16x8xf32>
    %346 = vector.extract_strided_slice %324 {offsets = [0, 0], sizes = [8, 32], strides = [1, 1]} : vector<32x32xf32> to vector<8x32xf32>
    %cst_151 = arith.constant dense<0.000000e+00> : vector<16x32xf32>
    %347 = tpu.matmul %345, %346, %cst_151 {dimension_numbers = #tpu.dot_dimension_numbers<[1], [0], [0], [1], [0, 0, 1, 1], [], []>} : vector<16x8xf32>, vector<8x32xf32>, vector<16x32xf32> -> vector<16x32xf32>
    %348 = arith.addf %327, %347 : vector<16x32xf32>
    %349 = vector.extract_strided_slice %320 {offsets = [0, 8], sizes = [16, 8], strides = [1, 1]} : vector<16x32xf32> to vector<16x8xf32>
    %350 = vector.extract_strided_slice %321 {offsets = [0, 8], sizes = [16, 8], strides = [1, 1]} : vector<16x32xf32> to vector<16x8xf32>
    %cst_152 = arith.constant dense<0.000000e+00> : vector<16x16xf32>
    %351 = tpu.matmul %349, %350, %cst_152 {dimension_numbers = #tpu.dot_dimension_numbers<[1], [1], [0], [0], [0, 0, 1, 0], [], []>} : vector<16x8xf32>, vector<16x8xf32>, vector<16x16xf32> -> vector<16x16xf32>
    %cst_153 = arith.constant 0.353553385 : f32
    %352 = vector.broadcast %cst_153 : f32 to vector<16x16xf32>
    %353 = arith.mulf %351, %352 : vector<16x16xf32>
    %354 = arith.addf %353, %4 : vector<16x16xf32>
    %cst_154 = arith.constant dense<0xFF800000> : vector<16xf32>
    %355 = vector.multi_reduction <maximumf>, %354, %cst_154 [1] : vector<16x16xf32> to vector<16xf32>
    %356 = vector.shape_cast %355 : vector<16xf32> to vector<16x1xf32>
    %357 = vector.broadcast %356 : vector<16x1xf32> to vector<16x16xf32>
    %358 = arith.subf %354, %357 : vector<16x16xf32>
    %359 = math.exp %358 : vector<16x16xf32>
    %cst_155 = arith.constant dense<0.000000e+00> : vector<16xf32>
    %360 = vector.multi_reduction <add>, %359, %cst_155 [1] : vector<16x16xf32> to vector<16xf32>
    %361 = vector.shape_cast %360 : vector<16xf32> to vector<16x1xf32>
    %362 = tpu.reciprocal %361 {approx = true} : vector<16x1xf32> -> vector<16x1xf32>
    %363 = vector.broadcast %362 : vector<16x1xf32> to vector<16x16xf32>
    %364 = arith.mulf %359, %363 : vector<16x16xf32>
    %365 = vector.extract_strided_slice %322 {offsets = [0, 8], sizes = [16, 8], strides = [1, 1]} : vector<16x32xf32> to vector<16x8xf32>
    %cst_156 = arith.constant dense<0.000000e+00> : vector<16x8xf32>
    %366 = tpu.matmul %364, %365, %cst_156 {dimension_numbers = #tpu.dot_dimension_numbers<[1], [0], [0], [1], [0, 0, 1, 1], [], []>} : vector<16x16xf32>, vector<16x8xf32>, vector<16x8xf32> -> vector<16x8xf32>
    %367 = vector.extract_strided_slice %324 {offsets = [8, 0], sizes = [8, 32], strides = [1, 1]} : vector<32x32xf32> to vector<8x32xf32>
    %cst_157 = arith.constant dense<0.000000e+00> : vector<16x32xf32>
    %368 = tpu.matmul %366, %367, %cst_157 {dimension_numbers = #tpu.dot_dimension_numbers<[1], [0], [0], [1], [0, 0, 1, 1], [], []>} : vector<16x8xf32>, vector<8x32xf32>, vector<16x32xf32> -> vector<16x32xf32>
    %369 = arith.addf %348, %368 : vector<16x32xf32>
    %370 = vector.extract_strided_slice %320 {offsets = [0, 16], sizes = [16, 8], strides = [1, 1]} : vector<16x32xf32> to vector<16x8xf32>
    %371 = vector.extract_strided_slice %321 {offsets = [0, 16], sizes = [16, 8], strides = [1, 1]} : vector<16x32xf32> to vector<16x8xf32>
    %cst_158 = arith.constant dense<0.000000e+00> : vector<16x16xf32>
    %372 = tpu.matmul %370, %371, %cst_158 {dimension_numbers = #tpu.dot_dimension_numbers<[1], [1], [0], [0], [0, 0, 1, 0], [], []>} : vector<16x8xf32>, vector<16x8xf32>, vector<16x16xf32> -> vector<16x16xf32>
    %cst_159 = arith.constant 0.353553385 : f32
    %373 = vector.broadcast %cst_159 : f32 to vector<16x16xf32>
    %374 = arith.mulf %372, %373 : vector<16x16xf32>
    %375 = arith.addf %374, %4 : vector<16x16xf32>
    %cst_160 = arith.constant dense<0xFF800000> : vector<16xf32>
    %376 = vector.multi_reduction <maximumf>, %375, %cst_160 [1] : vector<16x16xf32> to vector<16xf32>
    %377 = vector.shape_cast %376 : vector<16xf32> to vector<16x1xf32>
    %378 = vector.broadcast %377 : vector<16x1xf32> to vector<16x16xf32>
    %379 = arith.subf %375, %378 : vector<16x16xf32>
    %380 = math.exp %379 : vector<16x16xf32>
    %cst_161 = arith.constant dense<0.000000e+00> : vector<16xf32>
    %381 = vector.multi_reduction <add>, %380, %cst_161 [1] : vector<16x16xf32> to vector<16xf32>
    %382 = vector.shape_cast %381 : vector<16xf32> to vector<16x1xf32>
    %383 = tpu.reciprocal %382 {approx = true} : vector<16x1xf32> -> vector<16x1xf32>
    %384 = vector.broadcast %383 : vector<16x1xf32> to vector<16x16xf32>
    %385 = arith.mulf %380, %384 : vector<16x16xf32>
    %386 = vector.extract_strided_slice %322 {offsets = [0, 16], sizes = [16, 8], strides = [1, 1]} : vector<16x32xf32> to vector<16x8xf32>
    %cst_162 = arith.constant dense<0.000000e+00> : vector<16x8xf32>
    %387 = tpu.matmul %385, %386, %cst_162 {dimension_numbers = #tpu.dot_dimension_numbers<[1], [0], [0], [1], [0, 0, 1, 1], [], []>} : vector<16x16xf32>, vector<16x8xf32>, vector<16x8xf32> -> vector<16x8xf32>
    %388 = vector.extract_strided_slice %324 {offsets = [16, 0], sizes = [8, 32], strides = [1, 1]} : vector<32x32xf32> to vector<8x32xf32>
    %cst_163 = arith.constant dense<0.000000e+00> : vector<16x32xf32>
    %389 = tpu.matmul %387, %388, %cst_163 {dimension_numbers = #tpu.dot_dimension_numbers<[1], [0], [0], [1], [0, 0, 1, 1], [], []>} : vector<16x8xf32>, vector<8x32xf32>, vector<16x32xf32> -> vector<16x32xf32>
    %390 = arith.addf %369, %389 : vector<16x32xf32>
    %391 = vector.extract_strided_slice %320 {offsets = [0, 24], sizes = [16, 8], strides = [1, 1]} : vector<16x32xf32> to vector<16x8xf32>
    %392 = vector.extract_strided_slice %321 {offsets = [0, 24], sizes = [16, 8], strides = [1, 1]} : vector<16x32xf32> to vector<16x8xf32>
    %cst_164 = arith.constant dense<0.000000e+00> : vector<16x16xf32>
    %393 = tpu.matmul %391, %392, %cst_164 {dimension_numbers = #tpu.dot_dimension_numbers<[1], [1], [0], [0], [0, 0, 1, 0], [], []>} : vector<16x8xf32>, vector<16x8xf32>, vector<16x16xf32> -> vector<16x16xf32>
    %cst_165 = arith.constant 0.353553385 : f32
    %394 = vector.broadcast %cst_165 : f32 to vector<16x16xf32>
    %395 = arith.mulf %393, %394 : vector<16x16xf32>
    %396 = arith.addf %395, %4 : vector<16x16xf32>
    %cst_166 = arith.constant dense<0xFF800000> : vector<16xf32>
    %397 = vector.multi_reduction <maximumf>, %396, %cst_166 [1] : vector<16x16xf32> to vector<16xf32>
    %398 = vector.shape_cast %397 : vector<16xf32> to vector<16x1xf32>
    %399 = vector.broadcast %398 : vector<16x1xf32> to vector<16x16xf32>
    %400 = arith.subf %396, %399 : vector<16x16xf32>
    %401 = math.exp %400 : vector<16x16xf32>
    %cst_167 = arith.constant dense<0.000000e+00> : vector<16xf32>
    %402 = vector.multi_reduction <add>, %401, %cst_167 [1] : vector<16x16xf32> to vector<16xf32>
    %403 = vector.shape_cast %402 : vector<16xf32> to vector<16x1xf32>
    %404 = tpu.reciprocal %403 {approx = true} : vector<16x1xf32> -> vector<16x1xf32>
    %405 = vector.broadcast %404 : vector<16x1xf32> to vector<16x16xf32>
    %406 = arith.mulf %401, %405 : vector<16x16xf32>
    %407 = vector.extract_strided_slice %322 {offsets = [0, 24], sizes = [16, 8], strides = [1, 1]} : vector<16x32xf32> to vector<16x8xf32>
    %cst_168 = arith.constant dense<0.000000e+00> : vector<16x8xf32>
    %408 = tpu.matmul %406, %407, %cst_168 {dimension_numbers = #tpu.dot_dimension_numbers<[1], [0], [0], [1], [0, 0, 1, 1], [], []>} : vector<16x16xf32>, vector<16x8xf32>, vector<16x8xf32> -> vector<16x8xf32>
    %409 = vector.extract_strided_slice %324 {offsets = [24, 0], sizes = [8, 32], strides = [1, 1]} : vector<32x32xf32> to vector<8x32xf32>
    %cst_169 = arith.constant dense<0.000000e+00> : vector<16x32xf32>
    %410 = tpu.matmul %408, %409, %cst_169 {dimension_numbers = #tpu.dot_dimension_numbers<[1], [0], [0], [1], [0, 0, 1, 1], [], []>} : vector<16x8xf32>, vector<8x32xf32>, vector<16x32xf32> -> vector<16x32xf32>
    %411 = arith.addf %390, %410 : vector<16x32xf32>
    %412 = vector.broadcast %326 : vector<1x32xf32> to vector<16x32xf32>
    %413 = arith.addf %411, %412 : vector<16x32xf32>
    %414 = arith.addf %308, %413 : vector<16x32xf32>
    %415 = vector.extract_strided_slice %310 {offsets = [0, 0], sizes = [1, 32], strides = [1, 1]} : vector<3x32xf32> to vector<1x32xf32>
    %416 = vector.extract_strided_slice %312 {offsets = [0, 0], sizes = [1, 32], strides = [1, 1]} : vector<3x32xf32> to vector<1x32xf32>
    %cst_170 = arith.constant dense<0.000000e+00> : vector<16xf32>
    %417 = vector.multi_reduction <add>, %414, %cst_170 [1] : vector<16x32xf32> to vector<16xf32>
    %418 = vector.shape_cast %417 : vector<16xf32> to vector<16x1xf32>
    %cst_171 = arith.constant 3.200000e+01 : f32
    %419 = vector.broadcast %cst_171 : f32 to vector<16x1xf32>
    %420 = arith.divf %418, %419 : vector<16x1xf32>
    %421 = vector.broadcast %420 : vector<16x1xf32> to vector<16x32xf32>
    %422 = arith.subf %414, %421 : vector<16x32xf32>
    %423 = arith.mulf %422, %422 : vector<16x32xf32>
    %cst_172 = arith.constant dense<0.000000e+00> : vector<16xf32>
    %424 = vector.multi_reduction <add>, %423, %cst_172 [1] : vector<16x32xf32> to vector<16xf32>
    %425 = vector.shape_cast %424 : vector<16xf32> to vector<16x1xf32>
    %cst_173 = arith.constant 3.200000e+01 : f32
    %426 = vector.broadcast %cst_173 : f32 to vector<16x1xf32>
    %427 = arith.divf %425, %426 : vector<16x1xf32>
    %428 = vector.broadcast %420 : vector<16x1xf32> to vector<16x32xf32>
    %429 = arith.subf %414, %428 : vector<16x32xf32>
    %cst_174 = arith.constant 9.99999974E-6 : f32
    %430 = vector.broadcast %cst_174 : f32 to vector<16x1xf32>
    %431 = arith.addf %427, %430 : vector<16x1xf32>
    %432 = math.rsqrt %431 : vector<16x1xf32>
    %433 = vector.broadcast %432 : vector<16x1xf32> to vector<16x32xf32>
    %434 = arith.mulf %429, %433 : vector<16x32xf32>
    %435 = vector.broadcast %415 : vector<1x32xf32> to vector<16x32xf32>
    %436 = arith.mulf %434, %435 : vector<16x32xf32>
    %437 = vector.broadcast %416 : vector<1x32xf32> to vector<16x32xf32>
    %438 = arith.addf %436, %437 : vector<16x32xf32>
    %c1_175 = arith.constant 1 : index
    %c0_176 = arith.constant 0 : index
    %c0_177 = arith.constant 0 : index
    %439 = vector.load %arg10[%c1_175, %c0_176, %c0_177] : memref<2x32x32xf32, #tpu.memory_space<vmem>>, vector<1x32x32xf32>
    %440 = vector.shape_cast %439 : vector<1x32x32xf32> to vector<32x32xf32>
    %cst_178 = arith.constant dense<0.000000e+00> : vector<16x32xf32>
    %441 = tpu.matmul %438, %440, %cst_178 {dimension_numbers = #tpu.dot_dimension_numbers<[1], [0], [0], [1], [0, 0, 1, 1], [], []>} : vector<16x32xf32>, vector<32x32xf32>, vector<16x32xf32> -> vector<16x32xf32>
    %c1_179 = arith.constant 1 : index
    %c0_180 = arith.constant 0 : index
    %c0_181 = arith.constant 0 : index
    %442 = vector.load %arg11[%c1_179, %c0_180, %c0_181] : memref<2x1x32xf32, #tpu.memory_space<vmem>>, vector<1x1x32xf32>
    %443 = vector.shape_cast %442 : vector<1x1x32xf32> to vector<1x32xf32>
    %444 = vector.broadcast %443 : vector<1x32xf32> to vector<16x32xf32>
    %445 = arith.addf %441, %444 : vector<16x32xf32>
    %c1_182 = arith.constant 1 : index
    %c0_183 = arith.constant 0 : index
    %c0_184 = arith.constant 0 : index
    %446 = vector.load %arg12[%c1_182, %c0_183, %c0_184] : memref<2x32x64xf32, #tpu.memory_space<vmem>>, vector<1x32x64xf32>
    %447 = vector.shape_cast %446 : vector<1x32x64xf32> to vector<32x64xf32>
    %cst_185 = arith.constant dense<0.000000e+00> : vector<16x64xf32>
    %448 = tpu.matmul %3, %447, %cst_185 {dimension_numbers = #tpu.dot_dimension_numbers<[1], [0], [0], [1], [0, 0, 1, 1], [], []>} : vector<16x32xf32>, vector<32x64xf32>, vector<16x64xf32> -> vector<16x64xf32>
    %c1_186 = arith.constant 1 : index
    %c0_187 = arith.constant 0 : index
    %c0_188 = arith.constant 0 : index
    %449 = vector.load %arg13[%c1_186, %c0_187, %c0_188] : memref<2x1x64xf32, #tpu.memory_space<vmem>>, vector<1x1x64xf32>
    %450 = vector.shape_cast %449 : vector<1x1x64xf32> to vector<1x64xf32>
    %451 = vector.broadcast %450 : vector<1x64xf32> to vector<16x64xf32>
    %452 = arith.addf %448, %451 : vector<16x64xf32>
    %453 = vector.extract_strided_slice %452 {offsets = [0, 0], sizes = [16, 32], strides = [1, 1]} : vector<16x64xf32> to vector<16x32xf32>
    %454 = vector.extract_strided_slice %452 {offsets = [0, 32], sizes = [16, 32], strides = [1, 1]} : vector<16x64xf32> to vector<16x32xf32>
    %c1_189 = arith.constant 1 : index
    %c0_190 = arith.constant 0 : index
    %c0_191 = arith.constant 0 : index
    %455 = vector.load %arg14[%c1_189, %c0_190, %c0_191] : memref<2x32x32xf32, #tpu.memory_space<vmem>>, vector<1x32x32xf32>
    %456 = vector.shape_cast %455 : vector<1x32x32xf32> to vector<32x32xf32>
    %c1_192 = arith.constant 1 : index
    %c0_193 = arith.constant 0 : index
    %c0_194 = arith.constant 0 : index
    %457 = vector.load %arg15[%c1_192, %c0_193, %c0_194] : memref<2x1x32xf32, #tpu.memory_space<vmem>>, vector<1x1x32xf32>
    %458 = vector.shape_cast %457 : vector<1x1x32xf32> to vector<1x32xf32>
    %cst_195 = arith.constant 0.000000e+00 : f32
    %459 = vector.broadcast %cst_195 : f32 to vector<16x32xf32>
    %460 = vector.extract_strided_slice %445 {offsets = [0, 0], sizes = [16, 8], strides = [1, 1]} : vector<16x32xf32> to vector<16x8xf32>
    %461 = vector.extract_strided_slice %453 {offsets = [0, 0], sizes = [16, 8], strides = [1, 1]} : vector<16x32xf32> to vector<16x8xf32>
    %cst_196 = arith.constant dense<0.000000e+00> : vector<16x16xf32>
    %462 = tpu.matmul %460, %461, %cst_196 {dimension_numbers = #tpu.dot_dimension_numbers<[1], [1], [0], [0], [0, 0, 1, 0], [], []>} : vector<16x8xf32>, vector<16x8xf32>, vector<16x16xf32> -> vector<16x16xf32>
    %cst_197 = arith.constant 0.353553385 : f32
    %463 = vector.broadcast %cst_197 : f32 to vector<16x16xf32>
    %464 = arith.mulf %462, %463 : vector<16x16xf32>
    %465 = arith.addf %464, %5 : vector<16x16xf32>
    %cst_198 = arith.constant dense<0xFF800000> : vector<16xf32>
    %466 = vector.multi_reduction <maximumf>, %465, %cst_198 [1] : vector<16x16xf32> to vector<16xf32>
    %467 = vector.shape_cast %466 : vector<16xf32> to vector<16x1xf32>
    %468 = vector.broadcast %467 : vector<16x1xf32> to vector<16x16xf32>
    %469 = arith.subf %465, %468 : vector<16x16xf32>
    %470 = math.exp %469 : vector<16x16xf32>
    %cst_199 = arith.constant dense<0.000000e+00> : vector<16xf32>
    %471 = vector.multi_reduction <add>, %470, %cst_199 [1] : vector<16x16xf32> to vector<16xf32>
    %472 = vector.shape_cast %471 : vector<16xf32> to vector<16x1xf32>
    %473 = tpu.reciprocal %472 {approx = true} : vector<16x1xf32> -> vector<16x1xf32>
    %474 = vector.broadcast %473 : vector<16x1xf32> to vector<16x16xf32>
    %475 = arith.mulf %470, %474 : vector<16x16xf32>
    %476 = vector.extract_strided_slice %454 {offsets = [0, 0], sizes = [16, 8], strides = [1, 1]} : vector<16x32xf32> to vector<16x8xf32>
    %cst_200 = arith.constant dense<0.000000e+00> : vector<16x8xf32>
    %477 = tpu.matmul %475, %476, %cst_200 {dimension_numbers = #tpu.dot_dimension_numbers<[1], [0], [0], [1], [0, 0, 1, 1], [], []>} : vector<16x16xf32>, vector<16x8xf32>, vector<16x8xf32> -> vector<16x8xf32>
    %478 = vector.extract_strided_slice %456 {offsets = [0, 0], sizes = [8, 32], strides = [1, 1]} : vector<32x32xf32> to vector<8x32xf32>
    %cst_201 = arith.constant dense<0.000000e+00> : vector<16x32xf32>
    %479 = tpu.matmul %477, %478, %cst_201 {dimension_numbers = #tpu.dot_dimension_numbers<[1], [0], [0], [1], [0, 0, 1, 1], [], []>} : vector<16x8xf32>, vector<8x32xf32>, vector<16x32xf32> -> vector<16x32xf32>
    %480 = arith.addf %459, %479 : vector<16x32xf32>
    %481 = vector.extract_strided_slice %445 {offsets = [0, 8], sizes = [16, 8], strides = [1, 1]} : vector<16x32xf32> to vector<16x8xf32>
    %482 = vector.extract_strided_slice %453 {offsets = [0, 8], sizes = [16, 8], strides = [1, 1]} : vector<16x32xf32> to vector<16x8xf32>
    %cst_202 = arith.constant dense<0.000000e+00> : vector<16x16xf32>
    %483 = tpu.matmul %481, %482, %cst_202 {dimension_numbers = #tpu.dot_dimension_numbers<[1], [1], [0], [0], [0, 0, 1, 0], [], []>} : vector<16x8xf32>, vector<16x8xf32>, vector<16x16xf32> -> vector<16x16xf32>
    %cst_203 = arith.constant 0.353553385 : f32
    %484 = vector.broadcast %cst_203 : f32 to vector<16x16xf32>
    %485 = arith.mulf %483, %484 : vector<16x16xf32>
    %486 = arith.addf %485, %5 : vector<16x16xf32>
    %cst_204 = arith.constant dense<0xFF800000> : vector<16xf32>
    %487 = vector.multi_reduction <maximumf>, %486, %cst_204 [1] : vector<16x16xf32> to vector<16xf32>
    %488 = vector.shape_cast %487 : vector<16xf32> to vector<16x1xf32>
    %489 = vector.broadcast %488 : vector<16x1xf32> to vector<16x16xf32>
    %490 = arith.subf %486, %489 : vector<16x16xf32>
    %491 = math.exp %490 : vector<16x16xf32>
    %cst_205 = arith.constant dense<0.000000e+00> : vector<16xf32>
    %492 = vector.multi_reduction <add>, %491, %cst_205 [1] : vector<16x16xf32> to vector<16xf32>
    %493 = vector.shape_cast %492 : vector<16xf32> to vector<16x1xf32>
    %494 = tpu.reciprocal %493 {approx = true} : vector<16x1xf32> -> vector<16x1xf32>
    %495 = vector.broadcast %494 : vector<16x1xf32> to vector<16x16xf32>
    %496 = arith.mulf %491, %495 : vector<16x16xf32>
    %497 = vector.extract_strided_slice %454 {offsets = [0, 8], sizes = [16, 8], strides = [1, 1]} : vector<16x32xf32> to vector<16x8xf32>
    %cst_206 = arith.constant dense<0.000000e+00> : vector<16x8xf32>
    %498 = tpu.matmul %496, %497, %cst_206 {dimension_numbers = #tpu.dot_dimension_numbers<[1], [0], [0], [1], [0, 0, 1, 1], [], []>} : vector<16x16xf32>, vector<16x8xf32>, vector<16x8xf32> -> vector<16x8xf32>
    %499 = vector.extract_strided_slice %456 {offsets = [8, 0], sizes = [8, 32], strides = [1, 1]} : vector<32x32xf32> to vector<8x32xf32>
    %cst_207 = arith.constant dense<0.000000e+00> : vector<16x32xf32>
    %500 = tpu.matmul %498, %499, %cst_207 {dimension_numbers = #tpu.dot_dimension_numbers<[1], [0], [0], [1], [0, 0, 1, 1], [], []>} : vector<16x8xf32>, vector<8x32xf32>, vector<16x32xf32> -> vector<16x32xf32>
    %501 = arith.addf %480, %500 : vector<16x32xf32>
    %502 = vector.extract_strided_slice %445 {offsets = [0, 16], sizes = [16, 8], strides = [1, 1]} : vector<16x32xf32> to vector<16x8xf32>
    %503 = vector.extract_strided_slice %453 {offsets = [0, 16], sizes = [16, 8], strides = [1, 1]} : vector<16x32xf32> to vector<16x8xf32>
    %cst_208 = arith.constant dense<0.000000e+00> : vector<16x16xf32>
    %504 = tpu.matmul %502, %503, %cst_208 {dimension_numbers = #tpu.dot_dimension_numbers<[1], [1], [0], [0], [0, 0, 1, 0], [], []>} : vector<16x8xf32>, vector<16x8xf32>, vector<16x16xf32> -> vector<16x16xf32>
    %cst_209 = arith.constant 0.353553385 : f32
    %505 = vector.broadcast %cst_209 : f32 to vector<16x16xf32>
    %506 = arith.mulf %504, %505 : vector<16x16xf32>
    %507 = arith.addf %506, %5 : vector<16x16xf32>
    %cst_210 = arith.constant dense<0xFF800000> : vector<16xf32>
    %508 = vector.multi_reduction <maximumf>, %507, %cst_210 [1] : vector<16x16xf32> to vector<16xf32>
    %509 = vector.shape_cast %508 : vector<16xf32> to vector<16x1xf32>
    %510 = vector.broadcast %509 : vector<16x1xf32> to vector<16x16xf32>
    %511 = arith.subf %507, %510 : vector<16x16xf32>
    %512 = math.exp %511 : vector<16x16xf32>
    %cst_211 = arith.constant dense<0.000000e+00> : vector<16xf32>
    %513 = vector.multi_reduction <add>, %512, %cst_211 [1] : vector<16x16xf32> to vector<16xf32>
    %514 = vector.shape_cast %513 : vector<16xf32> to vector<16x1xf32>
    %515 = tpu.reciprocal %514 {approx = true} : vector<16x1xf32> -> vector<16x1xf32>
    %516 = vector.broadcast %515 : vector<16x1xf32> to vector<16x16xf32>
    %517 = arith.mulf %512, %516 : vector<16x16xf32>
    %518 = vector.extract_strided_slice %454 {offsets = [0, 16], sizes = [16, 8], strides = [1, 1]} : vector<16x32xf32> to vector<16x8xf32>
    %cst_212 = arith.constant dense<0.000000e+00> : vector<16x8xf32>
    %519 = tpu.matmul %517, %518, %cst_212 {dimension_numbers = #tpu.dot_dimension_numbers<[1], [0], [0], [1], [0, 0, 1, 1], [], []>} : vector<16x16xf32>, vector<16x8xf32>, vector<16x8xf32> -> vector<16x8xf32>
    %520 = vector.extract_strided_slice %456 {offsets = [16, 0], sizes = [8, 32], strides = [1, 1]} : vector<32x32xf32> to vector<8x32xf32>
    %cst_213 = arith.constant dense<0.000000e+00> : vector<16x32xf32>
    %521 = tpu.matmul %519, %520, %cst_213 {dimension_numbers = #tpu.dot_dimension_numbers<[1], [0], [0], [1], [0, 0, 1, 1], [], []>} : vector<16x8xf32>, vector<8x32xf32>, vector<16x32xf32> -> vector<16x32xf32>
    %522 = arith.addf %501, %521 : vector<16x32xf32>
    %523 = vector.extract_strided_slice %445 {offsets = [0, 24], sizes = [16, 8], strides = [1, 1]} : vector<16x32xf32> to vector<16x8xf32>
    %524 = vector.extract_strided_slice %453 {offsets = [0, 24], sizes = [16, 8], strides = [1, 1]} : vector<16x32xf32> to vector<16x8xf32>
    %cst_214 = arith.constant dense<0.000000e+00> : vector<16x16xf32>
    %525 = tpu.matmul %523, %524, %cst_214 {dimension_numbers = #tpu.dot_dimension_numbers<[1], [1], [0], [0], [0, 0, 1, 0], [], []>} : vector<16x8xf32>, vector<16x8xf32>, vector<16x16xf32> -> vector<16x16xf32>
    %cst_215 = arith.constant 0.353553385 : f32
    %526 = vector.broadcast %cst_215 : f32 to vector<16x16xf32>
    %527 = arith.mulf %525, %526 : vector<16x16xf32>
    %528 = arith.addf %527, %5 : vector<16x16xf32>
    %cst_216 = arith.constant dense<0xFF800000> : vector<16xf32>
    %529 = vector.multi_reduction <maximumf>, %528, %cst_216 [1] : vector<16x16xf32> to vector<16xf32>
    %530 = vector.shape_cast %529 : vector<16xf32> to vector<16x1xf32>
    %531 = vector.broadcast %530 : vector<16x1xf32> to vector<16x16xf32>
    %532 = arith.subf %528, %531 : vector<16x16xf32>
    %533 = math.exp %532 : vector<16x16xf32>
    %cst_217 = arith.constant dense<0.000000e+00> : vector<16xf32>
    %534 = vector.multi_reduction <add>, %533, %cst_217 [1] : vector<16x16xf32> to vector<16xf32>
    %535 = vector.shape_cast %534 : vector<16xf32> to vector<16x1xf32>
    %536 = tpu.reciprocal %535 {approx = true} : vector<16x1xf32> -> vector<16x1xf32>
    %537 = vector.broadcast %536 : vector<16x1xf32> to vector<16x16xf32>
    %538 = arith.mulf %533, %537 : vector<16x16xf32>
    %539 = vector.extract_strided_slice %454 {offsets = [0, 24], sizes = [16, 8], strides = [1, 1]} : vector<16x32xf32> to vector<16x8xf32>
    %cst_218 = arith.constant dense<0.000000e+00> : vector<16x8xf32>
    %540 = tpu.matmul %538, %539, %cst_218 {dimension_numbers = #tpu.dot_dimension_numbers<[1], [0], [0], [1], [0, 0, 1, 1], [], []>} : vector<16x16xf32>, vector<16x8xf32>, vector<16x8xf32> -> vector<16x8xf32>
    %541 = vector.extract_strided_slice %456 {offsets = [24, 0], sizes = [8, 32], strides = [1, 1]} : vector<32x32xf32> to vector<8x32xf32>
    %cst_219 = arith.constant dense<0.000000e+00> : vector<16x32xf32>
    %542 = tpu.matmul %540, %541, %cst_219 {dimension_numbers = #tpu.dot_dimension_numbers<[1], [0], [0], [1], [0, 0, 1, 1], [], []>} : vector<16x8xf32>, vector<8x32xf32>, vector<16x32xf32> -> vector<16x32xf32>
    %543 = arith.addf %522, %542 : vector<16x32xf32>
    %544 = vector.broadcast %458 : vector<1x32xf32> to vector<16x32xf32>
    %545 = arith.addf %543, %544 : vector<16x32xf32>
    %546 = arith.addf %438, %545 : vector<16x32xf32>
    %547 = vector.extract_strided_slice %310 {offsets = [1, 0], sizes = [1, 32], strides = [1, 1]} : vector<3x32xf32> to vector<1x32xf32>
    %548 = vector.extract_strided_slice %312 {offsets = [1, 0], sizes = [1, 32], strides = [1, 1]} : vector<3x32xf32> to vector<1x32xf32>
    %cst_220 = arith.constant dense<0.000000e+00> : vector<16xf32>
    %549 = vector.multi_reduction <add>, %546, %cst_220 [1] : vector<16x32xf32> to vector<16xf32>
    %550 = vector.shape_cast %549 : vector<16xf32> to vector<16x1xf32>
    %cst_221 = arith.constant 3.200000e+01 : f32
    %551 = vector.broadcast %cst_221 : f32 to vector<16x1xf32>
    %552 = arith.divf %550, %551 : vector<16x1xf32>
    %553 = vector.broadcast %552 : vector<16x1xf32> to vector<16x32xf32>
    %554 = arith.subf %546, %553 : vector<16x32xf32>
    %555 = arith.mulf %554, %554 : vector<16x32xf32>
    %cst_222 = arith.constant dense<0.000000e+00> : vector<16xf32>
    %556 = vector.multi_reduction <add>, %555, %cst_222 [1] : vector<16x32xf32> to vector<16xf32>
    %557 = vector.shape_cast %556 : vector<16xf32> to vector<16x1xf32>
    %cst_223 = arith.constant 3.200000e+01 : f32
    %558 = vector.broadcast %cst_223 : f32 to vector<16x1xf32>
    %559 = arith.divf %557, %558 : vector<16x1xf32>
    %560 = vector.broadcast %552 : vector<16x1xf32> to vector<16x32xf32>
    %561 = arith.subf %546, %560 : vector<16x32xf32>
    %cst_224 = arith.constant 9.99999974E-6 : f32
    %562 = vector.broadcast %cst_224 : f32 to vector<16x1xf32>
    %563 = arith.addf %559, %562 : vector<16x1xf32>
    %564 = math.rsqrt %563 : vector<16x1xf32>
    %565 = vector.broadcast %564 : vector<16x1xf32> to vector<16x32xf32>
    %566 = arith.mulf %561, %565 : vector<16x32xf32>
    %567 = vector.broadcast %547 : vector<1x32xf32> to vector<16x32xf32>
    %568 = arith.mulf %566, %567 : vector<16x32xf32>
    %569 = vector.broadcast %548 : vector<1x32xf32> to vector<16x32xf32>
    %570 = arith.addf %568, %569 : vector<16x32xf32>
    %c1_225 = arith.constant 1 : index
    %c0_226 = arith.constant 0 : index
    %c0_227 = arith.constant 0 : index
    %571 = vector.load %arg16[%c1_225, %c0_226, %c0_227] : memref<2x32x64xf32, #tpu.memory_space<vmem>>, vector<1x32x64xf32>
    %572 = vector.shape_cast %571 : vector<1x32x64xf32> to vector<32x64xf32>
    %cst_228 = arith.constant dense<0.000000e+00> : vector<16x64xf32>
    %573 = tpu.matmul %570, %572, %cst_228 {dimension_numbers = #tpu.dot_dimension_numbers<[1], [0], [0], [1], [0, 0, 1, 1], [], []>} : vector<16x32xf32>, vector<32x64xf32>, vector<16x64xf32> -> vector<16x64xf32>
    %c1_229 = arith.constant 1 : index
    %c0_230 = arith.constant 0 : index
    %c0_231 = arith.constant 0 : index
    %574 = vector.load %arg17[%c1_229, %c0_230, %c0_231] : memref<2x1x64xf32, #tpu.memory_space<vmem>>, vector<1x1x64xf32>
    %575 = vector.shape_cast %574 : vector<1x1x64xf32> to vector<1x64xf32>
    %576 = vector.broadcast %575 : vector<1x64xf32> to vector<16x64xf32>
    %577 = arith.addf %573, %576 : vector<16x64xf32>
    %cst_232 = arith.constant 0.000000e+00 : f32
    %578 = vector.broadcast %cst_232 : f32 to vector<16x64xf32>
    %579 = arith.maximumf %577, %578 : vector<16x64xf32>
    %c1_233 = arith.constant 1 : index
    %c0_234 = arith.constant 0 : index
    %c0_235 = arith.constant 0 : index
    %580 = vector.load %arg18[%c1_233, %c0_234, %c0_235] : memref<2x64x32xf32, #tpu.memory_space<vmem>>, vector<1x64x32xf32>
    %581 = vector.shape_cast %580 : vector<1x64x32xf32> to vector<64x32xf32>
    %cst_236 = arith.constant dense<0.000000e+00> : vector<16x32xf32>
    %582 = tpu.matmul %579, %581, %cst_236 {dimension_numbers = #tpu.dot_dimension_numbers<[1], [0], [0], [1], [0, 0, 1, 1], [], []>} : vector<16x64xf32>, vector<64x32xf32>, vector<16x32xf32> -> vector<16x32xf32>
    %c1_237 = arith.constant 1 : index
    %c0_238 = arith.constant 0 : index
    %c0_239 = arith.constant 0 : index
    %583 = vector.load %arg19[%c1_237, %c0_238, %c0_239] : memref<2x1x32xf32, #tpu.memory_space<vmem>>, vector<1x1x32xf32>
    %584 = vector.shape_cast %583 : vector<1x1x32xf32> to vector<1x32xf32>
    %585 = vector.broadcast %584 : vector<1x32xf32> to vector<16x32xf32>
    %586 = arith.addf %582, %585 : vector<16x32xf32>
    %587 = arith.addf %570, %586 : vector<16x32xf32>
    %588 = vector.extract_strided_slice %310 {offsets = [2, 0], sizes = [1, 32], strides = [1, 1]} : vector<3x32xf32> to vector<1x32xf32>
    %589 = vector.extract_strided_slice %312 {offsets = [2, 0], sizes = [1, 32], strides = [1, 1]} : vector<3x32xf32> to vector<1x32xf32>
    %cst_240 = arith.constant dense<0.000000e+00> : vector<16xf32>
    %590 = vector.multi_reduction <add>, %587, %cst_240 [1] : vector<16x32xf32> to vector<16xf32>
    %591 = vector.shape_cast %590 : vector<16xf32> to vector<16x1xf32>
    %cst_241 = arith.constant 3.200000e+01 : f32
    %592 = vector.broadcast %cst_241 : f32 to vector<16x1xf32>
    %593 = arith.divf %591, %592 : vector<16x1xf32>
    %594 = vector.broadcast %593 : vector<16x1xf32> to vector<16x32xf32>
    %595 = arith.subf %587, %594 : vector<16x32xf32>
    %596 = arith.mulf %595, %595 : vector<16x32xf32>
    %cst_242 = arith.constant dense<0.000000e+00> : vector<16xf32>
    %597 = vector.multi_reduction <add>, %596, %cst_242 [1] : vector<16x32xf32> to vector<16xf32>
    %598 = vector.shape_cast %597 : vector<16xf32> to vector<16x1xf32>
    %cst_243 = arith.constant 3.200000e+01 : f32
    %599 = vector.broadcast %cst_243 : f32 to vector<16x1xf32>
    %600 = arith.divf %598, %599 : vector<16x1xf32>
    %601 = vector.broadcast %593 : vector<16x1xf32> to vector<16x32xf32>
    %602 = arith.subf %587, %601 : vector<16x32xf32>
    %cst_244 = arith.constant 9.99999974E-6 : f32
    %603 = vector.broadcast %cst_244 : f32 to vector<16x1xf32>
    %604 = arith.addf %600, %603 : vector<16x1xf32>
    %605 = math.rsqrt %604 : vector<16x1xf32>
    %606 = vector.broadcast %605 : vector<16x1xf32> to vector<16x32xf32>
    %607 = arith.mulf %602, %606 : vector<16x32xf32>
    %608 = vector.broadcast %588 : vector<1x32xf32> to vector<16x32xf32>
    %609 = arith.mulf %607, %608 : vector<16x32xf32>
    %610 = vector.broadcast %589 : vector<1x32xf32> to vector<16x32xf32>
    %611 = arith.addf %609, %610 : vector<16x32xf32>
    %c0_245 = arith.constant 0 : index
    %c0_246 = arith.constant 0 : index
    %612 = vector.load %arg22[%c0_245, %c0_246] : memref<32x32xf32, #tpu.memory_space<vmem>>, vector<32x32xf32>
    %c0_247 = arith.constant 0 : index
    %c0_248 = arith.constant 0 : index
    %613 = vector.load %arg23[%c0_247, %c0_248] : memref<1x32xf32, #tpu.memory_space<vmem>>, vector<1x32xf32>
    %cst_249 = arith.constant dense<0.000000e+00> : vector<16x32xf32>
    %614 = tpu.matmul %611, %612, %cst_249 {dimension_numbers = #tpu.dot_dimension_numbers<[1], [0], [0], [1], [0, 0, 1, 1], [], []>} : vector<16x32xf32>, vector<32x32xf32>, vector<16x32xf32> -> vector<16x32xf32>
    %615 = vector.broadcast %613 : vector<1x32xf32> to vector<16x32xf32>
    %616 = arith.addf %614, %615 : vector<16x32xf32>
    %cst_250 = arith.constant 0.000000e+00 : f32
    %617 = vector.broadcast %cst_250 : f32 to vector<16x32xf32>
    %618 = arith.maximumf %616, %617 : vector<16x32xf32>
    %c0_251 = arith.constant 0 : index
    %c0_252 = arith.constant 0 : index
    %619 = vector.load %arg24[%c0_251, %c0_252] : memref<32x16xf32, #tpu.memory_space<vmem>>, vector<32x16xf32>
    %c0_253 = arith.constant 0 : index
    %c0_254 = arith.constant 0 : index
    %620 = vector.load %arg25[%c0_253, %c0_254] : memref<1x16xf32, #tpu.memory_space<vmem>>, vector<1x16xf32>
    %cst_255 = arith.constant dense<0.000000e+00> : vector<16x16xf32>
    %621 = tpu.matmul %618, %619, %cst_255 {dimension_numbers = #tpu.dot_dimension_numbers<[1], [0], [0], [1], [0, 0, 1, 1], [], []>} : vector<16x32xf32>, vector<32x16xf32>, vector<16x16xf32> -> vector<16x16xf32>
    %622 = vector.broadcast %620 : vector<1x16xf32> to vector<16x16xf32>
    %623 = arith.addf %621, %622 : vector<16x16xf32>
    %c0_256 = arith.constant 0 : index
    %c0_257 = arith.constant 0 : index
    %624 = vector.load %arg26[%c0_256, %c0_257] : memref<16x16xf32, #tpu.memory_space<vmem>>, vector<16x16xf32>
    tpu.vector_store %arg26[%c0_256, %c0_257], %623 {strides = array<i32>} : memref<16x16xf32, #tpu.memory_space<vmem>>, vector<16x16xf32>,
    return
  }
  func.func @transform_0(%arg0: i32) -> (i32, i32) {
    %c0_i32 = arith.constant 0 : i32
    %c0_i32_0 = arith.constant 0 : i32
    %c0_i32_1 = arith.constant 0 : i32
    return %c0_i32, %c0_i32_0 : i32, i32
  }
  func.func @transform_1(%arg0: i32) -> (i32, i32) {
    %c0_i32 = arith.constant 0 : i32
    %c0_i32_0 = arith.constant 0 : i32
    %c0_i32_1 = arith.constant 0 : i32
    return %c0_i32, %c0_i32_0 : i32, i32
  }
  func.func @transform_2(%arg0: i32) -> (i32, i32) {
    %c0_i32 = arith.constant 0 : i32
    %c0_i32_0 = arith.constant 0 : i32
    %c0_i32_1 = arith.constant 0 : i32
    return %c0_i32, %c0_i32_0 : i32, i32
  }
  func.func @transform_3(%arg0: i32) -> (i32, i32) {
    %c0_i32 = arith.constant 0 : i32
    %c0_i32_0 = arith.constant 0 : i32
    %c0_i32_1 = arith.constant 0 : i32
    return %c0_i32, %c0_i32_0 : i32, i32
  }
  func.func @transform_4(%arg0: i32) -> (i32, i32) {
    %c0_i32 = arith.constant 0 : i32
    %c0_i32_0 = arith.constant 0 : i32
    %c0_i32_1 = arith.constant 0 : i32
    return %c0_i32, %c0_i32_0 : i32, i32
  }
  func.func @transform_5(%arg0: i32) -> (i32, i32, i32) {
    %c0_i32 = arith.constant 0 : i32
    %c0_i32_0 = arith.constant 0 : i32
    %c0_i32_1 = arith.constant 0 : i32
    %c0_i32_2 = arith.constant 0 : i32
    return %c0_i32, %c0_i32_0, %c0_i32_1 : i32, i32, i32
  }
  func.func @transform_6(%arg0: i32) -> (i32, i32, i32) {
    %c0_i32 = arith.constant 0 : i32
    %c0_i32_0 = arith.constant 0 : i32
    %c0_i32_1 = arith.constant 0 : i32
    %c0_i32_2 = arith.constant 0 : i32
    return %c0_i32, %c0_i32_0, %c0_i32_1 : i32, i32, i32
  }
  func.func @transform_7(%arg0: i32) -> (i32, i32, i32) {
    %c0_i32 = arith.constant 0 : i32
    %c0_i32_0 = arith.constant 0 : i32
    %c0_i32_1 = arith.constant 0 : i32
    %c0_i32_2 = arith.constant 0 : i32
    return %c0_i32, %c0_i32_0, %c0_i32_1 : i32, i32, i32
  }
  func.func @transform_8(%arg0: i32) -> (i32, i32, i32) {
    %c0_i32 = arith.constant 0 : i32
    %c0_i32_0 = arith.constant 0 : i32
    %c0_i32_1 = arith.constant 0 : i32
    %c0_i32_2 = arith.constant 0 : i32
    return %c0_i32, %c0_i32_0, %c0_i32_1 : i32, i32, i32
  }
  func.func @transform_9(%arg0: i32) -> (i32, i32, i32) {
    %c0_i32 = arith.constant 0 : i32
    %c0_i32_0 = arith.constant 0 : i32
    %c0_i32_1 = arith.constant 0 : i32
    %c0_i32_2 = arith.constant 0 : i32
    return %c0_i32, %c0_i32_0, %c0_i32_1 : i32, i32, i32
  }
  func.func @transform_10(%arg0: i32) -> (i32, i32, i32) {
    %c0_i32 = arith.constant 0 : i32
    %c0_i32_0 = arith.constant 0 : i32
    %c0_i32_1 = arith.constant 0 : i32
    %c0_i32_2 = arith.constant 0 : i32
    return %c0_i32, %c0_i32_0, %c0_i32_1 : i32, i32, i32
  }
  func.func @transform_11(%arg0: i32) -> (i32, i32, i32) {
    %c0_i32 = arith.constant 0 : i32
    %c0_i32_0 = arith.constant 0 : i32
    %c0_i32_1 = arith.constant 0 : i32
    %c0_i32_2 = arith.constant 0 : i32
    return %c0_i32, %c0_i32_0, %c0_i32_1 : i32, i32, i32
  }
  func.func @transform_12(%arg0: i32) -> (i32, i32, i32) {
    %c0_i32 = arith.constant 0 : i32
    %c0_i32_0 = arith.constant 0 : i32
    %c0_i32_1 = arith.constant 0 : i32
    %c0_i32_2 = arith.constant 0 : i32
    return %c0_i32, %c0_i32_0, %c0_i32_1 : i32, i32, i32
  }
  func.func @transform_13(%arg0: i32) -> (i32, i32, i32) {
    %c0_i32 = arith.constant 0 : i32
    %c0_i32_0 = arith.constant 0 : i32
    %c0_i32_1 = arith.constant 0 : i32
    %c0_i32_2 = arith.constant 0 : i32
    return %c0_i32, %c0_i32_0, %c0_i32_1 : i32, i32, i32
  }
  func.func @transform_14(%arg0: i32) -> (i32, i32, i32) {
    %c0_i32 = arith.constant 0 : i32
    %c0_i32_0 = arith.constant 0 : i32
    %c0_i32_1 = arith.constant 0 : i32
    %c0_i32_2 = arith.constant 0 : i32
    return %c0_i32, %c0_i32_0, %c0_i32_1 : i32, i32, i32
  }
  func.func @transform_15(%arg0: i32) -> (i32, i32, i32) {
    %c0_i32 = arith.constant 0 : i32
    %c0_i32_0 = arith.constant 0 : i32
    %c0_i32_1 = arith.constant 0 : i32
    %c0_i32_2 = arith.constant 0 : i32
    return %c0_i32, %c0_i32_0, %c0_i32_1 : i32, i32, i32
  }
  func.func @transform_16(%arg0: i32) -> (i32, i32, i32) {
    %c0_i32 = arith.constant 0 : i32
    %c0_i32_0 = arith.constant 0 : i32
    %c0_i32_1 = arith.constant 0 : i32
    %c0_i32_2 = arith.constant 0 : i32
    return %c0_i32, %c0_i32_0, %c0_i32_1 : i32, i32, i32
  }
  func.func @transform_17(%arg0: i32) -> (i32, i32, i32) {
    %c0_i32 = arith.constant 0 : i32
    %c0_i32_0 = arith.constant 0 : i32
    %c0_i32_1 = arith.constant 0 : i32
    %c0_i32_2 = arith.constant 0 : i32
    return %c0_i32, %c0_i32_0, %c0_i32_1 : i32, i32, i32
  }
  func.func @transform_18(%arg0: i32) -> (i32, i32, i32) {
    %c0_i32 = arith.constant 0 : i32
    %c0_i32_0 = arith.constant 0 : i32
    %c0_i32_1 = arith.constant 0 : i32
    %c0_i32_2 = arith.constant 0 : i32
    return %c0_i32, %c0_i32_0, %c0_i32_1 : i32, i32, i32
  }
  func.func @transform_19(%arg0: i32) -> (i32, i32, i32) {
    %c0_i32 = arith.constant 0 : i32
    %c0_i32_0 = arith.constant 0 : i32
    %c0_i32_1 = arith.constant 0 : i32
    %c0_i32_2 = arith.constant 0 : i32
    return %c0_i32, %c0_i32_0, %c0_i32_1 : i32, i32, i32
  }
  func.func @transform_20(%arg0: i32) -> (i32, i32, i32) {
    %c0_i32 = arith.constant 0 : i32
    %c0_i32_0 = arith.constant 0 : i32
    %c0_i32_1 = arith.constant 0 : i32
    %c0_i32_2 = arith.constant 0 : i32
    return %c0_i32, %c0_i32_0, %c0_i32_1 : i32, i32, i32
  }
  func.func @transform_21(%arg0: i32) -> (i32, i32) {
    %c0_i32 = arith.constant 0 : i32
    %c0_i32_0 = arith.constant 0 : i32
    %c0_i32_1 = arith.constant 0 : i32
    return %c0_i32, %c0_i32_0 : i32, i32
  }
  func.func @transform_22(%arg0: i32) -> (i32, i32) {
    %c0_i32 = arith.constant 0 : i32
    %c0_i32_0 = arith.constant 0 : i32
    %c0_i32_1 = arith.constant 0 : i32
    return %c0_i32, %c0_i32_0 : i32, i32
  }
  func.func @transform_23(%arg0: i32) -> (i32, i32) {
    %c0_i32 = arith.constant 0 : i32
    %c0_i32_0 = arith.constant 0 : i32
    %c0_i32_1 = arith.constant 0 : i32
    return %c0_i32, %c0_i32_0 : i32, i32
  }
  func.func @transform_24(%arg0: i32) -> (i32, i32) {
    %c0_i32 = arith.constant 0 : i32
    %c0_i32_0 = arith.constant 0 : i32
    %c0_i32_1 = arith.constant 0 : i32
    return %c0_i32, %c0_i32_0 : i32, i32
  }
  func.func @transform_25(%arg0: i32) -> (i32, i32) {
    %c0_i32 = arith.constant 0 : i32
    %c0_i32_0 = arith.constant 0 : i32
    %c0_i32_1 = arith.constant 0 : i32
    return %c0_i32, %c0_i32_0 : i32, i32
  }
}

</mosaic_0001>

<bundles_post_ra>
// kernel: spatial_decoder_forward.1
= control target key start
LH: loop header
LB: loop body
LE: loop exit
PB: predicated region body
PF: predicated region fallthrough
CT: control target
= control target key end

     0   :  { %s9023_s0 = inlined_call_operand.hbm [shape: f32[16,32], index: 0, kind: input, shape index: {}]   ;;  %s9024_s1 = inlined_call_operand.hbm [shape: f32[16,32], index: 1, kind: input, shape index: {}]   ;;  %s9025_s2 = inlined_call_operand.vmem [shape: f32[16,32], index: 2, kind: input, shape index: {}]   ;;  %s9026_s3 = inlined_call_operand.vmem [shape: f32[16,16], index: 3, kind: input, shape index: {}]   ;;  %s9027_s4 = inlined_call_operand.vmem [shape: f32[16,16], index: 4, kind: input, shape index: {}]   ;;  %s9028_s5 = inlined_call_operand.hbm [shape: f32[2,32,96], index: 5, kind: input, shape index: {}]   ;;  %s9029_s6 = inlined_call_operand.vmem [shape: f32[2,1,96], index: 6, kind: input, shape index: {}]   ;;  %s9030_s7 = inlined_call_operand.hbm [shape: f32[2,32,32], index: 7, kind: input, shape index: {}]   ;;  %s9031_s8 = inlined_call_operand.vmem [shape: f32[2,1,32], index: 8, kind: input, shape index: {}, may-alias: {8,10,14,18}]   ;;  %s9032_s9 = inlined_call_operand.hbm [shape: f32[2,32,32], index: 9, kind: input, shape index: {}]   ;;  %s9033_s10 = inlined_call_operand.vmem [shape: f32[2,1,32], index: 10, kind: input, shape index: {}, may-alias: {8,10,14,18}]   ;;  %s9034_s11 = inlined_call_operand.hbm [shape: f32[2,32,64], index: 11, kind: input, shape index: {}]   ;;  %s9035_s12 = inlined_call_operand.vmem [shape: f32[2,1,64], index: 12, kind: input, shape index: {}, may-alias: {12,16}]   ;;  %s9036_s13 = inlined_call_operand.hbm [shape: f32[2,32,32], index: 13, kind: input, shape index: {}]   ;;  %s9037_s14 = inlined_call_operand.vmem [shape: f32[2,1,32], index: 14, kind: input, shape index: {}, may-alias: {8,10,14,18}]   ;;  %s9038_s15 = inlined_call_operand.hbm [shape: f32[2,32,64], index: 15, kind: input, shape index: {}]   ;;  %s9039_s16 = inlined_call_operand.vmem [shape: f32[2,1,64], index: 16, kind: input, shape index: {}, may-alias: {12,16}]   ;;  %s9040_s17 = inlined_call_operand.vmem [shape: f32[2,64,32], index: 17, kind: input, shape index: {}]   ;;  %s9041_s18 = inlined_call_operand.vmem [shape: f32[2,1,32], index: 18, kind: input, shape index: {}, may-alias: {8,10,14,18}]   ;;  %s9042_s19 = inlined_call_operand.vmem [shape: f32[2,3,32], index: 19, kind: input, shape index: {}]   ;;  %s9043_s20 = inlined_call_operand.vmem [shape: f32[2,3,32], index: 20, kind: input, shape index: {}]   ;;  %s9044_s21 = inlined_call_operand.hbm [shape: f32[32,32], index: 21, kind: input, shape index: {}]   ;;  %s9045_s22 = inlined_call_operand.vmem [shape: f32[1,32], index: 22, kind: input, shape index: {}]   ;;  %s9046_s23 = inlined_call_operand.vmem [shape: f32[32,16], index: 23, kind: input, shape index: {}]   ;;  %s9047_s24 = inlined_call_operand.vmem [shape: f32[1,16], index: 24, kind: input, shape index: {}]   ;;  %s9048_s25 = inlined_call_operand.hbm [shape: f32[16,16], index: 25, kind: output, shape index: {}]  }
   0x1   :  { %9067 = sst [smem:[#allocation24_spill]] %s9023_s0 }
   0x2   :  { %9068 = sst [smem:[#allocation25_spill]] %s9024_s1 }
   0x3   :  { %9069 = sst [smem:[#allocation26_spill]] %s9025_s2 }
   0x4   :  { %9070 = sst [smem:[#allocation27_spill]] %s9026_s3 }
   0x5   :  { %9071 = sst [smem:[#allocation28_spill]] %s9027_s4 }
   0x6   :  { %9072 = sst [smem:[#allocation29_spill]] %s9028_s5 }
   0x7   :  { %9073 = sst [smem:[#allocation30_spill]] %s9029_s6 }
   0x8   :  { %9074 = sst [smem:[#allocation31_spill]] %s9030_s7 }
   0x9   :  { %9075 = sst [smem:[#allocation32_spill]] %s9031_s8 }
   0xa   :  { %9076 = sst [smem:[#allocation33_spill]] %s9032_s9 }
   0xb   :  { %9077 = sst [smem:[#allocation34_spill]] %s9047_s24 }
   0xc   :  { %9078 = sst [smem:[#allocation35_spill]] %s9048_s25 }
   0xd   :  { %30 = vsyncpa [#allocation3], 0 }
   0xe   :  { %31 = vsyncpa [#allocation6], 0 }
   0xf   :  { %32 = vsyncpa [#allocation9], 0 }
  0x10   :  { %33 = vsyncpa [#allocation12], 0 }
  0x11   :  { %34 = vsyncpa [#allocation15], 0 }
  0x12   :  { %35 = vsyncpa [#allocation4], 0  ;;  %s7983_s29 = smov [#allocation5]   ;;  %s7984_s6 = smov [#allocation8]  }
  0x13   :  { %s53_s2 = sshll.u32 %s7983_s29, 4  ;;  %s85_s30 = sshll.u32 %s7984_s6, 4  ;;  %s54_s2 = int_to_ptr.vmem [resolvable:$true] %s53_s2  ;;  %s8136_s30 = int_to_ptr.vmem [resolvable:$true] %s85_s30 }
  0x14   :  { %s9079_s26 = sld [smem:[#allocation25_spill]] }
  0x1a   :  { %s7751_s1 = scalar_lea.hbm %s9079_s26, 256 }
  0x1b   :  { %p7752_p0 = scmp.ne.s32.totalorder %s9079_s26, %s7751_s1  ;;  %p7755_p1 = scmp.lt.u32.totalorder %s7751_s1, %s9079_s26 }
  0x1d   :  { %p7757_p2 = pnand %p7755_p1, %p7752_p0 }
  0x1f   :  { %7760 = shalt.err (!%p7757_p2)
}
  0x20   :  { %s7761_s9 = scalar_lea.vmem %s54_s2, 256  ;;  %p7766_p4 = scmp.lt.s32.totalorder %s54_s2, %s54_s2 }
  0x21   :  { %p7762_p3 = scmp.ne.s32.totalorder %s54_s2, %s7761_s9  ;;  %p7767_p5 = scmp.lt.s32.totalorder %s7761_s9, %s7761_s9 }
  0x23   :  { %p7768_p6 = por %p7767_p5, %p7766_p4 }
  0x25   :  { %p7769_p7 = pnand %p7768_p6, %p7762_p3 }
  0x27   :  { %7772 = shalt.err (!%p7769_p7)
}
  0x28   :  { %s9060_s5 = smov 128   ;;  %s9061_s0 = smov 8  }
  0x29   :  { %59 = dma.hbm_to_vmem [thread:$0]  %s9079_s26, 256, %s54_s2, [#allocation6], %s9060_s5, %s9060_s5, %s9061_s0  }
  0x2a   :  { %s9080_s1 = sld [smem:[#allocation31_spill]] }
  0x30   :  { %s7773_s8 = scalar_lea.hbm %s9080_s1, 1024 }
  0x31   :  { %p7774_p8 = scmp.ne.s32.totalorder %s9080_s1, %s7773_s8  ;;  %p7777_p9 = scmp.lt.u32.totalorder %s7773_s8, %s9080_s1 }
  0x33   :  { %p7779_p10 = pnand %p7777_p9, %p7774_p8 }
  0x35   :  { %7782 = shalt.err (!%p7779_p10)
}
  0x36   :  { %s7783_s25 = scalar_lea.vmem %s8136_s30, 1024  ;;  %p7788_p12 = scmp.lt.s32.totalorder %s8136_s30, %s8136_s30 }
  0x37   :  { %p7784_p11 = scmp.ne.s32.totalorder %s8136_s30, %s7783_s25  ;;  %p7789_p13 = scmp.lt.s32.totalorder %s7783_s25, %s7783_s25 }
  0x39   :  { %p7790_p0 = por %p7789_p13, %p7788_p12 }
  0x3b   :  { %p7791_p1 = pnand %p7790_p0, %p7784_p11 }
  0x3d   :  { %7794 = shalt.err (!%p7791_p1)
}
  0x3e   :  { %91 = dma.hbm_to_vmem [thread:$0]  %s9080_s1, 1024, %s8136_s30, [#allocation9], %s9060_s5, %s9060_s5, %s9061_s0  }
  0x3f   :  { %s7987_s29 = smov [#allocation11]   ;;  %s7988_s7 = smov [#allocation14]  }
  0x40   :  { %s113_s6 = sshll.u32 %s7987_s29, 4  ;;  %s141_s3 = sshll.u32 %s7988_s7, 4  ;;  %s114_s6 = int_to_ptr.vmem [resolvable:$true] %s113_s6  ;;  %s8173_s3 = int_to_ptr.vmem [resolvable:$true] %s141_s3 }
  0x41   :  { %s7795_s27 = scalar_lea.hbm %s9034_s11, 1024 }
  0x42   :  { %p7796_p2 = scmp.ne.s32.totalorder %s9034_s11, %s7795_s27  ;;  %p7799_p3 = scmp.lt.u32.totalorder %s7795_s27, %s9034_s11 }
  0x44   :  { %p7801_p4 = pnand %p7799_p3, %p7796_p2 }
  0x46   :  { %7804 = shalt.err (!%p7801_p4)
}
  0x47   :  { %s7805_s30 = scalar_lea.vmem %s114_s6, 1024  ;;  %p7810_p6 = scmp.lt.s32.totalorder %s114_s6, %s114_s6 }
  0x48   :  { %p7806_p5 = scmp.ne.s32.totalorder %s114_s6, %s7805_s30  ;;  %p7811_p7 = scmp.lt.s32.totalorder %s7805_s30, %s7805_s30 }
  0x4a   :  { %p7812_p8 = por %p7811_p7, %p7810_p6 }
  0x4c   :  { %p7813_p9 = pnand %p7812_p8, %p7806_p5 }
  0x4e   :  { %7816 = shalt.err (!%p7813_p9)
}
  0x4f   :  { %119 = dma.hbm_to_vmem [thread:$0]  %s9034_s11, 1024, %s114_s6, [#allocation12], %s9060_s5, %s9060_s5, %s9061_s0  }
  0x50   :  { %s7817_s24 = scalar_lea.hbm %s9038_s15, 1024 }
  0x51   :  { %p7818_p10 = scmp.ne.s32.totalorder %s9038_s15, %s7817_s24  ;;  %p7821_p11 = scmp.lt.u32.totalorder %s7817_s24, %s9038_s15 }
  0x53   :  { %p7823_p12 = pnand %p7821_p11, %p7818_p10 }
  0x55   :  { %7826 = shalt.err (!%p7823_p12)
}
  0x56   :  { %s7827_s4 = scalar_lea.vmem %s8173_s3, 1024  ;;  %p7832_p0 = scmp.lt.s32.totalorder %s8173_s3, %s8173_s3 }
  0x57   :  { %p7828_p13 = scmp.ne.s32.totalorder %s8173_s3, %s7827_s4  ;;  %p7833_p1 = scmp.lt.s32.totalorder %s7827_s4, %s7827_s4 }
  0x59   :  { %p7834_p2 = por %p7833_p1, %p7832_p0 }
  0x5b   :  { %p7835_p3 = pnand %p7834_p2, %p7828_p13 }
  0x5d   :  { %7838 = shalt.err (!%p7835_p3)
}
  0x5e   :  { %147 = dma.hbm_to_vmem [thread:$0]  %s9038_s15, 1024, %s8173_s3, [#allocation15], %s9060_s5, %s9060_s5, %s9061_s0  }
  0x5f   :  { %s7989_s28 = smov [#allocation2]   ;;  %s7990_s30 = smov [#allocation7]  }
  0x60   :  { %s41_s9 = sshll.u32 %s7989_s28, 4  ;;  %s71_s1 = sshll.u32 %s7990_s30, 4  ;;  %s42_s9 = int_to_ptr.vmem [resolvable:$true] %s41_s9  ;;  %s8210_s1 = int_to_ptr.vmem [resolvable:$true] %s71_s1 }
  0x61   :  { %s9081_s29 = sld [smem:[#allocation24_spill]] }
  0x67   :  { %s7839_s24 = scalar_lea.hbm %s9081_s29, 256 }
  0x68   :  { %p7840_p4 = scmp.ne.s32.totalorder %s9081_s29, %s7839_s24  ;;  %p7843_p5 = scmp.lt.u32.totalorder %s7839_s24, %s9081_s29 }
  0x6a   :  { %p7845_p6 = pnand %p7843_p5, %p7840_p4 }
  0x6c   :  { %7848 = shalt.err (!%p7845_p6)
}
  0x6d   :  { %s7849_s15 = scalar_lea.vmem %s42_s9, 256  ;;  %p7854_p8 = scmp.lt.s32.totalorder %s42_s9, %s42_s9 }
  0x6e   :  { %p7850_p7 = scmp.ne.s32.totalorder %s42_s9, %s7849_s15  ;;  %p7855_p9 = scmp.lt.s32.totalorder %s7849_s15, %s7849_s15 }
  0x70   :  { %p7856_p10 = por %p7855_p9, %p7854_p8 }
  0x72   :  { %p7857_p11 = pnand %p7856_p10, %p7850_p7 }
  0x74   :  { %7860 = shalt.err (!%p7857_p11)
}
  0x75   :  { %47 = dma.hbm_to_vmem [thread:$0]  %s9081_s29, 256, %s42_s9, [#allocation3], %s9060_s5, %s9060_s5, %s9061_s0  }
  0x76   :  { %s9082_s28 = sld [smem:[#allocation29_spill]] }
  0x7c   :  { %s7861_s30 = scalar_lea.hbm %s9082_s28, 1024 }
  0x7d   :  { %p7862_p12 = scmp.ne.s32.totalorder %s9082_s28, %s7861_s30  ;;  %p7865_p13 = scmp.lt.u32.totalorder %s7861_s30, %s9082_s28 }
  0x7f   :  { %p7867_p0 = pnand %p7865_p13, %p7862_p12 }
  0x81   :  { %7870 = shalt.err (!%p7867_p0)
}
  0x82   :  { %s7871_s8 = scalar_lea.vmem %s8210_s1, 1024  ;;  %p7876_p2 = scmp.lt.s32.totalorder %s8210_s1, %s8210_s1 }
  0x83   :  { %p7872_p1 = scmp.ne.s32.totalorder %s8210_s1, %s7871_s8  ;;  %p7877_p3 = scmp.lt.s32.totalorder %s7871_s8, %s7871_s8 }
  0x85   :  { %p7878_p4 = por %p7877_p3, %p7876_p2 }
  0x87   :  { %p7879_p5 = pnand %p7878_p4, %p7872_p1 }
  0x89   :  { %7882 = shalt.err (!%p7879_p5)
}
  0x8a   :  { %77 = dma.hbm_to_vmem [thread:$0]  %s9082_s28, 1024, %s8210_s1, [#allocation6], %s9060_s5, %s9060_s5, %s9061_s0  }
  0x8b   :  { %s7991_s25 = smov [#allocation10]   ;;  %s7992_s15 = smov [#allocation13]  }
  0x8c   :  { %s99_s27 = sshll.u32 %s7991_s25, 4  ;;  %s127_s3 = sshll.u32 %s7992_s15, 4  ;;  %s100_s27 = int_to_ptr.vmem [resolvable:$true] %s99_s27  ;;  %s8247_s3 = int_to_ptr.vmem [resolvable:$true] %s127_s3 }
  0x8d   :  { %s9083_s6 = sld [smem:[#allocation33_spill]] }
  0x93   :  { %s7883_s30 = scalar_lea.hbm %s9083_s6, 1024 }
  0x94   :  { %p7884_p6 = scmp.ne.s32.totalorder %s9083_s6, %s7883_s30  ;;  %p7887_p7 = scmp.lt.u32.totalorder %s7883_s30, %s9083_s6 }
  0x96   :  { %p7889_p8 = pnand %p7887_p7, %p7884_p6 }
  0x98   :  { %7892 = shalt.err (!%p7889_p8)
}
  0x99   :  { %s7893_s1 = scalar_lea.vmem %s100_s27, 1024  ;;  %p7898_p10 = scmp.lt.s32.totalorder %s100_s27, %s100_s27 }
  0x9a   :  { %p7894_p9 = scmp.ne.s32.totalorder %s100_s27, %s7893_s1  ;;  %p7899_p11 = scmp.lt.s32.totalorder %s7893_s1, %s7893_s1 }
  0x9c   :  { %p7900_p12 = por %p7899_p11, %p7898_p10 }
  0x9e   :  { %p7901_p13 = pnand %p7900_p12, %p7894_p9 }
  0xa0   :  { %7904 = shalt.err (!%p7901_p13)
}
  0xa1   :  { %105 = dma.hbm_to_vmem [thread:$0]  %s9083_s6, 1024, %s100_s27, [#allocation9], %s9060_s5, %s9060_s5, %s9061_s0  }
  0xa2   :  { %s7905_s25 = scalar_lea.hbm %s9036_s13, 1024 }
  0xa3   :  { %p7906_p0 = scmp.ne.s32.totalorder %s9036_s13, %s7905_s25  ;;  %p7909_p1 = scmp.lt.u32.totalorder %s7905_s25, %s9036_s13 }
  0xa5   :  { %p7911_p2 = pnand %p7909_p1, %p7906_p0 }
  0xa7   :  { %7914 = shalt.err (!%p7911_p2)
}
  0xa8   :  { %s7915_s2 = scalar_lea.vmem %s8247_s3, 1024  ;;  %p7920_p4 = scmp.lt.s32.totalorder %s8247_s3, %s8247_s3 }
  0xa9   :  { %p7916_p3 = scmp.ne.s32.totalorder %s8247_s3, %s7915_s2  ;;  %p7921_p5 = scmp.lt.s32.totalorder %s7915_s2, %s7915_s2 }
  0xab   :  { %p7922_p6 = por %p7921_p5, %p7920_p4 }
  0xad   :  { %p7923_p7 = pnand %p7922_p6, %p7916_p3 }
  0xaf   :  { %7926 = shalt.err (!%p7923_p7)
}
  0xb0   :  { %133 = dma.hbm_to_vmem [thread:$0]  %s9036_s13, 1024, %s8247_s3, [#allocation12], %s9060_s5, %s9060_s5, %s9061_s0  }
  0xb1   :  { %s7993_s26 = smov [#allocation16]   ;;  %s7927_s28 = scalar_lea.hbm %s9044_s21, 512 }
  0xb2   :  { %s163_s24 = sshll.u32 %s7993_s26, 4  ;;  %p7928_p8 = scmp.ne.s32.totalorder %s9044_s21, %s7927_s28  ;;  %s164_s24 = int_to_ptr.vmem [resolvable:$true] %s163_s24 }
  0xb3   :  { %p7931_p9 = scmp.lt.u32.totalorder %s7927_s28, %s9044_s21 }
  0xb5   :  { %p7933_p10 = pnand %p7931_p9, %p7928_p8 }
  0xb7   :  { %7936 = shalt.err (!%p7933_p10)
}
  0xb8   :  { %s7937_s15 = scalar_lea.vmem %s164_s24, 512  ;;  %p7942_p12 = scmp.lt.s32.totalorder %s164_s24, %s164_s24 }
  0xb9   :  { %p7938_p11 = scmp.ne.s32.totalorder %s164_s24, %s7937_s15  ;;  %p7943_p13 = scmp.lt.s32.totalorder %s7937_s15, %s7937_s15 }
  0xbb   :  { %p7944_p0 = por %p7943_p13, %p7942_p12 }
  0xbd   :  { %p7945_p1 = pnand %p7944_p0, %p7938_p11 }
  0xbf   :  { %7948 = shalt.err (!%p7945_p1)
}
  0xc0   :  { %169 = dma.hbm_to_vmem [thread:$0]  %s9044_s21, 512, %s164_s24, [#allocation15], %s9060_s5, %s9060_s5, %s9061_s0  }
  0xc1   :  { %7971 = dma.done.wait [#allocation3], 256  }
  0xc2   :  { %7972 = vsyncadd [#allocation3], 4294967040 }
  0xc3   :  { %7973 = dma.done.wait [#allocation6], 1280  }
  0xc4   :  { %7974 = vsyncadd [#allocation6], 4294966016 }
  0xc5   :  { %7975 = dma.done.wait [#allocation9], 2048  }
  0xc6   :  { %7976 = vsyncadd [#allocation9], 4294965248 }
  0xc7   :  { %7977 = dma.done.wait [#allocation12], 2048  }
  0xc8   :  { %7978 = vsyncadd [#allocation12], 4294965248 }
  0xc9   :  { %7979 = dma.done.wait [#allocation15], 1536  }
  0xca   :  { %7980 = vsyncadd [#allocation15], 4294965760  ;;  %v217_v0 = vld [vmem:[#allocation7] sm:$0xff]  ;;  %v218_v1 = vld [vmem:[#allocation7 + $0x8] sm:$0xff]  ;;  %s9084_s30 = sld [smem:[#allocation26_spill]]  ;;  %vm228_vm0 = vcmask 261120  }
  0xcb   :  { %v219_v2 = vld [vmem:[#allocation7 + $0x10] sm:$0xff]  ;;  %v7124_v3 = vpack.c.bf16 %v218_v1, %v217_v0  ;;  %v220_v4 = vld [vmem:[#allocation7 + $0x18] sm:$0xff]  ;;  %v203_v5 = vld [vmem:[#allocation2] sm:$0xff]  ;;  %s9085_s26 = sld [smem:[#allocation30_spill]]  ;;  %vm321_vm1 = vcmask 64512   ;;  %s7994_s24 = smov 120  }
  0xcc   :  { %v7128_v7 = vpack.c.bf16 %v220_v4, %v219_v2  ;;  %v204_v9 = vld [vmem:[#allocation2 + $0x8] sm:$0xff]  ;;  %s7995_s7 = smov 96   ;;  %s7996_s1 = smov 88   ;;  %vm8342_vm2 = vmpackc.low %vm321_vm1, %vm321_vm1  ;;  %vm409_vm3 = vcmask 130048   ;;  %vm2994_vm4 = vcmask 523264  }
  0xcd   :  { %7125 = vmatprep.subr.bf16.mxu0 %v7124_v3  ;;  %s7997_s28 = smov 112   ;;  %s7998_s8 = smov 80  }
  0xce   :  { %7127 = vmatpush3.bf16.msra.mxu0 %v7124_v3  ;;  %s9088_s25 = sld [smem:[#allocation27_spill]]  ;;  %s9064_s3 = smov 56  }
  0xcf   :  { %7129 = vmatprep.subr.bf16.mxu0 %v7128_v7  ;;  %s8000_s4 = smov 72   ;;  %s8001_s11 = smov 64  }
  0xd0   :  { %v205_v6 = vld [vmem:[%s9084_s30] sm:$0xff]  ;;  %v206_v10 = vld [vmem:[%s9084_s30 + $0x8] sm:$0xff]  ;;  %s9065_s30 = smov 104   ;;  %s9063_s21 = smov 48  }
  0xd1   :  { %v8302_v8 = vadd.f32 %v205_v6, %v203_v5  ;;  %v8309_v11 = vadd.f32 %v206_v10, %v204_v9  ;;  %v6231_v12 = vld [vmem:[%s9085_s26] ss:$0 sm:$0xff]  ;;  %s9062_s2 = smov 40   ;;  %s9089_s9 = sld [smem:[#allocation32_spill]] }
  0xd2   :  { %7131 = vmatpush3.bf16.msra.mxu0 %v7128_v7  ;;  %s9090_s29 = sld [smem:[#allocation28_spill]] }
  0xd3   :  { %6680 = vmatprep.mubr.msk.f32.mxu0 %vm228_vm0, %v8302_v8 }
  0xd4   :  { %v8367_v36 = vld [vmem:[%s9088_s25 + $0x8] sm:$0xff]  ;;  %v8372_v39 = vld [vmem:[%s9088_s25] sm:$0xff] }
  0xd5   :  { %6681 = vmatmul.mubr.msk.f32.vlgmr.msra.gmra.mrb[0].mxu0 %vm228_vm0, %v8309_v11 }
 0x1a8   :  { %v6682_v13 = vpop.f32.mrb[0].mxu0 }
 0x1a9   :  { %v8316_v14 = vadd.f32 %v6682_v13, %v6231_v12  ;;  %v301_v15 = vpop.f32.mrb[1].mxu0 }
 0x1aa   :  { %v8318_v16 = vadd.f32 %v6231_v12, %v301_v15 }
 0x1ac   :  { %519 = vrot.lane.b32.xlu1 %v8318_v16, %s7994_s24  ;;  %6687 = vmatprep.mubr.msk.f32.mxu1 %vm321_vm1, %v8318_v16  ;;  %v8326_v17 = vpack.i.bf16 %v8316_v14, %v8318_v16 }
 0x1ae   :  { %7444 = vrot.lane.b32.xlu0 %v8326_v17, %s7995_s7 }
 0x1b0   :  { %521 = vrot.lane.b32.xlu1 %v8316_v14, %s7994_s24 }
 0x1b2   :  { %7449 = vrot.lane.b32.xlu0 %v8326_v17, %s7996_s1 }
 0x1b4   :  { %885 = vrot.lane.b32.xlu1 %v8318_v16, %s7997_s28 }
 0x1b6   :  { %7454 = vrot.lane.b32.xlu0 %v8326_v17, %s7998_s8 }
 0x1ba   :  { %887 = vrot.lane.b32.xlu0 %v8316_v14, %s7997_s28 }
 0x21e   :  { %v520_v28 = vpop.permute.xlu1 %519 }
 0x220   :  { %v7445_v18 = vpop.permute.xlu0 %7444 }
 0x221   :  { %v7447_v19 = vunpack.i.h.bf16 %v7445_v18  ;;  %v7446_v20 = vunpack.i.l.bf16 %v7445_v18 }
 0x222   :  { %v522_v32 = vpop.permute.xlu1 %521 }
 0x223   :  { %v7132_v22 = vpack.c.bf16 %v7447_v19, %v7446_v20 }
 0x224   :  { %v7450_v23 = vpop.permute.xlu0 %7449 }
 0x225   :  { %v7452_v24 = vunpack.i.h.bf16 %v7450_v23  ;;  %v7451_v25 = vunpack.i.l.bf16 %v7450_v23  ;;  %7134 = vmatprep.subr.msk.bf16.mxu1 %vm8342_vm2, %v7132_v22 }
 0x226   :  { %7137 = vmatpush3.bf16.xpose.msk.msra.mxu1 %vm8342_vm2, %v7132_v22  ;;  %v886_v33 = vpop.permute.xlu1 %885 }
 0x227   :  { %v7142_v26 = vpack.c.bf16 %v7452_v24, %v7451_v25 }
 0x228   :  { %v7455_v27 = vpop.permute.xlu0 %7454 }
 0x229   :  { %v7457_v29 = vunpack.i.h.bf16 %v7455_v27  ;;  %v7456_v30 = vunpack.i.l.bf16 %v7455_v27  ;;  %7144 = vmatprep.subr.msk.bf16.mxu1 %vm8342_vm2, %v7142_v26 }
 0x22b   :  { %v7152_v31 = vpack.c.bf16 %v7457_v29, %v7456_v30 }
 0x22c   :  { %v888_v34 = vpop.permute.xlu0 %887 }
 0x22d   :  { %6688 = vmatmul.mubr.msk.f32.vlgmr.msra.gmra.mrb[0].mxu1 %vm321_vm1, %v8316_v14 }
 0x22e   :  { %7147 = vmatpush3.bf16.xpose.msk.msra.mxu1 %vm8342_vm2, %v7142_v26  ;;  %6701 = vmatprep.mubr.msk.f32.mxu1 %vm321_vm1, %v520_v28 }
 0x22f   :  { %7154 = vmatprep.subr.msk.bf16.mxu1 %vm8342_vm2, %v7152_v31 }
 0x235   :  { %6702 = vmatmul.mubr.msk.f32.vlgmr.msra.gmra.mrb[2].mxu1 %vm321_vm1, %v522_v32 }
 0x236   :  { %7157 = vmatpush3.bf16.xpose.msk.msra.mxu1 %vm8342_vm2, %v7152_v31  ;;  %6725 = vmatprep.mubr.msk.f32.mxu1 %vm321_vm1, %v886_v33 }
 0x23d   :  { %6726 = vmatmul.mubr.msk.f32.vlgmr.msra.gmra.mrb[4].mxu1 %vm321_vm1, %v888_v34 }
 0x300   :  { %v6689_v35 = vpop.f32.mrb[0].mxu1 }
 0x301   :  { %v406_v37 = vmul.f32 0.35355338, %v6689_v35  ;;  %v396_v38 = vpop.f32.mrb[1].mxu1 }
 0x302   :  { %v405_v40 = vmul.f32 0.35355338, %v396_v38 }
 0x303   :  { %v408_v41 = vadd.f32 %v406_v37, %v8367_v36 }
 0x304   :  { %v407_v42 = vadd.f32 %v405_v40, %v8372_v39 }
 0x305   :  { %v413_v43 = vsel %vm409_vm3, %v408_v41, -inf }
 0x306   :  { %414 = vmax.xlane.f32.xlu0 %v413_v43  ;;  %v410_v44 = vsel %vm409_vm3, %v407_v42, -inf }
 0x307   :  { %411 = vmax.xlane.f32.xlu1 %v410_v44 }
 0x308   :  { %v6703_v45 = vpop.f32.mrb[2].mxu1 }
 0x309   :  { %v611_v46 = vmul.f32 0.35355338, %v6703_v45  ;;  %v601_v47 = vpop.f32.mrb[3].mxu1 }
 0x30a   :  { %v610_v48 = vmul.f32 0.35355338, %v601_v47 }
 0x30b   :  { %v613_v49 = vadd.f32 %v611_v46, %v8367_v36 }
 0x30c   :  { %v612_v50 = vadd.f32 %v610_v48, %v8372_v39 }
 0x30d   :  { %v617_v51 = vsel %vm409_vm3, %v613_v49, -inf }
 0x30e   :  { %618 = vmax.xlane.f32.xlu1 %v617_v51  ;;  %v614_v52 = vsel %vm409_vm3, %v612_v50, -inf }
 0x30f   :  { %615 = vmax.xlane.f32.xlu0 %v614_v52 }
 0x310   :  { %v6727_v53 = vpop.f32.mrb[4].mxu1 }
 0x311   :  { %v967_v54 = vpop.f32.mrb[5].mxu1  ;;  %v977_v15 = vmul.f32 0.35355338, %v6727_v53 }
 0x312   :  { %v976_v13 = vmul.f32 0.35355338, %v967_v54 }
 0x313   :  { %v979_v19 = vadd.f32 %v977_v15, %v8367_v36 }
 0x314   :  { %v978_v18 = vadd.f32 %v976_v13, %v8372_v39 }
 0x315   :  { %v983_v22 = vsel %vm409_vm3, %v979_v19, -inf }
 0x316   :  { %v980_v20 = vsel %vm409_vm3, %v978_v18, -inf }
 0x393   :  { %v415_v55 = vpop.xlane.xlu0 %414 }
 0x394   :  { %v417_v56 = vsub.f32 %v408_v41, %v415_v55  ;;  %v412_v57 = vpop.xlane.xlu1 %411 }
 0x395   :  { %v416_v58 = vsub.f32 %v407_v42, %v412_v57 }
 0x396   :  { %v420_v59 = vmul.f32 1.442695, %v417_v56 }
 0x397   :  { %v418_v60 = vmul.f32 1.442695, %v416_v58  ;;  %v311_v58 = vld [vmem:[#allocation8 + $0x8] sm:$0xff] }
 0x398   :  { %7593 = vpow2.f32 %v420_v59  ;;  %v310_v59 = vld [vmem:[#allocation8] sm:$0xff] }
 0x399   :  { %7595 = vpow2.f32 %v418_v60 }
 0x39b   :  { %v619_v61 = vpop.xlane.xlu1 %618 }
 0x39c   :  { %v621_v62 = vsub.f32 %v613_v49, %v619_v61  ;;  %v616_v63 = vpop.xlane.xlu0 %615 }
 0x39d   :  { %v620_v0 = vsub.f32 %v612_v50, %v616_v63 }
 0x39e   :  { %v624_v1 = vmul.f32 1.442695, %v621_v62 }
 0x39f   :  { %v622_v2 = vmul.f32 1.442695, %v620_v0 }
 0x3a0   :  { %7597 = vpow2.f32 %v624_v1 }
 0x3a1   :  { %7599 = vpow2.f32 %v622_v2 }
 0x3a2   :  { %v8382_v3 = vpop.eup %7593 }
 0x3a3   :  { %v7596_v4 = vpop.eup %7595  ;;  %v425_v5 = vsel %vm409_vm3, %v8382_v3, 0.0 }
 0x3a4   :  { %426 = vadd.xlane.f32.xlu1 %v425_v5  ;;  %v422_v6 = vsel %vm409_vm3, %v7596_v4, 0.0 }
 0x3a5   :  { %423 = vadd.xlane.f32.xlu0 %v422_v6 }
 0x3aa   :  { %v8387_v7 = vpop.eup %7597 }
 0x3ab   :  { %v7600_v9 = vpop.eup %7599  ;;  %v629_v10 = vsel %vm409_vm3, %v8387_v7, 0.0 }
 0x3ac   :  { %630 = vadd.xlane.f32.xlu1 %v629_v10  ;;  %v626_v12 = vsel %vm409_vm3, %v7600_v9, 0.0 }
 0x3ad   :  { %627 = vadd.xlane.f32.xlu0 %v626_v12 }
 0x3bd   :  { %7464 = vrot.lane.b32.xlu1 %v8326_v17, %s9064_s3 }
 0x3c1   :  { %7469 = vrot.lane.b32.xlu1 %v8326_v17, %s8000_s4 }
 0x3c3   :  { %7459 = vrot.lane.b32.xlu0 %v8326_v17, %s8001_s11 }
 0x3c5   :  { %1174 = vrot.lane.b32.xlu1 %v8316_v14, %s9065_s30 }
 0x3c7   :  { %1172 = vrot.lane.b32.xlu0 %v8318_v16, %s9065_s30 }
 0x3e6   :  { %981 = vmax.xlane.f32.xlu0 %v980_v20 }
 0x3e9   :  { %984 = vmax.xlane.f32.xlu1 %v983_v22 }
 0x3fa   :  { %7474 = vrot.lane.b32.xlu1 %v8326_v17, %s9063_s21  ;;  %s9094_s21 = smov 40  }
 0x3fe   :  { %7479 = vrot.lane.b32.xlu1 %v8326_v17, %s9062_s2 }
 0x431   :  { %v427_v16 = vpop.xlane.xlu1 %426 }
 0x432   :  { %v424_v14 = vpop.xlane.xlu0 %423 }
 0x433   :  { %7601 = vrcp.f32 %v424_v14  ;;  %v312_v14 = vld [vmem:[#allocation8 + $0x10] sm:$0xff] }
 0x434   :  { %7603 = vrcp.f32 %v427_v16 }
 0x439   :  { %v631_v23 = vpop.xlane.xlu1 %630 }
 0x43a   :  { %v628_v24 = vpop.xlane.xlu0 %627 }
 0x43b   :  { %7605 = vrcp.f32 %v628_v24 }
 0x43c   :  { %7607 = vrcp.f32 %v631_v23 }
 0x43d   :  { %v7602_v25 = vpop.eup %7601  ;;  %v7465_v26 = vpop.permute.xlu1 %7464 }
 0x43e   :  { %v7460_v27 = vpop.permute.xlu0 %7459  ;;  %v430_v28 = vmul.f32 %v7602_v25, %v7596_v4  ;;  %v7467_v29 = vunpack.i.h.bf16 %v7465_v26  ;;  %v7466_v30 = vunpack.i.l.bf16 %v7465_v26  ;;  %v7604_v34 = vpop.eup %7603 }
 0x43f   :  { %v7462_v31 = vunpack.i.h.bf16 %v7460_v27  ;;  %v7461_v32 = vunpack.i.l.bf16 %v7460_v27  ;;  %v431_v43 = vmul.f32 %v7604_v34, %v8382_v3 }
 0x440   :  { %6694 = vmatprep.mubr.msk.f32.mxu0 %vm409_vm3, %v430_v28  ;;  %v7148_v40 = vpack.c.bf16 %v7467_v29, %v7466_v30 }
 0x441   :  { %v7470_v33 = vpop.permute.xlu1 %7469  ;;  %v7138_v17 = vpack.c.bf16 %v7462_v31, %v7461_v32 }
 0x442   :  { %v7472_v35 = vunpack.i.h.bf16 %v7470_v33  ;;  %v7471_v37 = vunpack.i.l.bf16 %v7470_v33  ;;  %v1173_v38 = vpop.permute.xlu0 %1172 }
 0x443   :  { %7139 = vmatprep.subr.bf16.mxu0 %v7138_v17  ;;  %6744 = vmatprep.mubr.msk.f32.mxu1 %vm321_vm1, %v1173_v38 }
 0x444   :  { %v7162_v41 = vpack.c.bf16 %v7472_v35, %v7471_v37  ;;  %7141 = vmatpush3.bf16.msra.mxu0 %v7138_v17  ;;  %v313_v37 = vld [vmem:[#allocation8 + $0x18] sm:$0xff] }
 0x445   :  { %v7606_v42 = vpop.eup %7605  ;;  %7149 = vmatprep.subr.bf16.mxu0 %v7148_v40  ;;  %v1175_v47 = vpop.permute.xlu1 %1174 }
 0x446   :  { %v7608_v44 = vpop.eup %7607  ;;  %7164 = vmatprep.subr.msk.bf16.mxu1 %vm8342_vm2, %v7162_v41  ;;  %v634_v45 = vmul.f32 %v7606_v42, %v7600_v9 }
 0x447   :  { %6695 = vmatmul.mubr.msk.f32.vlgmr.msra.gmra.mrb[2].mxu0 %vm409_vm3, %v431_v43  ;;  %7167 = vmatpush3.bf16.xpose.msk.msra.mxu1 %vm8342_vm2, %v7162_v41  ;;  %v635_v46 = vmul.f32 %v7608_v44, %v8387_v7 }
 0x448   :  { %7151 = vmatpush3.bf16.msra.mxu0 %v7148_v40  ;;  %6708 = vmatprep.mubr.msk.f32.mxu0 %vm409_vm3, %v634_v45 }
 0x449   :  { %6711 = vmatprep.subr.mxu0 %v311_v58 }
 0x44b   :  { %6709 = vmatmul.mubr.msk.f32.vlgmr.msra.gmra.mrb[4].mxu0 %vm409_vm3, %v635_v46 }
 0x44c   :  { %6712 = vmatpush3.msra.mxu0 %v311_v58 }
 0x44d   :  { %6716 = vmatprep.subr.mxu0 %v310_v59 }
 0x44e   :  { %6745 = vmatmul.mubr.msk.f32.vlgmr.msra.gmra.mrb[6].mxu1 %vm321_vm1, %v1175_v47  ;;  %v6266_v47 = vld [vmem:[%s9089_s9] ss:$0 sm:$0xff] }
 0x473   :  { %v982_v48 = vpop.xlane.xlu0 %981 }
 0x474   :  { %v986_v49 = vsub.f32 %v978_v18, %v982_v48 }
 0x476   :  { %v988_v50 = vmul.f32 1.442695, %v986_v49  ;;  %v985_v51 = vpop.xlane.xlu1 %984 }
 0x477   :  { %v987_v52 = vsub.f32 %v979_v19, %v985_v51 }
 0x478   :  { %7609 = vpow2.f32 %v988_v50 }
 0x479   :  { %v990_v53 = vmul.f32 1.442695, %v987_v52 }
 0x47a   :  { %v7475_v61 = vpop.permute.xlu1 %7474 }
 0x47b   :  { %7611 = vpow2.f32 %v990_v53  ;;  %v7477_v1 = vunpack.i.h.bf16 %v7475_v61  ;;  %v7476_v2 = vunpack.i.l.bf16 %v7475_v61 }
 0x47d   :  { %v7158_v5 = vpack.c.bf16 %v7477_v1, %v7476_v2  ;;  %v1601_v1 = vld [vmem:[#allocation11 + $0x8] sm:$0xff] }
 0x47e   :  { %v7480_v15 = vpop.permute.xlu1 %7479 }
 0x47f   :  { %v7482_v16 = vunpack.i.h.bf16 %v7480_v15  ;;  %v7481_v23 = vunpack.i.l.bf16 %v7480_v15  ;;  %v1511_v15 = vld [vmem:[#allocation10 + $0x18] sm:$0xff] }
 0x481   :  { %v7168_v25 = vpack.c.bf16 %v7482_v16, %v7481_v23 }
 0x482   :  { %v7610_v54 = vpop.eup %7609 }
 0x483   :  { %v992_v55 = vsel %vm409_vm3, %v7610_v54, 0.0 }
 0x484   :  { %993 = vadd.xlane.f32.xlu0 %v992_v55 }
 0x485   :  { %v7612_v56 = vpop.eup %7611 }
 0x486   :  { %v995_v57 = vsel %vm409_vm3, %v7612_v56, 0.0 }
 0x488   :  { %996 = vadd.xlane.f32.xlu0 %v995_v57 }
 0x511   :  { %v994_v60 = vpop.xlane.xlu0 %993 }
 0x512   :  { %7613 = vrcp.f32 %v994_v60 }
 0x515   :  { %v997_v63 = vpop.xlane.xlu0 %996 }
 0x516   :  { %7615 = vrcp.f32 %v997_v63 }
 0x51a   :  { %v6696_v62 = vpop.f32.mrb[2].mxu0 }
 0x51b   :  { %v510_v0 = vpop.f32.mrb[3].mxu0 }
 0x51c   :  { %v7614_v12 = vpop.eup %7613 }
 0x51d   :  { %v1000_v22 = vmul.f32 %v7614_v12, %v7610_v54 }
 0x51e   :  { %v6710_v3 = vpop.f32.mrb[4].mxu0 }
 0x51f   :  { %v714_v4 = vpop.f32.mrb[5].mxu0 }
 0x520   :  { %6713 = vmatprep.mubr.msk.f32.mxu0 %vm321_vm1, %v714_v4  ;;  %v7616_v20 = vpop.eup %7615  ;;  %v1603_v4 = vld [vmem:[#allocation11 + $0x18] sm:$0xff] }
 0x521   :  { %6714 = vmatmul.mubr.msk.f32.vlgmr.msra.gmra.mrb[6].mxu0 %vm321_vm1, %v6710_v3  ;;  %v6746_v6 = vpop.f32.mrb[6].mxu1  ;;  %v1602_v3 = vld [vmem:[#allocation11 + $0x10] sm:$0xff] }
 0x522   :  { %6717 = vmatpush3.msra.mxu0 %v310_v59  ;;  %6718 = vmatprep.mubr.msk.f32.mxu0 %vm321_vm1, %v510_v0  ;;  %v1254_v7 = vpop.f32.mrb[7].mxu1  ;;  %v1264_v9 = vmul.f32 0.35355338, %v6746_v6  ;;  %v209_v6 = vld [vmem:[#allocation5] sm:$0xff] }
 0x523   :  { %7159 = vmatprep.subr.bf16.mxu0 %v7158_v5  ;;  %v1263_v10 = vmul.f32 0.35355338, %v1254_v7  ;;  %v210_v7 = vld [vmem:[#allocation5 + $0x8] sm:$0xff] }
 0x524   :  { %v1266_v19 = vadd.f32 %v1264_v9, %v8367_v36  ;;  %v1508_v9 = vld [vmem:[#allocation10] sm:$0xff] }
 0x525   :  { %v1265_v13 = vadd.f32 %v1263_v10, %v8372_v39  ;;  %v1001_v39 = vmul.f32 %v7616_v20, %v7612_v56  ;;  %v1509_v10 = vld [vmem:[#allocation10 + $0x8] sm:$0xff] }
 0x526   :  { %v1270_v24 = vsel %vm409_vm3, %v1266_v19, -inf  ;;  %v7172_v12 = vpack.c.bf16 %v1509_v10, %v1508_v9 }
 0x527   :  { %v1267_v18 = vsel %vm409_vm3, %v1265_v13, -inf }
 0x528   :  { %1268 = vmax.xlane.f32.xlu0 %v1267_v18  ;;  %7173 = vmatprep.subr.bf16.mxu1 %v7172_v12 }
 0x529   :  { %6719 = vmatmul.mubr.msk.f32.vlgmr.msra.gmra.mrb[6].mxu0 %vm321_vm1, %v6696_v62  ;;  %7175 = vmatpush3.bf16.msra.mxu1 %v7172_v12 }
 0x52a   :  { %7161 = vmatpush3.bf16.msra.mxu0 %v7158_v5  ;;  %6732 = vmatprep.mubr.msk.f32.mxu0 %vm409_vm3, %v1000_v22  ;;  %v7184_v5 = vpack.c.bf16 %v1603_v4, %v1602_v3  ;;  %v1496_v22 = vlaneseq }
 0x52b   :  { %6735 = vmatprep.subr.mxu0 %v312_v14 }
 0x52c   :  { %1271 = vmax.xlane.f32.xlu0 %v1270_v24  ;;  %v8453_v24 = vshrl.u32 %v1496_v22, 7 }
 0x52d   :  { %6733 = vmatmul.mubr.msk.f32.vlgmr.msra.gmra.mrb[8].mxu0 %vm409_vm3, %v1001_v39 }
 0x52e   :  { %6736 = vmatpush3.msra.mxu0 %v312_v14 }
 0x52f   :  { %7169 = vmatprep.subr.bf16.mxu0 %v7168_v25 }
 0x5b5   :  { %v1269_v36 = vpop.xlane.xlu0 %1268 }
 0x5b6   :  { %v1273_v26 = vsub.f32 %v1265_v13, %v1269_v36  ;;  %v1510_v13 = vld [vmem:[#allocation10 + $0x10] sm:$0xff]  ;;  %v8461_v36 = vld [vmem:[%s9042_s19] sm:$0x7] }
 0x5b7   :  { %v7176_v18 = vpack.c.bf16 %v1511_v15, %v1510_v13 }
 0x5b8   :  { %v1275_v27 = vmul.f32 1.442695, %v1273_v26  ;;  %v8466_v26 = vld [vmem:[%s9043_s20] sm:$0x7] }
 0x5b9   :  { %v1272_v28 = vpop.xlane.xlu0 %1271  ;;  %7177 = vmatprep.subr.bf16.mxu1 %v7176_v18 }
 0x5ba   :  { %7617 = vpow2.f32 %v1275_v27  ;;  %v1274_v29 = vsub.f32 %v1266_v19, %v1272_v28  ;;  %7179 = vmatpush3.bf16.msra.mxu1 %v7176_v18 }
 0x5bc   :  { %v1277_v30 = vmul.f32 1.442695, %v1274_v29 }
 0x5be   :  { %7619 = vpow2.f32 %v1277_v30 }
 0x5c4   :  { %v7618_v31 = vpop.eup %7617 }
 0x5c5   :  { %v1279_v32 = vsel %vm409_vm3, %v7618_v31, 0.0 }
 0x5c6   :  { %1280 = vadd.xlane.f32.xlu0 %v1279_v32 }
 0x5c8   :  { %v7620_v33 = vpop.eup %7619 }
 0x5c9   :  { %v1282_v17 = vsel %vm409_vm3, %v7620_v33, 0.0 }
 0x5ca   :  { %1283 = vadd.xlane.f32.xlu0 %v1282_v17 }
 0x600   :  { %v6734_v34 = vpop.f32.mrb[8].mxu0 }
 0x601   :  { %v1080_v35 = vpop.f32.mrb[9].mxu0 }
 0x602   :  { %6737 = vmatprep.mubr.msk.f32.mxu0 %vm321_vm1, %v1080_v35 }
 0x603   :  { %6738 = vmatmul.mubr.msk.f32.vlgmr.msra.gmra.mrb[6].mxu0 %vm321_vm1, %v6734_v34 }
 0x604   :  { %7171 = vmatpush3.bf16.msra.mxu0 %v7168_v25  ;;  %v8456_v25 = vsub.s32 0, %v8453_v24 }
 0x605   :  { %6754 = vmatprep.subr.mxu0 %v313_v37 }
 0x606   :  { %v1499_v27 = vrot.slane %v8461_v36, %v8456_v25  ;;  %v1505_v30 = vrot.slane %v8466_v26, %v8456_v25 }
 0x653   :  { %v1281_v38 = vpop.xlane.xlu0 %1280 }
 0x654   :  { %7621 = vrcp.f32 %v1281_v38 }
 0x657   :  { %v1284_v40 = vpop.xlane.xlu0 %1283 }
 0x658   :  { %7623 = vrcp.f32 %v1284_v40 }
 0x65e   :  { %v7622_v41 = vpop.eup %7621 }
 0x65f   :  { %v1287_v42 = vmul.f32 %v7622_v41, %v7618_v31 }
 0x661   :  { %6751 = vmatprep.mubr.msk.f32.mxu0 %vm409_vm3, %v1287_v42 }
 0x662   :  { %v7624_v43 = vpop.eup %7623 }
 0x663   :  { %v1288_v44 = vmul.f32 %v7624_v43, %v7620_v33 }
 0x665   :  { %6752 = vmatmul.mubr.msk.f32.vlgmr.msra.gmra.mrb[10].mxu0 %vm409_vm3, %v1288_v44 }
 0x666   :  { %6755 = vmatpush3.msra.mxu0 %v313_v37  ;;  %v6270_v37 = vld [vmem:[%s9035_s12] ss:$0 sm:$0xff] }
 0x738   :  { %v6753_v45 = vpop.f32.mrb[10].mxu0 }
 0x739   :  { %v1367_v46 = vpop.f32.mrb[11].mxu0 }
 0x73a   :  { %6756 = vmatprep.mubr.msk.f32.mxu0 %vm321_vm1, %v1367_v46 }
 0x73b   :  { %6757 = vmatmul.mubr.msk.f32.vlgmr.msra.gmra.mrb[6].mxu0 %vm321_vm1, %v6753_v45 }
 0x73c   :  { %6778 = vmatprep.mubr.msk.f32.mxu0 %vm228_vm0, %v209_v6 }
 0x80e   :  { %v6758_v48 = vpop.f32.mrb[6].mxu0 }
 0x80f   :  { %v1466_v49 = vadd.f32 %v6758_v48, %v6266_v47  ;;  %v1448_v50 = vpop.f32.mrb[7].mxu0 }
 0x810   :  { %v1465_v51 = vadd.f32 %v6266_v47, %v1448_v50  ;;  %v6267_v50 = vld [vmem:[%s9033_s10] ss:$0 sm:$0xff] }
 0x811   :  { %v1468_v52 = vadd.f32 %v1466_v49, %v8309_v11 }
 0x812   :  { %v1467_v53 = vadd.f32 %v1465_v51, %v8302_v8  ;;  %v1600_v8 = vld [vmem:[#allocation11] sm:$0xff] }
 0x813   :  { %v1472_v54 = vsel %vm228_vm0, %v1468_v52, 0.0  ;;  %v7180_v2 = vpack.c.bf16 %v1601_v1, %v1600_v8  ;;  %v8532_v8 = vld [vmem:[%s9090_s29] sm:$0xff] }
 0x814   :  { %1473 = vadd.xlane.f32.xlu1 %v1472_v54  ;;  %v1469_v55 = vsel %vm228_vm0, %v1467_v53, 0.0 }
 0x815   :  { %1470 = vadd.xlane.f32.xlu0 %v1469_v55  ;;  %7181 = vmatprep.subr.bf16.mxu0 %v7180_v2 }
 0x816   :  { %7183 = vmatpush3.bf16.msra.mxu0 %v7180_v2 }
 0x817   :  { %7185 = vmatprep.subr.bf16.mxu0 %v7184_v5 }
 0x81a   :  { %7187 = vmatpush3.bf16.msra.mxu0 %v7184_v5 }
 0x81d   :  { %6779 = vmatmul.mubr.msk.f32.vlgmr.msra.gmra.mrb[12].mxu0 %vm228_vm0, %v210_v7 }
 0x8a1   :  { %v1474_v56 = vpop.xlane.xlu1 %1473 }
 0x8a2   :  { %v1477_v57 = vmul.f32 0.03125, %v1474_v56  ;;  %v1471_v58 = vpop.xlane.xlu0 %1470 }
 0x8a3   :  { %v1476_v59 = vmul.f32 0.03125, %v1471_v58 }
 0x8a4   :  { %v1479_v60 = vsub.f32 %v1468_v52, %v1477_v57 }
 0x8a5   :  { %v1478_v61 = vsub.f32 %v1467_v53, %v1476_v59 }
 0x8a6   :  { %v1481_v0 = vmul.f32 %v1479_v60, %v1479_v60 }
 0x8a7   :  { %v1480_v62 = vmul.f32 %v1478_v61, %v1478_v61 }
 0x8a8   :  { %v1485_v11 = vsel %vm228_vm0, %v1481_v0, 0.0 }
 0x8a9   :  { %v1482_v63 = vsel %vm228_vm0, %v1480_v62, 0.0 }
 0x8aa   :  { %1483 = vadd.xlane.f32.xlu0 %v1482_v63  ;;  %v8527_v63 = vld [vmem:[%s9090_s29 + $0x8] sm:$0xff] }
 0x8ae   :  { %1486 = vadd.xlane.f32.xlu0 %v1485_v11 }
 0x8f0   :  { %v6780_v38 = vpop.f32.mrb[12].mxu0 }
 0x8f1   :  { %v1689_v40 = vadd.f32 %v6780_v38, %v6270_v37  ;;  %v1683_v41 = vpop.f32.mrb[13].mxu0 }
 0x8f2   :  { %v1684_v42 = vadd.f32 %v6270_v37, %v1683_v41 }
 0x8f4   :  { %v8483_v43 = vpack.i.bf16 %v1689_v40, %v1684_v42  ;;  %v7188_v44 = vpack.c.bf16 %v1689_v40, %v1684_v42 }
 0x8f6   :  { %7484 = vrot.lane.b32.xlu0 %v8483_v43, %s7994_s24  ;;  %7190 = vmatprep.subr.msk.bf16.mxu1 %vm8342_vm2, %v7188_v44 }
 0x8f7   :  { %7489 = vrot.lane.b32.xlu1 %v8483_v43, %s7997_s28 }
 0x937   :  { %v1484_v19 = vpop.xlane.xlu0 %1483 }
 0x938   :  { %v1488_v20 = vmul.f32 0.03125, %v1484_v19 }
 0x93a   :  { %v1490_v14 = vadd.f32 1e-05, %v1488_v20 }
 0x93b   :  { %v1487_v16 = vpop.xlane.xlu0 %1486 }
 0x93c   :  { %7625 = vrsqrt.f32 %v1490_v14  ;;  %v1489_v23 = vmul.f32 0.03125, %v1487_v16 }
 0x93e   :  { %v1491_v39 = vadd.f32 1e-05, %v1489_v23 }
 0x940   :  { %7627 = vrsqrt.f32 %v1491_v39 }
 0x946   :  { %v7626_v28 = vpop.eup %7625 }
 0x947   :  { %v1494_v29 = vmul.f32 %v7626_v28, %v1478_v61 }
 0x949   :  { %v1500_v31 = vmul.f32 %v1499_v27, %v1494_v29 }
 0x94a   :  { %v7628_v32 = vpop.eup %7627 }
 0x94b   :  { %v1495_v33 = vmul.f32 %v7628_v32, %v1479_v60  ;;  %v8472_v17 = vadd.f32 %v1505_v30, %v1500_v31 }
 0x94d   :  { %v1501_v34 = vmul.f32 %v1499_v27, %v1495_v33  ;;  %6767 = vmatprep.mubr.msk.f32.mxu1 %vm228_vm0, %v8472_v17 }
 0x94f   :  { %v8476_v35 = vadd.f32 %v1505_v30, %v1501_v34 }
 0x951   :  { %6768 = vmatmul.mubr.msk.f32.vlgmr.msra.gmra.mrb[8].mxu1 %vm228_vm0, %v8476_v35 }
 0x952   :  { %7193 = vmatpush3.bf16.xpose.msk.msra.mxu1 %vm8342_vm2, %v7188_v44 }
 0x968   :  { %v7485_v45 = vpop.permute.xlu0 %7484 }
 0x969   :  { %v7487_v46 = vunpack.i.h.bf16 %v7485_v45  ;;  %v7486_v47 = vunpack.i.l.bf16 %v7485_v45  ;;  %v7490_v49 = vpop.permute.xlu1 %7489 }
 0x96a   :  { %v7492_v51 = vunpack.i.h.bf16 %v7490_v49  ;;  %v7491_v52 = vunpack.i.l.bf16 %v7490_v49 }
 0x96b   :  { %v7198_v48 = vpack.c.bf16 %v7487_v46, %v7486_v47 }
 0x96c   :  { %v7208_v57 = vpack.c.bf16 %v7492_v51, %v7491_v52 }
 0x96d   :  { %7200 = vmatprep.subr.msk.bf16.mxu1 %vm8342_vm2, %v7198_v48 }
 0xa24   :  { %v6769_v53 = vpop.f32.mrb[8].mxu1 }
 0xa25   :  { %v1591_v54 = vpop.f32.mrb[9].mxu1  ;;  %v8500_v56 = vadd.f32 %v6769_v53, %v6267_v50 }
 0xa26   :  { %v8498_v55 = vadd.f32 %v6267_v50, %v1591_v54 }
 0xa28   :  { %1897 = vrot.lane.b32.xlu0 %v8498_v55, %s7994_s24  ;;  %6785 = vmatprep.mubr.msk.f32.mxu1 %vm321_vm1, %v8498_v55 }
 0xa29   :  { %6786 = vmatmul.mubr.msk.f32.vlgmr.msra.gmra.mrb[10].mxu1 %vm321_vm1, %v8500_v56 }
 0xa2a   :  { %7203 = vmatpush3.bf16.xpose.msk.msra.mxu1 %vm8342_vm2, %v7198_v48 }
 0xa2b   :  { %7210 = vmatprep.subr.msk.bf16.mxu1 %vm8342_vm2, %v7208_v57 }
 0xa2c   :  { %1899 = vrot.lane.b32.xlu0 %v8500_v56, %s7994_s24 }
 0xa30   :  { %2263 = vrot.lane.b32.xlu0 %v8498_v55, %s7997_s28 }
 0xa34   :  { %2265 = vrot.lane.b32.xlu0 %v8500_v56, %s7997_s28 }
 0xa9a   :  { %v1898_v58 = vpop.permute.xlu0 %1897 }
 0xa9b   :  { %6799 = vmatprep.mubr.msk.f32.mxu1 %vm321_vm1, %v1898_v58 }
 0xa9e   :  { %v1900_v59 = vpop.permute.xlu0 %1899 }
 0xa9f   :  { %6800 = vmatmul.mubr.msk.f32.vlgmr.msra.gmra.mrb[12].mxu1 %vm321_vm1, %v1900_v59 }
 0xaa0   :  { %7213 = vmatpush3.bf16.xpose.msk.msra.mxu1 %vm8342_vm2, %v7208_v57 }
 0xaa2   :  { %v2264_v60 = vpop.permute.xlu0 %2263 }
 0xaa3   :  { %6823 = vmatprep.mubr.msk.f32.mxu1 %vm321_vm1, %v2264_v60 }
 0xaa6   :  { %v2266_v61 = vpop.permute.xlu0 %2265 }
 0xaa7   :  { %6824 = vmatmul.mubr.msk.f32.vlgmr.msra.gmra.mrb[14].mxu1 %vm321_vm1, %v2266_v61 }
 0xafc   :  { %v6787_v62 = vpop.f32.mrb[10].mxu1 }
 0xafd   :  { %v1785_v0 = vmul.f32 0.35355338, %v6787_v62  ;;  %v1775_v11 = vpop.f32.mrb[11].mxu1 }
 0xafe   :  { %v1784_v1 = vmul.f32 0.35355338, %v1775_v11 }
 0xaff   :  { %v1787_v2 = vadd.f32 %v1785_v0, %v8527_v63 }
 0xb00   :  { %v1786_v3 = vadd.f32 %v1784_v1, %v8532_v8 }
 0xb01   :  { %v1791_v4 = vsel %vm409_vm3, %v1787_v2, -inf }
 0xb02   :  { %1792 = vmax.xlane.f32.xlu1 %v1791_v4  ;;  %v1788_v5 = vsel %vm409_vm3, %v1786_v3, -inf }
 0xb03   :  { %1789 = vmax.xlane.f32.xlu0 %v1788_v5 }
 0xb72   :  { %v6801_v6 = vpop.f32.mrb[12].mxu1 }
 0xb73   :  { %v1979_v7 = vpop.f32.mrb[13].mxu1  ;;  %v1989_v9 = vmul.f32 0.35355338, %v6801_v6 }
 0xb74   :  { %v1988_v10 = vmul.f32 0.35355338, %v1979_v7 }
 0xb75   :  { %v1991_v15 = vadd.f32 %v1989_v9, %v8527_v63 }
 0xb76   :  { %v1990_v12 = vadd.f32 %v1988_v10, %v8532_v8 }
 0xb77   :  { %v1995_v20 = vsel %vm409_vm3, %v1991_v15, -inf }
 0xb78   :  { %v1992_v13 = vsel %vm409_vm3, %v1990_v12, -inf }
 0xb79   :  { %1993 = vmax.xlane.f32.xlu0 %v1992_v13 }
 0xb7a   :  { %v6825_v18 = vpop.f32.mrb[14].mxu1 }
 0xb7b   :  { %v2345_v19 = vpop.f32.mrb[15].mxu1  ;;  %v2355_v51 = vmul.f32 0.35355338, %v6825_v18 }
 0xb7c   :  { %v2354_v49 = vmul.f32 0.35355338, %v2345_v19 }
 0xb7d   :  { %1996 = vmax.xlane.f32.xlu0 %v1995_v20  ;;  %v2357_v53 = vadd.f32 %v2355_v51, %v8527_v63 }
 0xb7e   :  { %v2356_v50 = vadd.f32 %v2354_v49, %v8532_v8 }
 0xb7f   :  { %v2361_v54 = vsel %vm409_vm3, %v2357_v53, -inf }
 0xb80   :  { %v2358_v52 = vsel %vm409_vm3, %v2356_v50, -inf }
 0xb8f   :  { %v1793_v22 = vpop.xlane.xlu1 %1792 }
 0xb90   :  { %v1795_v14 = vsub.f32 %v1787_v2, %v1793_v22  ;;  %v1790_v16 = vpop.xlane.xlu0 %1789 }
 0xb91   :  { %v1794_v23 = vsub.f32 %v1786_v3, %v1790_v16 }
 0xb92   :  { %v1798_v39 = vmul.f32 1.442695, %v1795_v14 }
 0xb93   :  { %v1796_v27 = vmul.f32 1.442695, %v1794_v23 }
 0xb94   :  { %7629 = vpow2.f32 %v1798_v39 }
 0xb95   :  { %7631 = vpow2.f32 %v1796_v27 }
 0xb9e   :  { %v7630_v28 = vpop.eup %7629 }
 0xb9f   :  { %v7632_v29 = vpop.eup %7631  ;;  %v1803_v30 = vsel %vm409_vm3, %v7630_v28, 0.0 }
 0xba0   :  { %1804 = vadd.xlane.f32.xlu1 %v1803_v30  ;;  %v1800_v31 = vsel %vm409_vm3, %v7632_v29, 0.0  ;;  %v1692_v30 = vld [vmem:[#allocation13] sm:$0xff] }
 0xba1   :  { %1801 = vadd.xlane.f32.xlu0 %v1800_v31 }
 0xc06   :  { %v1994_v32 = vpop.xlane.xlu0 %1993 }
 0xc07   :  { %v1998_v33 = vsub.f32 %v1990_v12, %v1994_v32 }
 0xc09   :  { %v2000_v34 = vmul.f32 1.442695, %v1998_v33 }
 0xc0a   :  { %v1997_v37 = vpop.xlane.xlu0 %1996 }
 0xc0b   :  { %7633 = vpow2.f32 %v2000_v34  ;;  %v1999_v38 = vsub.f32 %v1991_v15, %v1997_v37 }
 0xc0d   :  { %v2002_v40 = vmul.f32 1.442695, %v1999_v38 }
 0xc0f   :  { %7635 = vpow2.f32 %v2002_v40 }
 0xc15   :  { %v7634_v41 = vpop.eup %7633 }
 0xc16   :  { %v2004_v42 = vsel %vm409_vm3, %v7634_v41, 0.0 }
 0xc17   :  { %2005 = vadd.xlane.f32.xlu0 %v2004_v42 }
 0xc19   :  { %v7636_v44 = vpop.eup %7635 }
 0xc1a   :  { %v2007_v45 = vsel %vm409_vm3, %v7636_v44, 0.0 }
 0xc1b   :  { %2008 = vadd.xlane.f32.xlu1 %v2007_v45 }
 0xc2c   :  { %7499 = vrot.lane.b32.xlu1 %v8483_v43, %s7996_s1 }
 0xc2d   :  { %7494 = vrot.lane.b32.xlu0 %v8483_v43, %s7995_s7 }
 0xc2e   :  { %v1802_v46 = vpop.xlane.xlu0 %1801 }
 0xc2f   :  { %7637 = vrcp.f32 %v1802_v46 }
 0xc30   :  { %7504 = vrot.lane.b32.xlu1 %v8483_v43, %s9065_s30 }
 0xc31   :  { %2550 = vrot.lane.b32.xlu0 %v8498_v55, %s9065_s30  ;;  %v1805_v55 = vpop.xlane.xlu1 %1804 }
 0xc32   :  { %7639 = vrcp.f32 %v1805_v55 }
 0xc34   :  { %2552 = vrot.lane.b32.xlu1 %v8500_v56, %s9065_s30  ;;  %s9092_s30 = smov 56  }
 0xc39   :  { %v7638_v47 = vpop.eup %7637 }
 0xc3a   :  { %v1808_v48 = vmul.f32 %v7638_v47, %v7632_v29  ;;  %v1693_v29 = vld [vmem:[#allocation13 + $0x8] sm:$0xff] }
 0xc3c   :  { %6792 = vmatprep.mubr.msk.f32.mxu0 %vm409_vm3, %v1808_v48  ;;  %v7640_v62 = vpop.eup %7639 }
 0xc3d   :  { %v1809_v3 = vmul.f32 %v7640_v62, %v7630_v28 }
 0xc50   :  { %2359 = vmax.xlane.f32.xlu0 %v2358_v52 }
 0xc58   :  { %2362 = vmax.xlane.f32.xlu1 %v2361_v54 }
 0xc69   :  { %7509 = vrot.lane.b32.xlu1 %v8483_v43, %s7998_s8 }
 0xc6d   :  { %7514 = vrot.lane.b32.xlu1 %v8483_v43, %s8000_s4 }
 0xca4   :  { %v2006_v56 = vpop.xlane.xlu0 %2005 }
 0xca5   :  { %7641 = vrcp.f32 %v2006_v56 }
 0xca8   :  { %v2009_v57 = vpop.xlane.xlu1 %2008  ;;  %v7495_v58 = vpop.permute.xlu0 %7494 }
 0xca9   :  { %7643 = vrcp.f32 %v2009_v57  ;;  %v7497_v59 = vunpack.i.h.bf16 %v7495_v58  ;;  %v7496_v60 = vunpack.i.l.bf16 %v7495_v58 }
 0xcab   :  { %v7194_v61 = vpack.c.bf16 %v7497_v59, %v7496_v60 }
 0xcac   :  { %v7500_v0 = vpop.permute.xlu1 %7499  ;;  %v2551_v11 = vpop.permute.xlu0 %2550 }
 0xcad   :  { %v7502_v1 = vunpack.i.h.bf16 %v7500_v0  ;;  %v7501_v2 = vunpack.i.l.bf16 %v7500_v0  ;;  %7195 = vmatprep.subr.bf16.mxu0 %v7194_v61  ;;  %6842 = vmatprep.mubr.msk.f32.mxu1 %vm321_vm1, %v2551_v11 }
 0xcae   :  { %7197 = vmatpush3.bf16.msra.mxu0 %v7194_v61 }
 0xcaf   :  { %v7642_v43 = vpop.eup %7641  ;;  %v7204_v4 = vpack.c.bf16 %v7502_v1, %v7501_v2 }
 0xcb0   :  { %v7505_v5 = vpop.permute.xlu1 %7504  ;;  %v2012_v6 = vmul.f32 %v7642_v43, %v7634_v41 }
 0xcb1   :  { %v7507_v7 = vunpack.i.h.bf16 %v7505_v5  ;;  %v7506_v9 = vunpack.i.l.bf16 %v7505_v5  ;;  %6793 = vmatmul.mubr.msk.f32.vlgmr.msra.gmra.mrb[14].mxu0 %vm409_vm3, %v1809_v3  ;;  %7205 = vmatprep.subr.bf16.mxu0 %v7204_v4 }
 0xcb2   :  { %7207 = vmatpush3.bf16.msra.mxu0 %v7204_v4  ;;  %6806 = vmatprep.mubr.msk.f32.mxu0 %vm409_vm3, %v2012_v6 }
 0xcb3   :  { %v7644_v10 = vpop.eup %7643  ;;  %v7218_v12 = vpack.c.bf16 %v7507_v7, %v7506_v9  ;;  %6809 = vmatprep.subr.mxu0 %v1693_v29  ;;  %v1695_v7 = vld [vmem:[#allocation13 + $0x18] sm:$0xff] }
 0xcb4   :  { %v2013_v13 = vmul.f32 %v7644_v10, %v7636_v44  ;;  %v2553_v15 = vpop.permute.xlu1 %2552 }
 0xcb5   :  { %7220 = vmatprep.subr.msk.bf16.mxu1 %vm8342_vm2, %v7218_v12 }
 0xcb6   :  { %6807 = vmatmul.mubr.msk.f32.vlgmr.msra.gmra.mrb[16].mxu0 %vm409_vm3, %v2013_v13  ;;  %7223 = vmatpush3.bf16.xpose.msk.msra.mxu1 %vm8342_vm2, %v7218_v12 }
 0xcb7   :  { %6810 = vmatpush3.msra.mxu0 %v1693_v29 }
 0xcb8   :  { %6814 = vmatprep.subr.mxu0 %v1692_v30 }
 0xcbd   :  { %6843 = vmatmul.mubr.msk.f32.vlgmr.msra.gmra.mrb[16].mxu1 %vm321_vm1, %v2553_v15 }
 0xcdd   :  { %v2360_v18 = vpop.xlane.xlu0 %2359 }
 0xcde   :  { %v2364_v19 = vsub.f32 %v2356_v50, %v2360_v18 }
 0xce0   :  { %v2366_v20 = vmul.f32 1.442695, %v2364_v19 }
 0xce2   :  { %7645 = vpow2.f32 %v2366_v20 }
 0xce5   :  { %v2363_v22 = vpop.xlane.xlu1 %2362 }
 0xce6   :  { %v2365_v14 = vsub.f32 %v2357_v53, %v2363_v22  ;;  %v1694_v53 = vld [vmem:[#allocation13 + $0x10] sm:$0xff]  ;;  %v6305_v22 = vld [vmem:[%s9037_s14] ss:$0 sm:$0xff] }
 0xce8   :  { %v2368_v16 = vmul.f32 1.442695, %v2365_v14 }
 0xce9   :  { %v7510_v33 = vpop.permute.xlu1 %7509 }
 0xcea   :  { %7647 = vpow2.f32 %v2368_v16  ;;  %v7512_v38 = vunpack.i.h.bf16 %v7510_v33  ;;  %v7511_v40 = vunpack.i.l.bf16 %v7510_v33 }
 0xcec   :  { %v7646_v23 = vpop.eup %7645  ;;  %v7214_v44 = vpack.c.bf16 %v7512_v38, %v7511_v40 }
 0xced   :  { %v2370_v39 = vsel %vm409_vm3, %v7646_v23, 0.0  ;;  %v7515_v47 = vpop.permute.xlu1 %7514 }
 0xcee   :  { %2371 = vadd.xlane.f32.xlu0 %v2370_v39  ;;  %v7517_v54 = vunpack.i.h.bf16 %v7515_v47  ;;  %v7516_v55 = vunpack.i.l.bf16 %v7515_v47  ;;  %v2888_v47 = vld [vmem:[#allocation14 + $0x18] sm:$0xff] }
 0xcf0   :  { %v7224_v60 = vpack.c.bf16 %v7517_v54, %v7516_v55  ;;  %v2983_v55 = vld [vmem:[%s9040_s17 + $0x20] sm:$0xff] }
 0xcf4   :  { %v7648_v27 = vpop.eup %7647 }
 0xcf5   :  { %v2373_v28 = vsel %vm409_vm3, %v7648_v27, 0.0 }
 0xcf6   :  { %2374 = vadd.xlane.f32.xlu0 %v2373_v28 }
 0xd7b   :  { %v2372_v31 = vpop.xlane.xlu0 %2371 }
 0xd7c   :  { %7649 = vrcp.f32 %v2372_v31 }
 0xd83   :  { %v2375_v37 = vpop.xlane.xlu0 %2374 }
 0xd84   :  { %v6794_v32 = vpop.f32.mrb[14].mxu0  ;;  %7651 = vrcp.f32 %v2375_v37 }
 0xd85   :  { %v1888_v34 = vpop.f32.mrb[15].mxu0 }
 0xd86   :  { %v7650_v45 = vpop.eup %7649 }
 0xd87   :  { %v2378_v52 = vmul.f32 %v7650_v45, %v7646_v23 }
 0xd89   :  { %v6808_v41 = vpop.f32.mrb[16].mxu0 }
 0xd8a   :  { %v2092_v42 = vpop.f32.mrb[17].mxu0 }
 0xd8b   :  { %6811 = vmatprep.mubr.msk.f32.mxu0 %vm321_vm1, %v2092_v42 }
 0xd8c   :  { %6812 = vmatmul.mubr.msk.f32.vlgmr.msra.gmra.mrb[18].mxu0 %vm321_vm1, %v6808_v41 }
 0xd8d   :  { %6815 = vmatpush3.msra.mxu0 %v1692_v30  ;;  %6816 = vmatprep.mubr.msk.f32.mxu0 %vm321_vm1, %v1888_v34 }
 0xd8e   :  { %7215 = vmatprep.subr.bf16.mxu0 %v7214_v44  ;;  %v7652_v51 = vpop.eup %7651 }
 0xd8f   :  { %v2379_v57 = vmul.f32 %v7652_v51, %v7648_v27  ;;  %v2981_v51 = vld [vmem:[%s9040_s17 + $0x10] sm:$0xff] }
 0xd90   :  { %v6844_v46 = vpop.f32.mrb[16].mxu1 }
 0xd91   :  { %v2632_v48 = vpop.f32.mrb[17].mxu1  ;;  %v2642_v49 = vmul.f32 0.35355338, %v6844_v46  ;;  %v2887_v46 = vld [vmem:[#allocation14 + $0x10] sm:$0xff] }
 0xd92   :  { %v2641_v50 = vmul.f32 0.35355338, %v2632_v48  ;;  %v7232_v48 = vpack.c.bf16 %v2888_v47, %v2887_v46  ;;  %v3122_v46 = vld [vmem:[#allocation7 + $0x28] sm:$0xff] }
 0xd93   :  { %v2644_v59 = vadd.f32 %v2642_v49, %v8527_v63  ;;  %v2979_v49 = vld [vmem:[%s9040_s17] sm:$0xff] }
 0xd94   :  { %6817 = vmatmul.mubr.msk.f32.vlgmr.msra.gmra.mrb[18].mxu0 %vm321_vm1, %v6794_v32  ;;  %v2643_v56 = vadd.f32 %v2641_v50, %v8532_v8  ;;  %v2980_v50 = vld [vmem:[%s9040_s17 + $0x8] sm:$0xff] }
 0xd95   :  { %7217 = vmatpush3.bf16.msra.mxu0 %v7214_v44  ;;  %6830 = vmatprep.mubr.msk.f32.mxu0 %vm409_vm3, %v2378_v52  ;;  %v2648_v61 = vsel %vm409_vm3, %v2644_v59, -inf  ;;  %v2886_v44 = vld [vmem:[#allocation14 + $0x8] sm:$0xff]  ;;  %v7236_v52 = vpack.c.bf16 %v2980_v50, %v2979_v49  ;;  %v3124_v49 = vld [vmem:[#allocation7 + $0x38] sm:$0xff] }
 0xd96   :  { %v2645_v58 = vsel %vm409_vm3, %v2643_v56, -inf  ;;  %6833 = vmatprep.subr.mxu0 %v1694_v53 }
 0xd97   :  { %2646 = vmax.xlane.f32.xlu0 %v2645_v58 }
 0xd98   :  { %6831 = vmatmul.mubr.msk.f32.vlgmr.msra.gmra.mrb[20].mxu0 %vm409_vm3, %v2379_v57 }
 0xd99   :  { %6834 = vmatpush3.msra.mxu0 %v1694_v53  ;;  %v2982_v53 = vld [vmem:[%s9040_s17 + $0x18] sm:$0xff] }
 0xd9a   :  { %7225 = vmatprep.subr.bf16.mxu0 %v7224_v60  ;;  %v7240_v54 = vpack.c.bf16 %v2982_v53, %v2981_v51 }
 0xd9b   :  { %2649 = vmax.xlane.f32.xlu0 %v2648_v61 }
 0xe24   :  { %v2647_v62 = vpop.xlane.xlu0 %2646 }
 0xe25   :  { %v2651_v8 = vsub.f32 %v2643_v56, %v2647_v62  ;;  %v2984_v56 = vld [vmem:[%s9040_s17 + $0x28] sm:$0xff] }
 0xe26   :  { %v7244_v57 = vpack.c.bf16 %v2984_v56, %v2983_v55 }
 0xe27   :  { %v2653_v0 = vmul.f32 1.442695, %v2651_v8 }
 0xe28   :  { %v2650_v11 = vpop.xlane.xlu0 %2649 }
 0xe29   :  { %7653 = vpow2.f32 %v2653_v0  ;;  %v2652_v1 = vsub.f32 %v2644_v59, %v2650_v11  ;;  %v8622_v0 = vsub.s32 1, %v8453_v24 }
 0xe2b   :  { %v2655_v2 = vmul.f32 1.442695, %v2652_v1  ;;  %v2876_v11 = vrot.slane %v8461_v36, %v8622_v0 }
 0xe2d   :  { %7655 = vpow2.f32 %v2655_v2 }
 0xe33   :  { %v7654_v43 = vpop.eup %7653 }
 0xe34   :  { %v2657_v63 = vsel %vm409_vm3, %v7654_v43, 0.0 }
 0xe35   :  { %2658 = vadd.xlane.f32.xlu0 %v2657_v63 }
 0xe37   :  { %v7656_v3 = vpop.eup %7655 }
 0xe38   :  { %v2660_v4 = vsel %vm409_vm3, %v7656_v3, 0.0 }
 0xe39   :  { %2661 = vadd.xlane.f32.xlu0 %v2660_v4 }
 0xe6b   :  { %v6832_v5 = vpop.f32.mrb[20].mxu0 }
 0xe6c   :  { %v2458_v6 = vpop.f32.mrb[21].mxu0 }
 0xe6d   :  { %6835 = vmatprep.mubr.msk.f32.mxu0 %vm321_vm1, %v2458_v6 }
 0xe6e   :  { %6836 = vmatmul.mubr.msk.f32.vlgmr.msra.gmra.mrb[18].mxu0 %vm321_vm1, %v6832_v5 }
 0xe6f   :  { %7227 = vmatpush3.bf16.msra.mxu0 %v7224_v60 }
 0xe70   :  { %6852 = vmatprep.subr.mxu0 %v1695_v7 }
 0xec2   :  { %v2659_v9 = vpop.xlane.xlu0 %2658 }
 0xec3   :  { %7657 = vrcp.f32 %v2659_v9  ;;  %v2985_v9 = vld [vmem:[%s9040_s17 + $0x30] sm:$0xff] }
 0xec6   :  { %v2662_v10 = vpop.xlane.xlu0 %2661 }
 0xec7   :  { %7659 = vrcp.f32 %v2662_v10  ;;  %v2986_v10 = vld [vmem:[%s9040_s17 + $0x38] sm:$0xff] }
 0xecd   :  { %v7658_v12 = vpop.eup %7657 }
 0xece   :  { %v2665_v13 = vmul.f32 %v7658_v12, %v7654_v43  ;;  %v2882_v43 = vrot.slane %v8466_v26, %v8622_v0  ;;  %v7248_v12 = vpack.c.bf16 %v2986_v10, %v2985_v9 }
 0xed0   :  { %6849 = vmatprep.mubr.msk.f32.mxu0 %vm409_vm3, %v2665_v13  ;;  %v6306_v13 = vld [vmem:[%s9039_s16] ss:$0 sm:$0xff] }
 0xed1   :  { %v7660_v15 = vpop.eup %7659 }
 0xed2   :  { %v2666_v18 = vmul.f32 %v7660_v15, %v7656_v3 }
 0xed4   :  { %6850 = vmatmul.mubr.msk.f32.vlgmr.msra.gmra.mrb[22].mxu0 %vm409_vm3, %v2666_v18 }
 0xed5   :  { %6853 = vmatpush3.msra.mxu0 %v1695_v7 }
 0xed6   :  { %7237 = vmatprep.subr.bf16.mxu0 %v7236_v52 }
 0xfa7   :  { %v6851_v19 = vpop.f32.mrb[22].mxu0 }
 0xfa8   :  { %v2745_v20 = vpop.f32.mrb[23].mxu0 }
 0xfa9   :  { %6854 = vmatprep.mubr.msk.f32.mxu0 %vm321_vm1, %v2745_v20 }
 0xfaa   :  { %6855 = vmatmul.mubr.msk.f32.vlgmr.msra.gmra.mrb[18].mxu0 %vm321_vm1, %v6851_v19 }
 0xfab   :  { %7239 = vmatpush3.bf16.msra.mxu0 %v7236_v52 }
 0xfac   :  { %7241 = vmatprep.subr.bf16.mxu0 %v7240_v54 }
 0xfaf   :  { %7243 = vmatpush3.bf16.msra.mxu0 %v7240_v54 }
 0xfb0   :  { %7245 = vmatprep.subr.bf16.mxu0 %v7244_v57 }
 0xfb3   :  { %7247 = vmatpush3.bf16.msra.mxu0 %v7244_v57  ;;  %v8649_v57 = vsub.s32 2, %v8453_v24  ;;  %v6315_v24 = vld [vmem:[%s9085_s26 + $0x1] ss:$0 sm:$0xff] }
 0xfb4   :  { %7249 = vmatprep.subr.bf16.mxu0 %v7248_v12 }
 0xfb7   :  { %7251 = vmatpush3.bf16.msra.mxu0 %v7248_v12 }
0x107d   :  { %v6856_v14 = vpop.f32.mrb[18].mxu0 }
0x107e   :  { %v2844_v16 = vadd.f32 %v6856_v14, %v6305_v22  ;;  %v2826_v23 = vpop.f32.mrb[19].mxu0 }
0x107f   :  { %v2843_v39 = vadd.f32 %v6305_v22, %v2826_v23 }
0x1080   :  { %v2846_v27 = vadd.f32 %v2844_v16, %v8476_v35  ;;  %v6309_v16 = vld [vmem:[%s9041_s18] ss:$0 sm:$0xff] }
0x1081   :  { %v2845_v28 = vadd.f32 %v2843_v39, %v8472_v17  ;;  %v2885_v17 = vld [vmem:[#allocation14] sm:$0xff] }
0x1082   :  { %v2850_v29 = vsel %vm228_vm0, %v2846_v27, 0.0  ;;  %v7228_v45 = vpack.c.bf16 %v2886_v44, %v2885_v17 }
0x1083   :  { %2851 = vadd.xlane.f32.xlu1 %v2850_v29  ;;  %v2847_v30 = vsel %vm228_vm0, %v2845_v28, 0.0 }
0x1084   :  { %2848 = vadd.xlane.f32.xlu0 %v2847_v30  ;;  %7229 = vmatprep.subr.bf16.mxu1 %v7228_v45 }
0x1085   :  { %7231 = vmatpush3.bf16.msra.mxu1 %v7228_v45  ;;  %v3121_v45 = vld [vmem:[#allocation7 + $0x20] sm:$0xff] }
0x1086   :  { %7233 = vmatprep.subr.bf16.mxu1 %v7232_v48  ;;  %v7252_v47 = vpack.c.bf16 %v3122_v46, %v3121_v45 }
0x1089   :  { %7235 = vmatpush3.bf16.msra.mxu1 %v7232_v48  ;;  %v3123_v48 = vld [vmem:[#allocation7 + $0x30] sm:$0xff] }
0x108a   :  { %7253 = vmatprep.subr.bf16.mxu1 %v7252_v47  ;;  %v7256_v50 = vpack.c.bf16 %v3124_v49, %v3123_v48 }
0x1110   :  { %v2852_v31 = vpop.xlane.xlu1 %2851 }
0x1111   :  { %v2854_v32 = vmul.f32 0.03125, %v2852_v31  ;;  %v2849_v33 = vpop.xlane.xlu0 %2848 }
0x1112   :  { %v2853_v34 = vmul.f32 0.03125, %v2849_v33 }
0x1113   :  { %v2856_v37 = vsub.f32 %v2846_v27, %v2854_v32 }
0x1114   :  { %v2855_v38 = vsub.f32 %v2845_v28, %v2853_v34 }
0x1115   :  { %v2858_v42 = vmul.f32 %v2856_v37, %v2856_v37 }
0x1116   :  { %v2857_v40 = vmul.f32 %v2855_v38, %v2855_v38 }
0x1117   :  { %v2862_v35 = vsel %vm228_vm0, %v2858_v42, 0.0 }
0x1118   :  { %v2859_v41 = vsel %vm228_vm0, %v2857_v40, 0.0 }
0x1119   :  { %2860 = vadd.xlane.f32.xlu0 %v2859_v41 }
0x111d   :  { %2863 = vadd.xlane.f32.xlu0 %v2862_v35 }
0x11a6   :  { %v2861_v58 = vpop.xlane.xlu0 %2860 }
0x11a7   :  { %v2865_v59 = vmul.f32 0.03125, %v2861_v58  ;;  %v3107_v58 = vrot.slane %v8461_v36, %v8649_v57 }
0x11a9   :  { %v2867_v60 = vadd.f32 1e-05, %v2865_v59 }
0x11aa   :  { %v2864_v61 = vpop.xlane.xlu0 %2863 }
0x11ab   :  { %7661 = vrsqrt.f32 %v2867_v60  ;;  %v2866_v62 = vmul.f32 0.03125, %v2864_v61  ;;  %v3113_v61 = vrot.slane %v8466_v26, %v8649_v57 }
0x11ad   :  { %v2868_v8 = vadd.f32 1e-05, %v2866_v62 }
0x11af   :  { %7663 = vrsqrt.f32 %v2868_v8 }
0x11b5   :  { %v7662_v1 = vpop.eup %7661 }
0x11b6   :  { %v2871_v2 = vmul.f32 %v7662_v1, %v2855_v38 }
0x11b8   :  { %v2877_v63 = vmul.f32 %v2876_v11, %v2871_v2 }
0x11b9   :  { %v7664_v3 = vpop.eup %7663 }
0x11ba   :  { %v2872_v4 = vmul.f32 %v7664_v3, %v2856_v37  ;;  %v2883_v5 = vadd.f32 %v2882_v43, %v2877_v63 }
0x11bc   :  { %v2878_v6 = vmul.f32 %v2876_v11, %v2872_v4  ;;  %6865 = vmatprep.mubr.msk.f32.mxu1 %vm228_vm0, %v2883_v5 }
0x11be   :  { %v2884_v7 = vadd.f32 %v2882_v43, %v2878_v6 }
0x11c0   :  { %6866 = vmatmul.mubr.msk.f32.vlgmr.msra.gmra.mrb[18].mxu1 %vm228_vm0, %v2884_v7 }
0x11c1   :  { %7255 = vmatpush3.bf16.msra.mxu1 %v7252_v47 }
0x11c2   :  { %7257 = vmatprep.subr.bf16.mxu1 %v7256_v50 }
0x11c5   :  { %7259 = vmatpush3.bf16.msra.mxu1 %v7256_v50 }
0x1293   :  { %v6867_v15 = vpop.f32.mrb[18].mxu1 }
0x1294   :  { %v2974_v18 = vadd.f32 %v6867_v15, %v6306_v13  ;;  %v2968_v19 = vpop.f32.mrb[19].mxu1 }
0x1295   :  { %v2969_v20 = vadd.f32 %v6306_v13, %v2968_v19 }
0x1296   :  { %v2978_v14 = vmax.f32 %v2974_v18, 0.0 }
0x1297   :  { %v2977_v22 = vmax.f32 %v2969_v20, 0.0 }
0x1299   :  { %6884 = vmatprep.mubr.msk.f32.mxu0 %vm2994_vm4, %v2977_v22 }
0x129a   :  { %6885 = vmatmul.mubr.msk.f32.vlgmr.msra.gmra.mrb[24].mxu0 %vm2994_vm4, %v2978_v14 }
0x136d   :  { %v6886_v23 = vpop.f32.mrb[24].mxu0 }
0x136e   :  { %v3067_v39 = vpop.f32.mrb[25].mxu0  ;;  %v3073_v27 = vadd.f32 %v6886_v23, %v6309_v16 }
0x136f   :  { %v3068_v28 = vadd.f32 %v6309_v16, %v3067_v39 }
0x1370   :  { %v3077_v31 = vadd.f32 %v3073_v27, %v2884_v7 }
0x1371   :  { %v3076_v29 = vadd.f32 %v3068_v28, %v2883_v5 }
0x1372   :  { %v3081_v32 = vsel %vm228_vm0, %v3077_v31, 0.0 }
0x1373   :  { %v3078_v30 = vsel %vm228_vm0, %v3076_v29, 0.0 }
0x1374   :  { %3079 = vadd.xlane.f32.xlu0 %v3078_v30 }
0x1378   :  { %3082 = vadd.xlane.f32.xlu0 %v3081_v32 }
0x1401   :  { %v3080_v33 = vpop.xlane.xlu0 %3079 }
0x1402   :  { %v3084_v34 = vmul.f32 0.03125, %v3080_v33  ;;  %v8717_v33 = vld [vmem:[%s9088_s25] sm:$0xff] }
0x1404   :  { %v3086_v37 = vsub.f32 %v3076_v29, %v3084_v34 }
0x1405   :  { %v3083_v38 = vpop.xlane.xlu0 %3082 }
0x1406   :  { %v3085_v40 = vmul.f32 0.03125, %v3083_v38  ;;  %v3088_v41 = vmul.f32 %v3086_v37, %v3086_v37 }
0x1408   :  { %v3087_v42 = vsub.f32 %v3077_v31, %v3085_v40  ;;  %v3090_v35 = vsel %vm228_vm0, %v3088_v41, 0.0  ;;  %v8711_v31 = vld [vmem:[%s9088_s25 + $0x8] sm:$0xff]  ;;  %s9091_s25 = smov 104  }
0x1409   :  { %3091 = vadd.xlane.f32.xlu0 %v3090_v35 }
0x140a   :  { %v3089_v17 = vmul.f32 %v3087_v42, %v3087_v42 }
0x140c   :  { %v3093_v44 = vsel %vm228_vm0, %v3089_v17, 0.0 }
0x140d   :  { %3094 = vadd.xlane.f32.xlu0 %v3093_v44 }
0x1496   :  { %v3092_v51 = vpop.xlane.xlu0 %3091 }
0x1497   :  { %v3096_v52 = vmul.f32 0.03125, %v3092_v51 }
0x1499   :  { %v3098_v53 = vadd.f32 1e-05, %v3096_v52 }
0x149a   :  { %v3095_v54 = vpop.xlane.xlu0 %3094 }
0x149b   :  { %7665 = vrsqrt.f32 %v3098_v53  ;;  %v3097_v55 = vmul.f32 0.03125, %v3095_v54 }
0x149d   :  { %v3099_v56 = vadd.f32 1e-05, %v3097_v55 }
0x149f   :  { %7667 = vrsqrt.f32 %v3099_v56 }
0x14a5   :  { %v7666_v59 = vpop.eup %7665 }
0x14a6   :  { %v3102_v60 = vmul.f32 %v7666_v59, %v3086_v37 }
0x14a8   :  { %v3108_v62 = vmul.f32 %v3107_v58, %v3102_v60 }
0x14a9   :  { %v7668_v8 = vpop.eup %7667 }
0x14aa   :  { %v3103_v11 = vmul.f32 %v7668_v8, %v3087_v42  ;;  %v8655_v1 = vadd.f32 %v3113_v61, %v3108_v62 }
0x14ac   :  { %v3109_v2 = vmul.f32 %v3107_v58, %v3103_v11  ;;  %6895 = vmatprep.mubr.msk.f32.mxu1 %vm228_vm0, %v8655_v1 }
0x14ae   :  { %v8659_v43 = vadd.f32 %v3113_v61, %v3109_v2 }
0x14b0   :  { %6896 = vmatmul.mubr.msk.f32.vlgmr.msra.gmra.mrb[20].mxu1 %vm228_vm0, %v8659_v43 }
0x1583   :  { %v6897_v36 = vpop.f32.mrb[20].mxu1 }
0x1584   :  { %v8666_v26 = vadd.f32 %v6897_v36, %v6315_v24  ;;  %v3205_v63 = vpop.f32.mrb[21].mxu1 }
0x1585   :  { %v8668_v3 = vadd.f32 %v6315_v24, %v3205_v63 }
0x1587   :  { %6902 = vmatprep.mubr.msk.f32.mxu1 %vm321_vm1, %v8668_v3  ;;  %v8674_v4 = vpack.i.bf16 %v8666_v26, %v8668_v3 }
0x1589   :  { %7524 = vrot.lane.b32.xlu1 %v8674_v4, %s7996_s1  ;;  %7519 = vrot.lane.b32.xlu0 %v8674_v4, %s7995_s7 }
0x158d   :  { %7529 = vrot.lane.b32.xlu1 %v8674_v4, %s7998_s8  ;;  %3423 = vrot.lane.b32.xlu0 %v8668_v3, %s7994_s24 }
0x1591   :  { %3791 = vrot.lane.b32.xlu1 %v8666_v26, %s7997_s28  ;;  %3425 = vrot.lane.b32.xlu0 %v8666_v26, %s7994_s24 }
0x1595   :  { %3789 = vrot.lane.b32.xlu0 %v8668_v3, %s7997_s28 }
0x15fb   :  { %v7525_v5 = vpop.permute.xlu1 %7524  ;;  %v7520_v6 = vpop.permute.xlu0 %7519 }
0x15fc   :  { %v7527_v7 = vunpack.i.h.bf16 %v7525_v5  ;;  %v7526_v9 = vunpack.i.l.bf16 %v7525_v5  ;;  %v7522_v10 = vunpack.i.h.bf16 %v7520_v6  ;;  %v7521_v12 = vunpack.i.l.bf16 %v7520_v6 }
0x15fe   :  { %v7260_v13 = vpack.c.bf16 %v7522_v10, %v7521_v12  ;;  %v7270_v15 = vpack.c.bf16 %v7527_v7, %v7526_v9 }
0x15ff   :  { %v7530_v18 = vpop.permute.xlu1 %7529  ;;  %v3424_v22 = vpop.permute.xlu0 %3423 }
0x1600   :  { %7262 = vmatprep.subr.msk.bf16.mxu1 %vm8342_vm2, %v7260_v13  ;;  %v7532_v19 = vunpack.i.h.bf16 %v7530_v18  ;;  %v7531_v20 = vunpack.i.l.bf16 %v7530_v18 }
0x1601   :  { %7265 = vmatpush3.bf16.xpose.msk.msra.mxu1 %vm8342_vm2, %v7260_v13 }
0x1602   :  { %7272 = vmatprep.subr.msk.bf16.mxu1 %vm8342_vm2, %v7270_v15  ;;  %v7280_v14 = vpack.c.bf16 %v7532_v19, %v7531_v20 }
0x1603   :  { %v3426_v16 = vpop.permute.xlu0 %3425  ;;  %v3792_v39 = vpop.permute.xlu1 %3791 }
0x1607   :  { %v3790_v23 = vpop.permute.xlu0 %3789 }
0x1608   :  { %6903 = vmatmul.mubr.msk.f32.vlgmr.msra.gmra.mrb[22].mxu1 %vm321_vm1, %v8666_v26 }
0x1609   :  { %7275 = vmatpush3.bf16.xpose.msk.msra.mxu1 %vm8342_vm2, %v7270_v15  ;;  %6916 = vmatprep.mubr.msk.f32.mxu1 %vm321_vm1, %v3424_v22 }
0x160a   :  { %7282 = vmatprep.subr.msk.bf16.mxu1 %vm8342_vm2, %v7280_v14 }
0x1610   :  { %6917 = vmatmul.mubr.msk.f32.vlgmr.msra.gmra.mrb[24].mxu1 %vm321_vm1, %v3426_v16 }
0x1611   :  { %7285 = vmatpush3.bf16.xpose.msk.msra.mxu1 %vm8342_vm2, %v7280_v14  ;;  %6940 = vmatprep.mubr.msk.f32.mxu1 %vm321_vm1, %v3790_v23 }
0x1618   :  { %6941 = vmatmul.mubr.msk.f32.vlgmr.msra.gmra.mrb[26].mxu1 %vm321_vm1, %v3792_v39 }
0x16db   :  { %v6904_v27 = vpop.f32.mrb[22].mxu1 }
0x16dc   :  { %v3311_v28 = vmul.f32 0.35355338, %v6904_v27  ;;  %v3301_v29 = vpop.f32.mrb[23].mxu1 }
0x16dd   :  { %v3310_v30 = vmul.f32 0.35355338, %v3301_v29 }
0x16de   :  { %v3313_v32 = vadd.f32 %v8711_v31, %v3311_v28 }
0x16df   :  { %v3312_v34 = vadd.f32 %v8717_v33, %v3310_v30 }
0x16e0   :  { %v3317_v37 = vsel %vm409_vm3, %v3313_v32, -inf }
0x16e1   :  { %3318 = vmax.xlane.f32.xlu1 %v3317_v37  ;;  %v3314_v38 = vsel %vm409_vm3, %v3312_v34, -inf }
0x16e2   :  { %3315 = vmax.xlane.f32.xlu0 %v3314_v38 }
0x16e3   :  { %v6918_v40 = vpop.f32.mrb[24].mxu1 }
0x16e4   :  { %v3505_v41 = vpop.f32.mrb[25].mxu1  ;;  %v3515_v42 = vmul.f32 0.35355338, %v6918_v40 }
0x16e5   :  { %v3514_v35 = vmul.f32 0.35355338, %v3505_v41 }
0x16e6   :  { %v3517_v44 = vadd.f32 %v8711_v31, %v3515_v42 }
0x16e7   :  { %v3516_v17 = vadd.f32 %v8717_v33, %v3514_v35 }
0x16e8   :  { %v3521_v48 = vsel %vm409_vm3, %v3517_v44, -inf }
0x16e9   :  { %v3518_v45 = vsel %vm409_vm3, %v3516_v17, -inf }
0x16ea   :  { %3519 = vmax.xlane.f32.xlu0 %v3518_v45 }
0x16eb   :  { %v6942_v46 = vpop.f32.mrb[26].mxu1 }
0x16ec   :  { %v3871_v47 = vpop.f32.mrb[27].mxu1  ;;  %v3881_v6 = vmul.f32 0.35355338, %v6942_v46 }
0x16ed   :  { %v3880_v7 = vmul.f32 0.35355338, %v3871_v47 }
0x16ee   :  { %3522 = vmax.xlane.f32.xlu0 %v3521_v48  ;;  %v3883_v9 = vadd.f32 %v8711_v31, %v3881_v6 }
0x16ef   :  { %v3882_v10 = vadd.f32 %v8717_v33, %v3880_v7 }
0x16f0   :  { %v3887_v13 = vsel %vm409_vm3, %v3883_v9, -inf }
0x16f1   :  { %v3884_v12 = vsel %vm409_vm3, %v3882_v10, -inf }
0x176e   :  { %v3319_v49 = vpop.xlane.xlu1 %3318 }
0x176f   :  { %v3321_v50 = vsub.f32 %v3313_v32, %v3319_v49  ;;  %v3316_v51 = vpop.xlane.xlu0 %3315 }
0x1770   :  { %v3320_v52 = vsub.f32 %v3312_v34, %v3316_v51 }
0x1771   :  { %v3324_v53 = vmul.f32 1.442695, %v3321_v50 }
0x1772   :  { %v3322_v54 = vmul.f32 1.442695, %v3320_v52 }
0x1773   :  { %7669 = vpow2.f32 %v3324_v53 }
0x1774   :  { %7671 = vpow2.f32 %v3322_v54 }
0x1777   :  { %v3520_v55 = vpop.xlane.xlu0 %3519 }
0x1778   :  { %v3524_v56 = vsub.f32 %v3516_v17, %v3520_v55 }
0x177a   :  { %v3526_v58 = vmul.f32 1.442695, %v3524_v56  ;;  %v3216_v56 = vld [vmem:[#allocation8 + $0x28] sm:$0xff] }
0x177b   :  { %v3523_v59 = vpop.xlane.xlu0 %3522 }
0x177c   :  { %7673 = vpow2.f32 %v3526_v58  ;;  %v3525_v60 = vsub.f32 %v3517_v44, %v3523_v59  ;;  %v3215_v58 = vld [vmem:[#allocation8 + $0x20] sm:$0xff] }
0x177d   :  { %v7670_v61 = vpop.eup %7669 }
0x177e   :  { %v7672_v62 = vpop.eup %7671  ;;  %v3528_v8 = vmul.f32 1.442695, %v3525_v60  ;;  %v3329_v11 = vsel %vm409_vm3, %v7670_v61, 0.0 }
0x177f   :  { %3330 = vadd.xlane.f32.xlu0 %v3329_v11  ;;  %v3326_v2 = vsel %vm409_vm3, %v7672_v62, 0.0 }
0x1780   :  { %7675 = vpow2.f32 %v3528_v8  ;;  %3327 = vadd.xlane.f32.xlu1 %v3326_v2 }
0x1786   :  { %v7674_v24 = vpop.eup %7673 }
0x1787   :  { %v3530_v36 = vsel %vm409_vm3, %v7674_v24, 0.0 }
0x1788   :  { %3531 = vadd.xlane.f32.xlu1 %v3530_v36 }
0x178a   :  { %v7676_v63 = vpop.eup %7675 }
0x178b   :  { %v3533_v5 = vsel %vm409_vm3, %v7676_v63, 0.0 }
0x178c   :  { %3534 = vadd.xlane.f32.xlu0 %v3533_v5 }
0x1799   :  { %7534 = vrot.lane.b32.xlu1 %v8674_v4, %s8001_s11  ;;  %s9093_s11 = smov 48  }
0x179d   :  { %7544 = vrot.lane.b32.xlu1 %v8674_v4, %s8000_s4 }
0x17a1   :  { %4076 = vrot.lane.b32.xlu1 %v8668_v3, %s9091_s25 }
0x17a2   :  { %7539 = vrot.lane.b32.xlu0 %v8674_v4, %s9092_s30 }
0x17a6   :  { %4078 = vrot.lane.b32.xlu0 %v8666_v26, %s9091_s25 }
0x17c5   :  { %3885 = vmax.xlane.f32.xlu1 %v3884_v12  ;;  %3888 = vmax.xlane.f32.xlu0 %v3887_v13 }
0x180c   :  { %v3331_v3 = vpop.xlane.xlu0 %3330 }
0x180d   :  { %v3328_v15 = vpop.xlane.xlu1 %3327 }
0x180e   :  { %7677 = vrcp.f32 %v3328_v15 }
0x180f   :  { %7679 = vrcp.f32 %v3331_v3 }
0x1815   :  { %v3532_v18 = vpop.xlane.xlu1 %3531 }
0x1816   :  { %7681 = vrcp.f32 %v3532_v18 }
0x1818   :  { %v7678_v19 = vpop.eup %7677 }
0x1819   :  { %v7535_v26 = vpop.permute.xlu1 %7534  ;;  %v3535_v20 = vpop.xlane.xlu0 %3534  ;;  %v3334_v22 = vmul.f32 %v7678_v19, %v7672_v62 }
0x181a   :  { %v7537_v14 = vunpack.i.h.bf16 %v7535_v26  ;;  %v7536_v16 = vunpack.i.l.bf16 %v7535_v26  ;;  %7683 = vrcp.f32 %v3535_v20  ;;  %v7680_v39 = vpop.eup %7679  ;;  %v3217_v20 = vld [vmem:[#allocation8 + $0x30] sm:$0xff] }
0x181b   :  { %6909 = vmatprep.mubr.msk.f32.mxu0 %vm409_vm3, %v3334_v22  ;;  %v3335_v38 = vmul.f32 %v7680_v39, %v7670_v61 }
0x181c   :  { %v7266_v23 = vpack.c.bf16 %v7537_v14, %v7536_v16 }
0x181d   :  { %v7545_v27 = vpop.permute.xlu1 %7544  ;;  %v7540_v28 = vpop.permute.xlu0 %7539 }
0x181e   :  { %v7547_v29 = vunpack.i.h.bf16 %v7545_v27  ;;  %v7546_v30 = vunpack.i.l.bf16 %v7545_v27  ;;  %v7542_v32 = vunpack.i.h.bf16 %v7540_v28  ;;  %v7541_v34 = vunpack.i.l.bf16 %v7540_v28  ;;  %7267 = vmatprep.subr.bf16.mxu0 %v7266_v23 }
0x181f   :  { %7269 = vmatpush3.bf16.msra.mxu0 %v7266_v23 }
0x1820   :  { %v7682_v37 = vpop.eup %7681  ;;  %v7290_v40 = vpack.c.bf16 %v7547_v29, %v7546_v30  ;;  %v7276_v41 = vpack.c.bf16 %v7542_v32, %v7541_v34 }
0x1821   :  { %v4077_v42 = vpop.permute.xlu1 %4076  ;;  %v3538_v35 = vmul.f32 %v7682_v37, %v7674_v24  ;;  %v4079_v45 = vpop.permute.xlu0 %4078 }
0x1822   :  { %6910 = vmatmul.mubr.msk.f32.vlgmr.msra.gmra.mrb[26].mxu0 %vm409_vm3, %v3335_v38  ;;  %7277 = vmatprep.subr.bf16.mxu0 %v7276_v41 }
0x1823   :  { %7292 = vmatprep.subr.msk.bf16.mxu1 %vm8342_vm2, %v7290_v40  ;;  %6959 = vmatprep.mubr.msk.f32.mxu1 %vm321_vm1, %v4077_v42 }
0x1824   :  { %v7684_v17 = vpop.eup %7683  ;;  %7279 = vmatpush3.bf16.msra.mxu0 %v7276_v41  ;;  %6923 = vmatprep.mubr.msk.f32.mxu0 %vm409_vm3, %v3538_v35  ;;  %v3218_v35 = vld [vmem:[#allocation8 + $0x38] sm:$0xff] }
0x1825   :  { %v3539_v44 = vmul.f32 %v7684_v17, %v7676_v63  ;;  %7295 = vmatpush3.bf16.xpose.msk.msra.mxu1 %vm8342_vm2, %v7290_v40  ;;  %6926 = vmatprep.subr.mxu0 %v3216_v56 }
0x1827   :  { %6924 = vmatmul.mubr.msk.f32.vlgmr.msra.gmra.mrb[28].mxu0 %vm409_vm3, %v3539_v44 }
0x1828   :  { %6927 = vmatpush3.msra.mxu0 %v3216_v56 }
0x1829   :  { %6931 = vmatprep.subr.mxu0 %v3215_v58 }
0x182c   :  { %6960 = vmatmul.mubr.msk.f32.vlgmr.msra.gmra.mrb[28].mxu1 %vm321_vm1, %v4079_v45 }
0x1852   :  { %v3886_v46 = vpop.xlane.xlu1 %3885  ;;  %v3889_v47 = vpop.xlane.xlu0 %3888 }
0x1853   :  { %v3890_v48 = vsub.f32 %v3882_v10, %v3886_v46  ;;  %v3891_v49 = vsub.f32 %v3883_v9, %v3889_v47 }
0x1855   :  { %v3892_v50 = vmul.f32 1.442695, %v3890_v48  ;;  %v3894_v51 = vmul.f32 1.442695, %v3891_v49  ;;  %v7747_v48 = vld [vmem:[#allocation5] sm:$0xff] }
0x1856   :  { %v6351_v49 = vld [vmem:[%s9089_s9 + $0x1] ss:$0 sm:$0xff] }
0x1857   :  { %7685 = vpow2.f32 %v3892_v50 }
0x1858   :  { %7687 = vpow2.f32 %v3894_v51 }
0x1861   :  { %v7686_v52 = vpop.eup %7685 }
0x1862   :  { %v7688_v53 = vpop.eup %7687  ;;  %v3896_v54 = vsel %vm409_vm3, %v7686_v52, 0.0 }
0x1863   :  { %3897 = vadd.xlane.f32.xlu0 %v3896_v54  ;;  %v3899_v55 = vsel %vm409_vm3, %v7688_v53, 0.0 }
0x1864   :  { %3900 = vadd.xlane.f32.xlu1 %v3899_v55 }
0x1879   :  { %7549 = vrot.lane.b32.xlu0 %v8674_v4, %s9093_s11 }
0x18f0   :  { %v3898_v59 = vpop.xlane.xlu0 %3897 }
0x18f1   :  { %v3901_v8 = vpop.xlane.xlu1 %3900  ;;  %7689 = vrcp.f32 %v3898_v59 }
0x18f2   :  { %7691 = vrcp.f32 %v3901_v8 }
0x18f4   :  { %v7550_v61 = vpop.permute.xlu0 %7549 }
0x18f5   :  { %v6911_v60 = vpop.f32.mrb[26].mxu0  ;;  %v7552_v11 = vunpack.i.h.bf16 %v7550_v61  ;;  %v7551_v2 = vunpack.i.l.bf16 %v7550_v61 }
0x18f6   :  { %v3414_v62 = vpop.f32.mrb[27].mxu0 }
0x18f7   :  { %v7286_v63 = vpack.c.bf16 %v7552_v11, %v7551_v2 }
0x18fa   :  { %v6925_v24 = vpop.f32.mrb[28].mxu0 }
0x18fb   :  { %v3618_v36 = vpop.f32.mrb[29].mxu0  ;;  %v7690_v10 = vpop.eup %7689 }
0x18fc   :  { %6928 = vmatprep.mubr.msk.f32.mxu0 %vm321_vm1, %v3618_v36  ;;  %v7692_v13 = vpop.eup %7691  ;;  %v3904_v3 = vmul.f32 %v7690_v10, %v7686_v52  ;;  %v7748_v10 = vld [vmem:[#allocation5 + $0x8] sm:$0xff] }
0x18fd   :  { %6929 = vmatmul.mubr.msk.f32.vlgmr.msra.gmra.mrb[30].mxu0 %vm321_vm1, %v6925_v24  ;;  %v3905_v19 = vmul.f32 %v7692_v13, %v7688_v53  ;;  %v4413_v13 = vld [vmem:[#allocation10 + $0x28] sm:$0xff] }
0x18fe   :  { %6932 = vmatpush3.msra.mxu0 %v3215_v58  ;;  %6933 = vmatprep.mubr.msk.f32.mxu0 %vm321_vm1, %v3414_v62 }
0x18ff   :  { %v6961_v5 = vpop.f32.mrb[28].mxu1  ;;  %7287 = vmatprep.subr.bf16.mxu0 %v7286_v63 }
0x1900   :  { %v4158_v6 = vpop.f32.mrb[29].mxu1  ;;  %v4168_v7 = vmul.f32 0.35355338, %v6961_v5 }
0x1901   :  { %v4167_v9 = vmul.f32 0.35355338, %v4158_v6  ;;  %v4508_v6 = vld [vmem:[#allocation11 + $0x30] sm:$0xff] }
0x1902   :  { %v4170_v18 = vadd.f32 %v8711_v31, %v4168_v7  ;;  %v4509_v7 = vld [vmem:[#allocation11 + $0x38] sm:$0xff] }
0x1903   :  { %v4169_v12 = vadd.f32 %v8717_v33, %v4167_v9  ;;  %v7312_v9 = vpack.c.bf16 %v4509_v7, %v4508_v6 }
0x1904   :  { %v4174_v26 = vsel %vm409_vm3, %v4170_v18, -inf }
0x1905   :  { %v4171_v15 = vsel %vm409_vm3, %v4169_v12, -inf  ;;  %6934 = vmatmul.mubr.msk.f32.vlgmr.msra.gmra.mrb[30].mxu0 %vm321_vm1, %v6911_v60 }
0x1906   :  { %4172 = vmax.xlane.f32.xlu1 %v4171_v15  ;;  %7289 = vmatpush3.bf16.msra.mxu0 %v7286_v63  ;;  %v4507_v63 = vld [vmem:[#allocation11 + $0x28] sm:$0xff] }
0x1907   :  { %6947 = vmatprep.mubr.msk.f32.mxu0 %vm409_vm3, %v3904_v3  ;;  %6950 = vmatprep.subr.mxu0 %v3217_v20  ;;  %v4414_v3 = vld [vmem:[#allocation10 + $0x30] sm:$0xff] }
0x1909   :  { %6948 = vmatmul.mubr.msk.f32.vlgmr.msra.gmra.mrb[32].mxu0 %vm409_vm3, %v3905_v19 }
0x190a   :  { %4175 = vmax.xlane.f32.xlu1 %v4174_v26  ;;  %6951 = vmatpush3.msra.mxu0 %v3217_v20 }
0x1993   :  { %v4173_v33 = vpop.xlane.xlu1 %4172 }
0x1994   :  { %v4177_v22 = vsub.f32 %v4169_v12, %v4173_v33  ;;  %v4412_v12 = vld [vmem:[#allocation10 + $0x20] sm:$0xff] }
0x1995   :  { %v7300_v15 = vpack.c.bf16 %v4413_v13, %v4412_v12 }
0x1996   :  { %v4179_v23 = vmul.f32 1.442695, %v4177_v22 }
0x1997   :  { %v4176_v14 = vpop.xlane.xlu1 %4175  ;;  %7301 = vmatprep.subr.bf16.mxu1 %v7300_v15 }
0x1998   :  { %v4178_v16 = vsub.f32 %v4170_v18, %v4176_v14  ;;  %7303 = vmatpush3.bf16.msra.mxu1 %v7300_v15  ;;  %v4415_v18 = vld [vmem:[#allocation10 + $0x38] sm:$0xff] }
0x1999   :  { %v7304_v19 = vpack.c.bf16 %v4415_v18, %v4414_v3 }
0x199a   :  { %v4181_v39 = vmul.f32 1.442695, %v4178_v16 }
0x199b   :  { %7305 = vmatprep.subr.bf16.mxu1 %v7304_v19 }
0x199c   :  { %7693 = vpow2.f32 %v4181_v39  ;;  %7307 = vmatpush3.bf16.msra.mxu1 %v7304_v19  ;;  %v8797_v39 = vld [vmem:[%s9043_s20 + $0x4] sm:$0x7] }
0x199d   :  { %7695 = vpow2.f32 %v4179_v23  ;;  %v8792_v23 = vld [vmem:[%s9042_s19 + $0x4] sm:$0x7] }
0x19a6   :  { %v7694_v31 = vpop.eup %7693 }
0x19a7   :  { %v4186_v27 = vsel %vm409_vm3, %v7694_v31, 0.0  ;;  %v7696_v28 = vpop.eup %7695 }
0x19a8   :  { %4187 = vadd.xlane.f32.xlu1 %v4186_v27  ;;  %v4183_v29 = vsel %vm409_vm3, %v7696_v28, 0.0 }
0x19ac   :  { %4184 = vadd.xlane.f32.xlu1 %v4183_v29  ;;  %v4408_v29 = vrot.slane %v8797_v39, %v8456_v25 }
0x19bd   :  { %7554 = vrot.lane.b32.xlu1 %v8674_v4, %s9094_s21 }
0x19dc   :  { %v6949_v30 = vpop.f32.mrb[32].mxu0 }
0x19dd   :  { %v3984_v32 = vpop.f32.mrb[33].mxu0 }
0x19de   :  { %6952 = vmatprep.mubr.msk.f32.mxu0 %vm321_vm1, %v3984_v32 }
0x19df   :  { %6953 = vmatmul.mubr.msk.f32.vlgmr.msra.gmra.mrb[30].mxu0 %vm321_vm1, %v6949_v30 }
0x1a35   :  { %v4188_v34 = vpop.xlane.xlu1 %4187 }
0x1a36   :  { %7697 = vrcp.f32 %v4188_v34 }
0x1a39   :  { %v4185_v37 = vpop.xlane.xlu1 %4184 }
0x1a3a   :  { %7699 = vrcp.f32 %v4185_v37 }
0x1a3d   :  { %v7555_v38 = vpop.permute.xlu1 %7554 }
0x1a3e   :  { %v7557_v40 = vunpack.i.h.bf16 %v7555_v38  ;;  %v7556_v41 = vunpack.i.l.bf16 %v7555_v38 }
0x1a40   :  { %v7296_v42 = vpack.c.bf16 %v7557_v40, %v7556_v41  ;;  %v7698_v17 = vpop.eup %7697  ;;  %v6357_v41 = vld [vmem:[%s9035_s12 + $0x1] ss:$0 sm:$0xff] }
0x1a41   :  { %v4192_v45 = vmul.f32 %v7698_v17, %v7694_v31  ;;  %v4402_v31 = vrot.slane %v8792_v23, %v8456_v25 }
0x1a42   :  { %7297 = vmatprep.subr.bf16.mxu0 %v7296_v42 }
0x1a43   :  { %7299 = vmatpush3.bf16.msra.mxu0 %v7296_v42 }
0x1a44   :  { %v7700_v44 = vpop.eup %7699  ;;  %6969 = vmatprep.subr.mxu0 %v3218_v35 }
0x1a45   :  { %v4191_v4 = vmul.f32 %v7700_v44, %v7696_v28 }
0x1a47   :  { %6966 = vmatprep.mubr.msk.f32.mxu0 %vm409_vm3, %v4191_v4 }
0x1a48   :  { %6967 = vmatmul.mubr.msk.f32.vlgmr.msra.gmra.mrb[34].mxu0 %vm409_vm3, %v4192_v45 }
0x1a49   :  { %6970 = vmatpush3.msra.mxu0 %v3218_v35 }
0x1b1b   :  { %v6968_v46 = vpop.f32.mrb[34].mxu0 }
0x1b1c   :  { %v4271_v47 = vpop.f32.mrb[35].mxu0 }
0x1b1d   :  { %6971 = vmatprep.mubr.msk.f32.mxu0 %vm321_vm1, %v4271_v47 }
0x1b1e   :  { %6972 = vmatmul.mubr.msk.f32.vlgmr.msra.gmra.mrb[30].mxu0 %vm321_vm1, %v6968_v46 }
0x1b1f   :  { %6993 = vmatprep.mubr.msk.f32.mxu0 %vm228_vm0, %v7747_v48 }
0x1bf1   :  { %v6973_v50 = vpop.f32.mrb[30].mxu0 }
0x1bf2   :  { %v4370_v51 = vadd.f32 %v6973_v50, %v6351_v49  ;;  %v4352_v52 = vpop.f32.mrb[31].mxu0 }
0x1bf3   :  { %v4369_v53 = vadd.f32 %v6351_v49, %v4352_v52  ;;  %v6353_v49 = vld [vmem:[%s9033_s10 + $0x1] ss:$0 sm:$0xff] }
0x1bf4   :  { %v4372_v54 = vadd.f32 %v4370_v51, %v8659_v43 }
0x1bf5   :  { %v4371_v55 = vadd.f32 %v4369_v53, %v8655_v1  ;;  %v4506_v1 = vld [vmem:[#allocation11 + $0x20] sm:$0xff] }
0x1bf6   :  { %v4376_v56 = vsel %vm228_vm0, %v4372_v54, 0.0  ;;  %v7308_v5 = vpack.c.bf16 %v4507_v63, %v4506_v1  ;;  %v8864_v1 = vld [vmem:[%s9090_s29] sm:$0xff] }
0x1bf7   :  { %4377 = vadd.xlane.f32.xlu1 %v4376_v56  ;;  %v4373_v58 = vsel %vm228_vm0, %v4371_v55, 0.0 }
0x1bf8   :  { %4374 = vadd.xlane.f32.xlu0 %v4373_v58  ;;  %7309 = vmatprep.subr.bf16.mxu0 %v7308_v5 }
0x1bf9   :  { %7311 = vmatpush3.bf16.msra.mxu0 %v7308_v5 }
0x1bfa   :  { %7313 = vmatprep.subr.bf16.mxu0 %v7312_v9 }
0x1bfd   :  { %7315 = vmatpush3.bf16.msra.mxu0 %v7312_v9 }
0x1c00   :  { %6994 = vmatmul.mubr.msk.f32.vlgmr.msra.gmra.mrb[36].mxu0 %vm228_vm0, %v7748_v10 }
0x1c84   :  { %v4378_v59 = vpop.xlane.xlu1 %4377 }
0x1c85   :  { %v4380_v60 = vmul.f32 0.03125, %v4378_v59  ;;  %v4375_v61 = vpop.xlane.xlu0 %4374 }
0x1c86   :  { %v4379_v62 = vmul.f32 0.03125, %v4375_v61 }
0x1c87   :  { %v4382_v8 = vsub.f32 %v4372_v54, %v4380_v60 }
0x1c88   :  { %v4381_v11 = vsub.f32 %v4371_v55, %v4379_v62 }
0x1c89   :  { %v4384_v36 = vmul.f32 %v4382_v8, %v4382_v8 }
0x1c8a   :  { %v4383_v2 = vmul.f32 %v4381_v11, %v4381_v11 }
0x1c8b   :  { %v4388_v43 = vsel %vm228_vm0, %v4384_v36, 0.0  ;;  %v8858_v36 = vld [vmem:[%s9090_s29 + $0x8] sm:$0xff]  ;;  %s8005_s29 = smov [#allocation17]  }
0x1c8c   :  { %v4385_v24 = vsel %vm228_vm0, %v4383_v2, 0.0  ;;  %s6215_s0 = sshll.u32 %s8005_s29, 4  ;;  %s6216_s0 = int_to_ptr.vmem [resolvable:$true] %s6215_s0 }
0x1c8d   :  { %4386 = vadd.xlane.f32.xlu0 %v4385_v24  ;;  %p7954_p3 = scmp.lt.s32.totalorder %s6216_s0, %s6216_s0 }
0x1c91   :  { %4389 = vadd.xlane.f32.xlu0 %v4388_v43 }
0x1cd3   :  { %v6995_v42 = vpop.f32.mrb[36].mxu0 }
0x1cd4   :  { %v4590_v25 = vadd.f32 %v6995_v42, %v6357_v41  ;;  %v4584_v35 = vpop.f32.mrb[37].mxu0 }
0x1cd5   :  { %v4585_v17 = vadd.f32 %v6357_v41, %v4584_v35 }
0x1cd7   :  { %v7316_v44 = vpack.c.bf16 %v4590_v25, %v4585_v17  ;;  %v8814_v4 = vpack.i.bf16 %v4590_v25, %v4585_v17 }
0x1cd9   :  { %7318 = vmatprep.subr.msk.bf16.mxu1 %vm8342_vm2, %v7316_v44  ;;  %7559 = vrot.lane.b32.xlu0 %v8814_v4, %s7994_s24 }
0x1d1a   :  { %v4387_v26 = vpop.xlane.xlu0 %4386 }
0x1d1b   :  { %v4391_v20 = vmul.f32 0.03125, %v4387_v26 }
0x1d1d   :  { %v4393_v33 = vadd.f32 1e-05, %v4391_v20 }
0x1d1e   :  { %v4390_v22 = vpop.xlane.xlu0 %4389 }
0x1d1f   :  { %7701 = vrsqrt.f32 %v4393_v33  ;;  %v4392_v14 = vmul.f32 0.03125, %v4390_v22 }
0x1d21   :  { %v4394_v16 = vadd.f32 1e-05, %v4392_v14 }
0x1d23   :  { %7703 = vrsqrt.f32 %v4394_v16 }
0x1d29   :  { %v7702_v27 = vpop.eup %7701 }
0x1d2a   :  { %v4397_v28 = vmul.f32 %v7702_v27, %v4381_v11 }
0x1d2c   :  { %v4403_v30 = vmul.f32 %v4402_v31, %v4397_v28 }
0x1d2d   :  { %v7704_v32 = vpop.eup %7703 }
0x1d2e   :  { %v4398_v34 = vmul.f32 %v7704_v32, %v4382_v8  ;;  %v8803_v37 = vadd.f32 %v4408_v29, %v4403_v30 }
0x1d30   :  { %v4404_v38 = vmul.f32 %v4402_v31, %v4398_v34  ;;  %6982 = vmatprep.mubr.msk.f32.mxu1 %vm228_vm0, %v8803_v37 }
0x1d32   :  { %v8807_v40 = vadd.f32 %v4408_v29, %v4404_v38 }
0x1d34   :  { %6983 = vmatmul.mubr.msk.f32.vlgmr.msra.gmra.mrb[30].mxu1 %vm228_vm0, %v8807_v40 }
0x1d35   :  { %7321 = vmatpush3.bf16.xpose.msk.msra.mxu1 %vm8342_vm2, %v7316_v44 }
0x1d4b   :  { %v7560_v45 = vpop.permute.xlu0 %7559 }
0x1d4c   :  { %v7562_v46 = vunpack.i.h.bf16 %v7560_v45  ;;  %v7561_v47 = vunpack.i.l.bf16 %v7560_v45 }
0x1d4e   :  { %v7326_v48 = vpack.c.bf16 %v7562_v46, %v7561_v47 }
0x1d50   :  { %7328 = vmatprep.subr.msk.bf16.mxu1 %vm8342_vm2, %v7326_v48 }
0x1e07   :  { %v6984_v50 = vpop.f32.mrb[30].mxu1 }
0x1e08   :  { %v8827_v51 = vadd.f32 %v6984_v50, %v6353_v49  ;;  %v4496_v52 = vpop.f32.mrb[31].mxu1 }
0x1e09   :  { %v8829_v53 = vadd.f32 %v6353_v49, %v4496_v52 }
0x1e0a   :  { %4802 = vrot.lane.b32.xlu0 %v8827_v51, %s7994_s24 }
0x1e0b   :  { %4800 = vrot.lane.b32.xlu1 %v8829_v53, %s7994_s24  ;;  %7000 = vmatprep.mubr.msk.f32.mxu1 %vm321_vm1, %v8829_v53 }
0x1e0c   :  { %7001 = vmatmul.mubr.msk.f32.vlgmr.msra.gmra.mrb[32].mxu1 %vm321_vm1, %v8827_v51 }
0x1e0d   :  { %7331 = vmatpush3.bf16.xpose.msk.msra.mxu1 %vm8342_vm2, %v7326_v48 }
0x1e0e   :  { %7564 = vrot.lane.b32.xlu0 %v8814_v4, %s7997_s28 }
0x1e0f   :  { %5166 = vrot.lane.b32.xlu1 %v8829_v53, %s7997_s28 }
0x1e12   :  { %5168 = vrot.lane.b32.xlu0 %v8827_v51, %s7997_s28 }
0x1e7c   :  { %v4803_v54 = vpop.permute.xlu0 %4802 }
0x1e7d   :  { %v4801_v55 = vpop.permute.xlu1 %4800 }
0x1e7e   :  { %7014 = vmatprep.mubr.msk.f32.mxu1 %vm321_vm1, %v4801_v55 }
0x1e7f   :  { %7015 = vmatmul.mubr.msk.f32.vlgmr.msra.gmra.mrb[34].mxu1 %vm321_vm1, %v4803_v54 }
0x1e80   :  { %v7565_v56 = vpop.permute.xlu0 %7564 }
0x1e81   :  { %v7567_v58 = vunpack.i.h.bf16 %v7565_v56  ;;  %v7566_v59 = vunpack.i.l.bf16 %v7565_v56  ;;  %v5167_v60 = vpop.permute.xlu1 %5166 }
0x1e82   :  { %7038 = vmatprep.mubr.msk.f32.mxu1 %vm321_vm1, %v5167_v60 }
0x1e83   :  { %v7336_v61 = vpack.c.bf16 %v7567_v58, %v7566_v59 }
0x1e84   :  { %v5169_v62 = vpop.permute.xlu0 %5168 }
0x1e85   :  { %7338 = vmatprep.subr.msk.bf16.mxu1 %vm8342_vm2, %v7336_v61 }
0x1e86   :  { %7341 = vmatpush3.bf16.xpose.msk.msra.mxu1 %vm8342_vm2, %v7336_v61 }
0x1e8d   :  { %7039 = vmatmul.mubr.msk.f32.vlgmr.msra.gmra.mrb[36].mxu1 %vm321_vm1, %v5169_v62 }
0x1edf   :  { %v7002_v8 = vpop.f32.mrb[32].mxu1 }
0x1ee0   :  { %v4688_v11 = vmul.f32 0.35355338, %v7002_v8  ;;  %v4678_v2 = vpop.f32.mrb[33].mxu1 }
0x1ee1   :  { %v4687_v24 = vmul.f32 0.35355338, %v4678_v2 }
0x1ee2   :  { %v4690_v43 = vadd.f32 %v8858_v36, %v4688_v11 }
0x1ee3   :  { %v4689_v63 = vadd.f32 %v8864_v1, %v4687_v24 }
0x1ee4   :  { %v4694_v5 = vsel %vm409_vm3, %v4690_v43, -inf }
0x1ee5   :  { %4695 = vmax.xlane.f32.xlu0 %v4694_v5  ;;  %v4691_v6 = vsel %vm409_vm3, %v4689_v63, -inf }
0x1ee6   :  { %4692 = vmax.xlane.f32.xlu1 %v4691_v6 }
0x1f52   :  { %v7016_v7 = vpop.f32.mrb[34].mxu1 }
0x1f53   :  { %v4892_v9 = vmul.f32 0.35355338, %v7016_v7  ;;  %v4882_v10 = vpop.f32.mrb[35].mxu1 }
0x1f54   :  { %v4891_v12 = vmul.f32 0.35355338, %v4882_v10 }
0x1f55   :  { %v4894_v13 = vadd.f32 %v8858_v36, %v4892_v9 }
0x1f56   :  { %v4893_v15 = vadd.f32 %v8864_v1, %v4891_v12 }
0x1f57   :  { %v4898_v3 = vsel %vm409_vm3, %v4894_v13, -inf }
0x1f58   :  { %4899 = vmax.xlane.f32.xlu1 %v4898_v3  ;;  %v4895_v18 = vsel %vm409_vm3, %v4893_v15, -inf }
0x1f59   :  { %4896 = vmax.xlane.f32.xlu0 %v4895_v18 }
0x1f60   :  { %v7040_v19 = vpop.f32.mrb[36].mxu1 }
0x1f61   :  { %v5248_v26 = vpop.f32.mrb[37].mxu1  ;;  %v5258_v50 = vmul.f32 0.35355338, %v7040_v19 }
0x1f62   :  { %v5257_v49 = vmul.f32 0.35355338, %v5248_v26 }
0x1f63   :  { %v5260_v54 = vadd.f32 %v8858_v36, %v5258_v50 }
0x1f64   :  { %v5259_v52 = vadd.f32 %v8864_v1, %v5257_v49 }
0x1f66   :  { %v5261_v55 = vsel %vm409_vm3, %v5259_v52, -inf }
0x1f72   :  { %v4696_v20 = vpop.xlane.xlu0 %4695 }
0x1f73   :  { %v4698_v33 = vsub.f32 %v4690_v43, %v4696_v20  ;;  %v4693_v22 = vpop.xlane.xlu1 %4692 }
0x1f74   :  { %v4697_v14 = vsub.f32 %v4689_v63, %v4693_v22 }
0x1f75   :  { %v4701_v16 = vmul.f32 1.442695, %v4698_v33 }
0x1f76   :  { %v4699_v31 = vmul.f32 1.442695, %v4697_v14 }
0x1f77   :  { %7705 = vpow2.f32 %v4701_v16 }
0x1f78   :  { %7707 = vpow2.f32 %v4699_v31 }
0x1f81   :  { %v8873_v27 = vpop.eup %7705 }
0x1f82   :  { %v7708_v28 = vpop.eup %7707  ;;  %v4706_v29 = vsel %vm409_vm3, %v8873_v27, 0.0 }
0x1f83   :  { %4707 = vadd.xlane.f32.xlu1 %v4706_v29  ;;  %v4703_v30 = vsel %vm409_vm3, %v7708_v28, 0.0  ;;  %v4594_v29 = vld [vmem:[#allocation13 + $0x20] sm:$0xff] }
0x1f84   :  { %4704 = vadd.xlane.f32.xlu0 %v4703_v30 }
0x1fe5   :  { %v4900_v32 = vpop.xlane.xlu1 %4899 }
0x1fe6   :  { %v4902_v34 = vsub.f32 %v4894_v13, %v4900_v32  ;;  %v4897_v38 = vpop.xlane.xlu0 %4896 }
0x1fe7   :  { %v4901_v41 = vsub.f32 %v4893_v15, %v4897_v38 }
0x1fe8   :  { %v4905_v42 = vmul.f32 1.442695, %v4902_v34 }
0x1fe9   :  { %v4903_v25 = vmul.f32 1.442695, %v4901_v41 }
0x1fea   :  { %7709 = vpow2.f32 %v4905_v42 }
0x1feb   :  { %7711 = vpow2.f32 %v4903_v25 }
0x1ff4   :  { %v7710_v35 = vpop.eup %7709 }
0x1ff5   :  { %v7712_v17 = vpop.eup %7711  ;;  %v4910_v44 = vsel %vm409_vm3, %v7710_v35, 0.0 }
0x1ff6   :  { %4911 = vadd.xlane.f32.xlu1 %v4910_v44  ;;  %v4907_v45 = vsel %vm409_vm3, %v7712_v17, 0.0 }
0x1ff7   :  { %4908 = vadd.xlane.f32.xlu0 %v4907_v45 }
0x2007   :  { %7574 = vrot.lane.b32.xlu1 %v8814_v4, %s7996_s1 }
0x200b   :  { %7579 = vrot.lane.b32.xlu1 %v8814_v4, %s9091_s25 }
0x200d   :  { %7569 = vrot.lane.b32.xlu0 %v8814_v4, %s7995_s7 }
0x200f   :  { %5455 = vrot.lane.b32.xlu1 %v8827_v51, %s9091_s25  ;;  %v5264_v51 = vsel %vm409_vm3, %v5260_v54, -inf }
0x2011   :  { %5453 = vrot.lane.b32.xlu0 %v8829_v53, %s9091_s25  ;;  %v4705_v46 = vpop.xlane.xlu0 %4704  ;;  %v4708_v53 = vpop.xlane.xlu1 %4707 }
0x2012   :  { %7713 = vrcp.f32 %v4705_v46 }
0x2013   :  { %7715 = vrcp.f32 %v4708_v53 }
0x201c   :  { %v7714_v47 = vpop.eup %7713 }
0x201d   :  { %v4711_v48 = vmul.f32 %v7714_v47, %v7708_v28  ;;  %v7716_v43 = vpop.eup %7715  ;;  %v4595_v28 = vld [vmem:[#allocation13 + $0x28] sm:$0xff] }
0x201e   :  { %v4712_v12 = vmul.f32 %v7716_v43, %v8873_v27 }
0x201f   :  { %7007 = vmatprep.mubr.msk.f32.mxu0 %vm409_vm3, %v4711_v48 }
0x2030   :  { %5262 = vmax.xlane.f32.xlu0 %v5261_v55 }
0x2033   :  { %5265 = vmax.xlane.f32.xlu1 %v5264_v51 }
0x2044   :  { %7584 = vrot.lane.b32.xlu1 %v8814_v4, %s7998_s8 }
0x2083   :  { %v4912_v56 = vpop.xlane.xlu1 %4911 }
0x2084   :  { %v4909_v58 = vpop.xlane.xlu0 %4908 }
0x2085   :  { %7717 = vrcp.f32 %v4909_v58  ;;  %v4596_v58 = vld [vmem:[#allocation13 + $0x30] sm:$0xff] }
0x2086   :  { %7719 = vrcp.f32 %v4912_v56 }
0x2087   :  { %v7575_v59 = vpop.permute.xlu1 %7574 }
0x2088   :  { %v7570_v60 = vpop.permute.xlu0 %7569  ;;  %v7577_v61 = vunpack.i.h.bf16 %v7575_v59  ;;  %v7576_v62 = vunpack.i.l.bf16 %v7575_v59 }
0x2089   :  { %v7572_v8 = vunpack.i.h.bf16 %v7570_v60  ;;  %v7571_v11 = vunpack.i.l.bf16 %v7570_v60 }
0x208a   :  { %v7332_v7 = vpack.c.bf16 %v7577_v61, %v7576_v62 }
0x208b   :  { %v7322_v2 = vpack.c.bf16 %v7572_v8, %v7571_v11  ;;  %v7580_v24 = vpop.permute.xlu1 %7579 }
0x208c   :  { %v7582_v63 = vunpack.i.h.bf16 %v7580_v24  ;;  %v7581_v5 = vunpack.i.l.bf16 %v7580_v24  ;;  %v5454_v6 = vpop.permute.xlu0 %5453 }
0x208d   :  { %7323 = vmatprep.subr.bf16.mxu0 %v7322_v2  ;;  %7057 = vmatprep.mubr.msk.f32.mxu1 %vm321_vm1, %v5454_v6 }
0x208e   :  { %v7346_v9 = vpack.c.bf16 %v7582_v63, %v7581_v5  ;;  %7325 = vmatpush3.bf16.msra.mxu0 %v7322_v2 }
0x208f   :  { %v7718_v10 = vpop.eup %7717  ;;  %7333 = vmatprep.subr.bf16.mxu0 %v7332_v7  ;;  %v5456_v18 = vpop.permute.xlu1 %5455 }
0x2090   :  { %v7720_v13 = vpop.eup %7719  ;;  %7348 = vmatprep.subr.msk.bf16.mxu1 %vm8342_vm2, %v7346_v9  ;;  %v4915_v15 = vmul.f32 %v7718_v10, %v7712_v17 }
0x2091   :  { %7008 = vmatmul.mubr.msk.f32.vlgmr.msra.gmra.mrb[38].mxu0 %vm409_vm3, %v4712_v12  ;;  %7351 = vmatpush3.bf16.xpose.msk.msra.mxu1 %vm8342_vm2, %v7346_v9  ;;  %v4916_v3 = vmul.f32 %v7720_v13, %v7710_v35  ;;  %v4597_v13 = vld [vmem:[#allocation13 + $0x38] sm:$0xff] }
0x2092   :  { %7335 = vmatpush3.bf16.msra.mxu0 %v7332_v7  ;;  %7021 = vmatprep.mubr.msk.f32.mxu0 %vm409_vm3, %v4915_v15 }
0x2093   :  { %7024 = vmatprep.subr.mxu0 %v4595_v28 }
0x2095   :  { %7022 = vmatmul.mubr.msk.f32.vlgmr.msra.gmra.mrb[40].mxu0 %vm409_vm3, %v4916_v3 }
0x2096   :  { %7025 = vmatpush3.msra.mxu0 %v4595_v28 }
0x2097   :  { %7029 = vmatprep.subr.mxu0 %v4594_v29 }
0x2098   :  { %7058 = vmatmul.mubr.msk.f32.vlgmr.msra.gmra.mrb[38].mxu1 %vm321_vm1, %v5456_v18 }
0x20bd   :  { %v5263_v19 = vpop.xlane.xlu0 %5262 }
0x20be   :  { %v5267_v26 = vsub.f32 %v5259_v52, %v5263_v19 }
0x20c0   :  { %v5269_v20 = vmul.f32 1.442695, %v5267_v26  ;;  %v5266_v33 = vpop.xlane.xlu1 %5265 }
0x20c1   :  { %v5268_v22 = vsub.f32 %v5260_v54, %v5266_v33 }
0x20c2   :  { %7721 = vpow2.f32 %v5269_v20  ;;  %v6393_v20 = vld [vmem:[%s9037_s14 + $0x1] ss:$0 sm:$0xff] }
0x20c3   :  { %v5271_v14 = vmul.f32 1.442695, %v5268_v22 }
0x20c4   :  { %v7585_v32 = vpop.permute.xlu1 %7584 }
0x20c5   :  { %7723 = vpow2.f32 %v5271_v14  ;;  %v7587_v42 = vunpack.i.h.bf16 %v7585_v32  ;;  %v7586_v25 = vunpack.i.l.bf16 %v7585_v32 }
0x20c7   :  { %v7342_v44 = vpack.c.bf16 %v7587_v42, %v7586_v25 }
0x20cc   :  { %v7722_v16 = vpop.eup %7721 }
0x20cd   :  { %v5273_v21 = vsel %vm409_vm3, %v7722_v16, 0.0 }
0x20ce   :  { %5274 = vadd.xlane.f32.xlu0 %v5273_v21 }
0x20cf   :  { %v7724_v31 = vpop.eup %7723 }
0x20d0   :  { %v5276_v27 = vsel %vm409_vm3, %v7724_v31, 0.0 }
0x20d2   :  { %5277 = vadd.xlane.f32.xlu0 %v5276_v27 }
0x215b   :  { %v5275_v30 = vpop.xlane.xlu0 %5274 }
0x215c   :  { %7725 = vrcp.f32 %v5275_v30 }
0x215f   :  { %v5278_v38 = vpop.xlane.xlu0 %5277 }
0x2160   :  { %7727 = vrcp.f32 %v5278_v38 }
0x2164   :  { %v7009_v34 = vpop.f32.mrb[38].mxu0 }
0x2165   :  { %v4791_v41 = vpop.f32.mrb[39].mxu0 }
0x2166   :  { %v7726_v49 = vpop.eup %7725 }
0x2167   :  { %v5281_v51 = vmul.f32 %v7726_v49, %v7722_v16  ;;  %v6399_v49 = vld [vmem:[%s9040_s17 + $0x48] sm:$0xff] }
0x2168   :  { %v7023_v35 = vpop.f32.mrb[40].mxu0 }
0x2169   :  { %v4995_v17 = vpop.f32.mrb[41].mxu0 }
0x216a   :  { %7026 = vmatprep.mubr.msk.f32.mxu0 %vm321_vm1, %v4995_v17  ;;  %v7728_v55 = vpop.eup %7727  ;;  %v5790_v17 = vld [vmem:[#allocation14 + $0x28] sm:$0xff] }
0x216b   :  { %7027 = vmatmul.mubr.msk.f32.vlgmr.msra.gmra.mrb[42].mxu0 %vm321_vm1, %v7023_v35  ;;  %v7059_v45 = vpop.f32.mrb[38].mxu1  ;;  %v5282_v53 = vmul.f32 %v7728_v55, %v7724_v31 }
0x216c   :  { %7030 = vmatpush3.msra.mxu0 %v4594_v29  ;;  %7031 = vmatprep.mubr.msk.f32.mxu0 %vm321_vm1, %v4791_v41  ;;  %v5535_v46 = vpop.f32.mrb[39].mxu1  ;;  %v5545_v47 = vmul.f32 0.35355338, %v7059_v45  ;;  %v5791_v45 = vld [vmem:[#allocation14 + $0x30] sm:$0xff] }
0x216d   :  { %7343 = vmatprep.subr.bf16.mxu0 %v7342_v44  ;;  %v5544_v48 = vmul.f32 0.35355338, %v5535_v46  ;;  %v5792_v46 = vld [vmem:[#allocation14 + $0x38] sm:$0xff] }
0x216e   :  { %v5547_v52 = vadd.f32 %v8858_v36, %v5545_v47  ;;  %v7360_v47 = vpack.c.bf16 %v5792_v46, %v5791_v45  ;;  %v6025_v45 = vld [vmem:[#allocation16 + $0x18] sm:$0xff] }
0x216f   :  { %v5546_v50 = vadd.f32 %v8864_v1, %v5544_v48  ;;  %v6398_v48 = vld [vmem:[%s9040_s17 + $0x40] sm:$0xff] }
0x2170   :  { %v5551_v56 = vsel %vm409_vm3, %v5547_v52, -inf }
0x2171   :  { %v5548_v54 = vsel %vm409_vm3, %v5546_v50, -inf }
0x2172   :  { %5549 = vmax.xlane.f32.xlu0 %v5548_v54  ;;  %v6401_v54 = vld [vmem:[%s9040_s17 + $0x58] sm:$0xff] }
0x2173   :  { %7032 = vmatmul.mubr.msk.f32.vlgmr.msra.gmra.mrb[42].mxu0 %vm321_vm1, %v7009_v34 }
0x2174   :  { %7345 = vmatpush3.bf16.msra.mxu0 %v7342_v44  ;;  %7045 = vmatprep.mubr.msk.f32.mxu0 %vm409_vm3, %v5281_v51  ;;  %v6402_v51 = vld [vmem:[%s9040_s17 + $0x60] sm:$0xff] }
0x2175   :  { %7048 = vmatprep.subr.mxu0 %v4596_v58 }
0x2176   :  { %5552 = vmax.xlane.f32.xlu0 %v5551_v56 }
0x2177   :  { %7046 = vmatmul.mubr.msk.f32.vlgmr.msra.gmra.mrb[44].mxu0 %vm409_vm3, %v5282_v53  ;;  %v6403_v53 = vld [vmem:[%s9040_s17 + $0x68] sm:$0xff] }
0x2178   :  { %7049 = vmatpush3.msra.mxu0 %v4596_v58  ;;  %v7372_v56 = vpack.c.bf16 %v6403_v53, %v6402_v51 }
0x21ff   :  { %v5550_v36 = vpop.xlane.xlu0 %5549 }
0x2200   :  { %v5554_v1 = vsub.f32 %v5546_v50, %v5550_v36  ;;  %v6400_v50 = vld [vmem:[%s9040_s17 + $0x50] sm:$0xff] }
0x2201   :  { %v7368_v55 = vpack.c.bf16 %v6401_v54, %v6400_v50 }
0x2202   :  { %v5556_v61 = vmul.f32 1.442695, %v5554_v1 }
0x2203   :  { %v5553_v59 = vpop.xlane.xlu0 %5552 }
0x2204   :  { %v5555_v60 = vsub.f32 %v5547_v52, %v5553_v59  ;;  %v7364_v52 = vpack.c.bf16 %v6399_v49, %v6398_v48  ;;  %v6117_v48 = vld [vmem:[%s9046_s23 + $0x8] sm:$0xff] }
0x2206   :  { %v5558_v62 = vmul.f32 1.442695, %v5555_v60 }
0x2208   :  { %7729 = vpow2.f32 %v5558_v62  ;;  %v5779_v62 = vrot.slane %v8792_v23, %v8622_v0 }
0x2209   :  { %7731 = vpow2.f32 %v5556_v61 }
0x2212   :  { %v7730_v8 = vpop.eup %7729 }
0x2213   :  { %v5563_v11 = vsel %vm409_vm3, %v7730_v8, 0.0  ;;  %v7732_v2 = vpop.eup %7731 }
0x2214   :  { %5564 = vadd.xlane.f32.xlu0 %v5563_v11  ;;  %v5560_v24 = vsel %vm409_vm3, %v7732_v2, 0.0 }
0x2218   :  { %5561 = vadd.xlane.f32.xlu0 %v5560_v24 }
0x222e   :  { %7589 = vrot.lane.b32.xlu0 %v8814_v4, %s8000_s4 }
0x224a   :  { %v7047_v43 = vpop.f32.mrb[44].mxu0 }
0x224b   :  { %v5361_v63 = vpop.f32.mrb[45].mxu0 }
0x224c   :  { %7050 = vmatprep.mubr.msk.f32.mxu0 %vm321_vm1, %v5361_v63 }
0x224d   :  { %7051 = vmatmul.mubr.msk.f32.vlgmr.msra.gmra.mrb[42].mxu0 %vm321_vm1, %v7047_v43 }
0x22a1   :  { %v5565_v5 = vpop.xlane.xlu0 %5564 }
0x22a2   :  { %7733 = vrcp.f32 %v5565_v5 }
0x22a5   :  { %v5562_v6 = vpop.xlane.xlu0 %5561 }
0x22a6   :  { %7735 = vrcp.f32 %v5562_v6 }
0x22a9   :  { %v7590_v7 = vpop.permute.xlu0 %7589 }
0x22aa   :  { %v7592_v9 = vunpack.i.h.bf16 %v7590_v7  ;;  %v7591_v10 = vunpack.i.l.bf16 %v7590_v7 }
0x22ac   :  { %v7352_v12 = vpack.c.bf16 %v7592_v9, %v7591_v10  ;;  %v7734_v15 = vpop.eup %7733  ;;  %v6404_v9 = vld [vmem:[%s9040_s17 + $0x70] sm:$0xff]  ;;  %v6405_v10 = vld [vmem:[%s9040_s17 + $0x78] sm:$0xff] }
0x22ad   :  { %v5569_v18 = vmul.f32 %v7734_v15, %v7730_v8 }
0x22ae   :  { %7353 = vmatprep.subr.bf16.mxu0 %v7352_v12 }
0x22af   :  { %7355 = vmatpush3.bf16.msra.mxu0 %v7352_v12  ;;  %v7376_v12 = vpack.c.bf16 %v6405_v10, %v6404_v9 }
0x22b0   :  { %v7736_v3 = vpop.eup %7735  ;;  %7067 = vmatprep.subr.mxu0 %v4597_v13 }
0x22b1   :  { %v5568_v4 = vmul.f32 %v7736_v3, %v7732_v2  ;;  %v5785_v2 = vrot.slane %v8797_v39, %v8622_v0  ;;  %v6395_v0 = vld [vmem:[%s9039_s16 + $0x1] ss:$0 sm:$0xff] }
0x22b3   :  { %7064 = vmatprep.mubr.msk.f32.mxu0 %vm409_vm3, %v5568_v4 }
0x22b4   :  { %7065 = vmatmul.mubr.msk.f32.vlgmr.msra.gmra.mrb[46].mxu0 %vm409_vm3, %v5569_v18 }
0x22b5   :  { %7068 = vmatpush3.msra.mxu0 %v4597_v13 }
0x22b6   :  { %7365 = vmatprep.subr.bf16.mxu0 %v7364_v52 }
0x2387   :  { %v7066_v19 = vpop.f32.mrb[46].mxu0 }
0x2388   :  { %v5648_v26 = vpop.f32.mrb[47].mxu0 }
0x2389   :  { %7069 = vmatprep.mubr.msk.f32.mxu0 %vm321_vm1, %v5648_v26  ;;  %v6407_v26 = vld [vmem:[%s9041_s18 + $0x1] ss:$0 sm:$0xff] }
0x238a   :  { %7070 = vmatmul.mubr.msk.f32.vlgmr.msra.gmra.mrb[42].mxu0 %vm321_vm1, %v7066_v19 }
0x238b   :  { %7367 = vmatpush3.bf16.msra.mxu0 %v7364_v52 }
0x238c   :  { %7369 = vmatprep.subr.bf16.mxu0 %v7368_v55 }
0x238f   :  { %7371 = vmatpush3.bf16.msra.mxu0 %v7368_v55 }
0x2390   :  { %7373 = vmatprep.subr.bf16.mxu0 %v7372_v56 }
0x2393   :  { %7375 = vmatpush3.bf16.msra.mxu0 %v7372_v56  ;;  %v6013_v56 = vrot.slane %v8792_v23, %v8649_v57  ;;  %v6118_v23 = vld [vmem:[%s9046_s23 + $0x10] sm:$0xff] }
0x2394   :  { %7377 = vmatprep.subr.bf16.mxu0 %v7376_v12 }
0x2397   :  { %7379 = vmatpush3.bf16.msra.mxu0 %v7376_v12 }
0x245d   :  { %v7071_v33 = vpop.f32.mrb[42].mxu0 }
0x245e   :  { %v5747_v22 = vadd.f32 %v7071_v33, %v6393_v20  ;;  %v5729_v14 = vpop.f32.mrb[43].mxu0 }
0x245f   :  { %v5746_v16 = vadd.f32 %v6393_v20, %v5729_v14 }
0x2460   :  { %v5749_v21 = vadd.f32 %v5747_v22, %v8807_v40 }
0x2461   :  { %v5748_v31 = vadd.f32 %v5746_v16, %v8803_v37  ;;  %v5789_v37 = vld [vmem:[#allocation14 + $0x20] sm:$0xff] }
0x2462   :  { %v5753_v27 = vsel %vm228_vm0, %v5749_v21, 0.0  ;;  %v7356_v44 = vpack.c.bf16 %v5790_v17, %v5789_v37  ;;  %v6023_v37 = vld [vmem:[#allocation16 + $0x8] sm:$0xff] }
0x2463   :  { %5754 = vadd.xlane.f32.xlu0 %v5753_v27  ;;  %v5750_v28 = vsel %vm228_vm0, %v5748_v31, 0.0 }
0x2464   :  { %5751 = vadd.xlane.f32.xlu1 %v5750_v28  ;;  %7357 = vmatprep.subr.bf16.mxu1 %v7356_v44 }
0x2465   :  { %7359 = vmatpush3.bf16.msra.mxu1 %v7356_v44  ;;  %v6024_v44 = vld [vmem:[#allocation16 + $0x10] sm:$0xff] }
0x2466   :  { %7361 = vmatprep.subr.bf16.mxu1 %v7360_v47  ;;  %v7384_v46 = vpack.c.bf16 %v6025_v45, %v6024_v44 }
0x2469   :  { %7363 = vmatpush3.bf16.msra.mxu1 %v7360_v47  ;;  %v6116_v47 = vld [vmem:[%s9046_s23] sm:$0xff] }
0x246a   :  { %v7388_v49 = vpack.c.bf16 %v6117_v48, %v6116_v47 }
0x24f0   :  { %v5755_v29 = vpop.xlane.xlu0 %5754 }
0x24f1   :  { %v5757_v30 = vmul.f32 0.03125, %v5755_v29  ;;  %v5752_v32 = vpop.xlane.xlu1 %5751 }
0x24f2   :  { %v5756_v34 = vmul.f32 0.03125, %v5752_v32 }
0x24f3   :  { %v5759_v38 = vsub.f32 %v5749_v21, %v5757_v30 }
0x24f4   :  { %v5758_v41 = vsub.f32 %v5748_v31, %v5756_v34 }
0x24f5   :  { %v5761_v35 = vmul.f32 %v5759_v38, %v5759_v38 }
0x24f6   :  { %v5760_v42 = vmul.f32 %v5758_v41, %v5758_v41 }
0x24f7   :  { %v5765_v40 = vsel %vm228_vm0, %v5761_v35, 0.0 }
0x24f8   :  { %v5762_v25 = vsel %vm228_vm0, %v5760_v42, 0.0 }
0x24f9   :  { %5763 = vadd.xlane.f32.xlu1 %v5762_v25 }
0x24fd   :  { %5766 = vadd.xlane.f32.xlu1 %v5765_v40  ;;  %v6022_v40 = vld [vmem:[#allocation16] sm:$0xff] }
0x24fe   :  { %v7380_v17 = vpack.c.bf16 %v6023_v37, %v6022_v40 }
0x2500   :  { %7381 = vmatprep.subr.bf16.mxu1 %v7380_v17 }
0x2586   :  { %v5764_v58 = vpop.xlane.xlu1 %5763 }
0x2587   :  { %v5768_v36 = vmul.f32 0.03125, %v5764_v58 }
0x2589   :  { %v5770_v1 = vadd.f32 1e-05, %v5768_v36 }
0x258a   :  { %v5767_v59 = vpop.xlane.xlu1 %5766 }
0x258b   :  { %7737 = vrsqrt.f32 %v5770_v1  ;;  %v5769_v60 = vmul.f32 0.03125, %v5767_v59  ;;  %v6019_v1 = vrot.slane %v8797_v39, %v8649_v57  ;;  %v6410_v39 = vld [vmem:[%s9045_s22] ss:$0 sm:$0xff]  ;;  %s7949_s22 = scalar_lea.vmem %s6216_s0, 256 }
0x258c   :  { %p7950_p2 = scmp.ne.s32.totalorder %s6216_s0, %s7949_s22  ;;  %p7955_p4 = scmp.lt.s32.totalorder %s7949_s22, %s7949_s22 }
0x258d   :  { %v5771_v61 = vadd.f32 1e-05, %v5769_v60 }
0x258e   :  { %p7956_p5 = por %p7955_p4, %p7954_p3 }
0x258f   :  { %7739 = vrsqrt.f32 %v5771_v61 }
0x2590   :  { %p7957_p6 = pnand %p7956_p5, %p7950_p2 }
0x2595   :  { %v7738_v8 = vpop.eup %7737 }
0x2596   :  { %v5774_v11 = vmul.f32 %v7738_v8, %v5758_v41 }
0x2598   :  { %v5780_v24 = vmul.f32 %v5779_v62, %v5774_v11 }
0x2599   :  { %v7740_v43 = vpop.eup %7739 }
0x259a   :  { %v5775_v63 = vmul.f32 %v7740_v43, %v5759_v38  ;;  %v5786_v5 = vadd.f32 %v5785_v2, %v5780_v24 }
0x259c   :  { %v5781_v6 = vmul.f32 %v5779_v62, %v5775_v63  ;;  %7080 = vmatprep.mubr.msk.f32.mxu1 %vm228_vm0, %v5786_v5 }
0x259e   :  { %v5787_v7 = vadd.f32 %v5785_v2, %v5781_v6  ;;  %v6119_v2 = vld [vmem:[%s9046_s23 + $0x18] sm:$0xff]  ;;  %s9095_s23 = sld [smem:[#allocation34_spill]] }
0x259f   :  { %v7392_v57 = vpack.c.bf16 %v6119_v2, %v6118_v23 }
0x25a0   :  { %7081 = vmatmul.mubr.msk.f32.vlgmr.msra.gmra.mrb[40].mxu1 %vm228_vm0, %v5787_v7 }
0x25a1   :  { %7383 = vmatpush3.bf16.msra.mxu1 %v7380_v17 }
0x25a2   :  { %7385 = vmatprep.subr.bf16.mxu1 %v7384_v46 }
0x25a4   :  { %v6413_v9 = vld [vmem:[%s9095_s23] ss:$0 sm:$0xff] }
0x25a5   :  { %7387 = vmatpush3.bf16.msra.mxu1 %v7384_v46 }
0x25a6   :  { %7389 = vmatprep.subr.bf16.mxu1 %v7388_v49 }
0x2673   :  { %v7082_v13 = vpop.f32.mrb[40].mxu1 }
0x2674   :  { %v5879_v15 = vadd.f32 %v7082_v13, %v6395_v0  ;;  %v5873_v3 = vpop.f32.mrb[41].mxu1 }
0x2675   :  { %v5874_v4 = vadd.f32 %v6395_v0, %v5873_v3 }
0x2676   :  { %v5883_v19 = vmax.f32 %v5879_v15, 0.0 }
0x2677   :  { %v5882_v18 = vmax.f32 %v5874_v4, 0.0 }
0x2679   :  { %7099 = vmatprep.mubr.msk.f32.mxu0 %vm2994_vm4, %v5882_v18 }
0x267a   :  { %7100 = vmatmul.mubr.msk.f32.vlgmr.msra.gmra.mrb[48].mxu0 %vm2994_vm4, %v5883_v19 }
0x274d   :  { %v7101_v20 = vpop.f32.mrb[48].mxu0 }
0x274e   :  { %v5973_v33 = vpop.f32.mrb[49].mxu0  ;;  %v5979_v22 = vadd.f32 %v7101_v20, %v6407_v26 }
0x274f   :  { %v5974_v14 = vadd.f32 %v6407_v26, %v5973_v33 }
0x2750   :  { %v5983_v21 = vadd.f32 %v5979_v22, %v5787_v7 }
0x2751   :  { %v5982_v16 = vadd.f32 %v5974_v14, %v5786_v5 }
0x2752   :  { %v5987_v27 = vsel %vm228_vm0, %v5983_v21, 0.0 }
0x2753   :  { %v5984_v31 = vsel %vm228_vm0, %v5982_v16, 0.0 }
0x2754   :  { %5985 = vadd.xlane.f32.xlu1 %v5984_v31 }
0x2758   :  { %5988 = vadd.xlane.f32.xlu1 %v5987_v27 }
0x27e1   :  { %v5986_v28 = vpop.xlane.xlu1 %5985 }
0x27e2   :  { %v5990_v29 = vmul.f32 0.03125, %v5986_v28 }
0x27e4   :  { %v5992_v30 = vsub.f32 %v5982_v16, %v5990_v29 }
0x27e5   :  { %v5989_v32 = vpop.xlane.xlu1 %5988 }
0x27e6   :  { %v5991_v34 = vmul.f32 0.03125, %v5989_v32  ;;  %v5994_v38 = vmul.f32 %v5992_v30, %v5992_v30 }
0x27e8   :  { %v5993_v41 = vsub.f32 %v5983_v21, %v5991_v34  ;;  %v5996_v42 = vsel %vm228_vm0, %v5994_v38, 0.0 }
0x27e9   :  { %5997 = vadd.xlane.f32.xlu1 %v5996_v42 }
0x27ea   :  { %v5995_v25 = vmul.f32 %v5993_v41, %v5993_v41 }
0x27ec   :  { %v5999_v35 = vsel %vm228_vm0, %v5995_v25, 0.0 }
0x27ed   :  { %6000 = vadd.xlane.f32.xlu0 %v5999_v35 }
0x2876   :  { %v5998_v50 = vpop.xlane.xlu1 %5997 }
0x2877   :  { %v6002_v52 = vmul.f32 0.03125, %v5998_v50 }
0x2879   :  { %v6004_v54 = vadd.f32 1e-05, %v6002_v52 }
0x287a   :  { %v6001_v55 = vpop.xlane.xlu0 %6000 }
0x287b   :  { %7741 = vrsqrt.f32 %v6004_v54  ;;  %v6003_v51 = vmul.f32 0.03125, %v6001_v55 }
0x287d   :  { %v6005_v53 = vadd.f32 1e-05, %v6003_v51 }
0x287f   :  { %7743 = vrsqrt.f32 %v6005_v53 }
0x2885   :  { %v7742_v58 = vpop.eup %7741 }
0x2886   :  { %v6008_v36 = vmul.f32 %v7742_v58, %v5992_v30 }
0x2888   :  { %v6014_v59 = vmul.f32 %v6013_v56, %v6008_v36 }
0x2889   :  { %v7744_v60 = vpop.eup %7743 }
0x288a   :  { %v6009_v61 = vmul.f32 %v7744_v60, %v5993_v41  ;;  %v6020_v62 = vadd.f32 %v6019_v1, %v6014_v59 }
0x288c   :  { %v6015_v8 = vmul.f32 %v6013_v56, %v6009_v61  ;;  %7110 = vmatprep.mubr.msk.f32.mxu1 %vm228_vm0, %v6020_v62 }
0x288e   :  { %v6021_v11 = vadd.f32 %v6019_v1, %v6015_v8 }
0x2890   :  { %7111 = vmatmul.mubr.msk.f32.vlgmr.msra.gmra.mrb[42].mxu1 %vm228_vm0, %v6021_v11 }
0x2891   :  { %7391 = vmatpush3.bf16.msra.mxu1 %v7388_v49 }
0x2892   :  { %7393 = vmatprep.subr.bf16.mxu1 %v7392_v57 }
0x2895   :  { %7395 = vmatpush3.bf16.msra.mxu1 %v7392_v57 }
0x2963   :  { %v7112_v24 = vpop.f32.mrb[42].mxu1 }
0x2964   :  { %v6111_v43 = vadd.f32 %v7112_v24, %v6410_v39  ;;  %v6105_v63 = vpop.f32.mrb[43].mxu1 }
0x2965   :  { %v6106_v5 = vadd.f32 %v6410_v39, %v6105_v63 }
0x2966   :  { %v6115_v7 = vmax.f32 %v6111_v43, 0.0 }
0x2967   :  { %v6114_v6 = vmax.f32 %v6106_v5, 0.0 }
0x2969   :  { %7121 = vmatprep.mubr.msk.f32.mxu1 %vm228_vm0, %v6114_v6 }
0x296a   :  { %7122 = vmatmul.mubr.msk.f32.vlgmr.msra.gmra.mrb[44].mxu1 %vm228_vm0, %v6115_v7 }
0x2a3d   :  { %v7123_v10 = vpop.f32.mrb[44].mxu1 }
0x2a3e   :  { %v6205_v12 = vadd.f32 %v7123_v10, %v6413_v9  ;;  %v6199_v0 = vpop.f32.mrb[45].mxu1 }
0x2a3f   :  { %v6200_v13 = vadd.f32 %v6413_v9, %v6199_v0 }
0x2a40   :  { %6209 = vst.msk [vmem:[#allocation17 + $0x8] sm:$0xff] %vm409_vm3, %v6205_v12 }
0x2a41   :  { %6208 = vst.msk [vmem:[#allocation17] sm:$0xff] %vm409_vm3, %v6200_v13 }
0x2a42   :  { %7960 = shalt.err (!%p7957_p6)
}
0x2a43   :  { %s9096_s30 = sld [smem:[#allocation35_spill]] }
0x2a49   :  { %s7961_s11 = scalar_lea.hbm %s9096_s30, 256 }
0x2a4a   :  { %p7962_p7 = scmp.ne.s32.totalorder %s9096_s30, %s7961_s11  ;;  %p7965_p8 = scmp.lt.u32.totalorder %s7961_s11, %s9096_s30 }
0x2a4c   :  { %p7967_p9 = pnand %p7965_p8, %p7962_p7 }
0x2a4e   :  { %7970 = shalt.err (!%p7967_p9)
}
0x2a4f   :  { %s9097_s6 = smov 8   ;;  %s9098_s15 = smov 128  }
0x2a50   :  { %6221 = dma.vmem_to_hbm [thread:$0]  %s6216_s0, 256, %s9096_s30, [#allocation4], %s9098_s15, %s9098_s15, %s9097_s6  }
0x2a51   :  { %7981 = dma.done.wait [#allocation4], 256  }
0x2a52   :  { %7982 = vsyncadd [#allocation4], 4294967040 }
0x2a53   :  { %6225 = vsyncpa [#allocation3], 1 }
0x2a54   :  { %6226 = vsyncpa [#allocation6], 1 }
0x2a55   :  { %6227 = vsyncpa [#allocation9], 1 }
0x2a56   :  { %6228 = vsyncpa [#allocation12], 1 }
0x2a57   :  { %6229 = vsyncpa [#allocation15], 1 }
0x2a58   :  { %6230 = vsyncpa [#allocation4], 1 }

</bundles_post_ra>
